<compile_context>
chip_gen: v7x
topology: tpu7x:2x2x1
jax: 0.10.0
libtpu: 0.0.40
codegen_flags: <defaults>
</compile_context>

<pallas_src>
import jax
import jax.numpy as jnp
import numpy as np
from jax.experimental import pallas as pl
from jax.experimental.pallas import tpu as pltpu

N_EMBEDDING = 1280
N_CLASSES = 7
H1, H2, H3 = 768, 512, 64
H3_PAD = 128   # pad the 64-wide hidden layer to 128 lanes
OUT_PAD = 128  # pad the 7-wide logits to 128 lanes (sliced back in the wrapper)


def _round_up(x, m):
    return (x + m - 1) // m * m


def _cls_mlp_kernel(cls_ref, w1_ref, b1_ref, w2_ref, b2_ref,
                    w3_ref, b3_ref, w4_ref, b4_ref, out_ref):
    # cls_ref: [TB, 1280] bf16 tile of CLS embeddings; weights bf16, biases f32.
    x = cls_ref[...]

    h = jnp.dot(x, w1_ref[...], preferred_element_type=jnp.float32) + b1_ref[...]
    h = jnp.maximum(h, 0.0).astype(w2_ref.dtype)
    # Dropout(0.5): identity in eval mode.
    h = jnp.dot(h, w2_ref[...], preferred_element_type=jnp.float32) + b2_ref[...]
    h = jnp.maximum(h, 0.0).astype(w3_ref.dtype)
    # Dropout(0.5): identity in eval mode.
    h = jnp.dot(h, w3_ref[...], preferred_element_type=jnp.float32) + b3_ref[...]
    h = jnp.maximum(h, 0.0).astype(w4_ref.dtype)
    logits = jnp.dot(h, w4_ref[...], preferred_element_type=jnp.float32) + b4_ref[...]

    out_ref[...] = logits.astype(out_ref.dtype)  # [TB, 128] lane-dense store


def init_classifier_params(key):
    """Deterministic f32 init matching nn.Linear default (uniform +/- 1/sqrt(fan_in))."""
    dims = [N_EMBEDDING, H1, H2, H3, N_CLASSES]
    params = []
    keys = jax.random.split(key, len(dims) - 1)
    for k, (din, dout) in zip(keys, zip(dims[:-1], dims[1:])):
        kw, kb = jax.random.split(k)
        bound = 1.0 / float(np.sqrt(din))
        w = jax.random.uniform(kw, (din, dout), jnp.float32, -bound, bound)
        b = jax.random.uniform(kb, (1, dout), jnp.float32, -bound, bound)
        params += [w, b]
    return params


def _prepare_kernel_params(params, compute_dtype=jnp.bfloat16):
    """Cast weights to bf16 and zero-pad the narrow last two layers to 128 lanes."""
    w1, b1, w2, b2, w3, b3, w4, b4 = params
    w3p = jnp.pad(w3, ((0, 0), (0, H3_PAD - w3.shape[1])))
    b3p = jnp.pad(b3, ((0, 0), (0, H3_PAD - b3.shape[1])))
    w4p = jnp.pad(w4, ((0, H3_PAD - w4.shape[0]), (0, OUT_PAD - w4.shape[1])))
    b4p = jnp.pad(b4, ((0, 0), (0, OUT_PAD - b4.shape[1])))
    ws = [w.astype(compute_dtype) for w in (w1, w2, w3p, w4p)]
    bs = [b.astype(jnp.float32) for b in (b1, b2, b3p, b4p)]
    return [ws[0], bs[0], ws[1], bs[1], ws[2], bs[2], ws[3], bs[3]]


def esm_multilabel_cls_forward(token_representations, labels, params,
                               *, compute_dtype=jnp.bfloat16, block_b=256):
    """Eval-mode forward: returns dict(model_outputs=logits, labels=labels)."""
    # TODO(synk): the pretrained ESM-1b backbone is not reimplemented in Pallas;
    # its layer-33 token representations are the input of this head.
    # CLS-only slice in the wrapper -> the kernel never touches [B, L, D].
    cls = token_representations[:, 0, :].astype(compute_dtype)  # [B, 1280]
    B = cls.shape[0]

    tb = min(block_b, _round_up(B, 16))          # 16 = bf16 sublane pack
    b_pad = _round_up(B, tb)
    if b_pad != B:
        cls = jnp.pad(cls, ((0, b_pad - B), (0, 0)))

    kparams = _prepare_kernel_params(params, compute_dtype)

    in_specs = [pl.BlockSpec((tb, N_EMBEDDING), lambda i: (i, 0))]
    for p in kparams:
        # Constant block index -> weights/biases stay resident across batch tiles.
        in_specs.append(pl.BlockSpec(p.shape, lambda i: (0, 0)))
    out_spec = pl.BlockSpec((tb, OUT_PAD), lambda i: (i, 0))

    flops = 2 * b_pad * (N_EMBEDDING * H1 + H1 * H2 + H2 * H3_PAD + H3_PAD * OUT_PAD)
    bytes_accessed = (cls.size * cls.dtype.itemsize
                      + sum(int(p.size) * p.dtype.itemsize for p in kparams)
                      + b_pad * OUT_PAD * 4)

    logits_pad = pl.pallas_call(
        _cls_mlp_kernel,
        out_shape=jax.ShapeDtypeStruct((b_pad, OUT_PAD), jnp.float32),
        grid=(b_pad // tb,),
        in_specs=in_specs,
        out_specs=out_spec,
        compiler_params=pltpu.CompilerParams(
            dimension_semantics=("parallel",)),
        cost_estimate=pl.CostEstimate(flops=flops, transcendentals=0,
                                      bytes_accessed=int(bytes_accessed)),
    )(cls, *kparams)

    # output_logits.squeeze(dim=-1) is a no-op here (last dim is n_classes=7, not 1).
    logits = logits_pad[:B, :N_CLASSES]
    return dict(model_outputs=logits, labels=labels)


def _reference_forward(token_representations, params, compute_dtype=jnp.bfloat16):
    """Plain-JAX reference with the same bf16-operand / f32-accumulation recipe."""
    x = token_representations[:, 0, :].astype(compute_dtype)
    w1, b1, w2, b2, w3, b3, w4, b4 = params

    def lin(h, w, b):
        return jnp.dot(h, w.astype(compute_dtype),
                       preferred_element_type=jnp.float32) + b

    h = jnp.maximum(lin(x, w1, b1), 0.0).astype(compute_dtype)
    h = jnp.maximum(lin(h, w2, b2), 0.0).astype(compute_dtype)
    h = jnp.maximum(lin(h, w3, b3), 0.0).astype(compute_dtype)
    return lin(h, w4, b4)


if __name__ == "__main__":
    key = jax.random.PRNGKey(0)
    k_tok, k_lab, k_par = jax.random.split(key, 3)

    B, L = 2, 8
    token_representations = jax.random.normal(k_tok, (B, L, N_EMBEDDING), jnp.float32)
    labels = (jax.random.uniform(k_lab, (B, N_CLASSES)) > 0.5).astype(jnp.float32)
    params = init_classifier_params(k_par)

    results = esm_multilabel_cls_forward(token_representations, labels, params)
    logits = jax.block_until_ready(results["model_outputs"])
    assert logits.shape == (B, N_CLASSES)

    ref = _reference_forward(token_representations, params)
    np.testing.assert_allclose(np.asarray(logits), np.asarray(ref),
                               rtol=1e-2, atol=1e-2)

    print("KERNEL_OK")
</pallas_src>

<mosaic_0001>
module attributes {stable_mosaic.version = 11 : i64} {
  func.func @_cls_mlp_kernel(%arg0: i32, %arg1: memref<16x1280xbf16, #tpu.memory_space<vmem>>, %arg2: memref<1280x768xbf16, #tpu.memory_space<vmem>>, %arg3: memref<1x768xf32, #tpu.memory_space<vmem>>, %arg4: memref<768x512xbf16, #tpu.memory_space<vmem>>, %arg5: memref<1x512xf32, #tpu.memory_space<vmem>>, %arg6: memref<512x128xbf16, #tpu.memory_space<vmem>>, %arg7: memref<1x128xf32, #tpu.memory_space<vmem>>, %arg8: memref<128x128xbf16, #tpu.memory_space<vmem>>, %arg9: memref<1x128xf32, #tpu.memory_space<vmem>>, %arg10: memref<16x128xf32, #tpu.memory_space<vmem>>) attributes {dimension_semantics = [#tpu.dimension_semantics<parallel>], iteration_bounds = array<i64: 1>, scalar_prefetch = 0 : i64, scratch_operands = 0 : i64, tpu.core_type = #tpu.core_type<tc>, window_params = [{transform_indices = @transform_0, window_bounds = array<i64: 16, 1280>}, {pipeline_mode = #tpu.pipeline_mode<synchronous>, transform_indices = @transform_1, window_bounds = array<i64: 1280, 768>}, {pipeline_mode = #tpu.pipeline_mode<synchronous>, transform_indices = @transform_2, window_bounds = array<i64: 1, 768>}, {pipeline_mode = #tpu.pipeline_mode<synchronous>, transform_indices = @transform_3, window_bounds = array<i64: 768, 512>}, {pipeline_mode = #tpu.pipeline_mode<synchronous>, transform_indices = @transform_4, window_bounds = array<i64: 1, 512>}, {pipeline_mode = #tpu.pipeline_mode<synchronous>, transform_indices = @transform_5, window_bounds = array<i64: 512, 128>}, {pipeline_mode = #tpu.pipeline_mode<synchronous>, transform_indices = @transform_6, window_bounds = array<i64: 1, 128>}, {pipeline_mode = #tpu.pipeline_mode<synchronous>, transform_indices = @transform_7, window_bounds = array<i64: 128, 128>}, {pipeline_mode = #tpu.pipeline_mode<synchronous>, transform_indices = @transform_8, window_bounds = array<i64: 1, 128>}, {transform_indices = @transform_9, window_bounds = array<i64: 16, 128>}]} {
    %c0 = arith.constant 0 : index
    %c0_0 = arith.constant 0 : index
    %0 = vector.load %arg1[%c0, %c0_0] : memref<16x1280xbf16, #tpu.memory_space<vmem>>, vector<16x1280xbf16>
    %c0_1 = arith.constant 0 : index
    %c0_2 = arith.constant 0 : index
    %1 = vector.load %arg2[%c0_1, %c0_2] : memref<1280x768xbf16, #tpu.memory_space<vmem>>, vector<1280x768xbf16>
    %cst = arith.constant dense<0.000000e+00> : vector<16x768xf32>
    %2 = tpu.matmul %0, %1, %cst {dimension_numbers = #tpu.dot_dimension_numbers<[1], [0], [0], [1], [0, 0, 1, 1], [], []>} : vector<16x1280xbf16>, vector<1280x768xbf16>, vector<16x768xf32> -> vector<16x768xf32>
    %c0_3 = arith.constant 0 : index
    %c0_4 = arith.constant 0 : index
    %3 = vector.load %arg3[%c0_3, %c0_4] : memref<1x768xf32, #tpu.memory_space<vmem>>, vector<1x768xf32>
    %4 = vector.broadcast %3 : vector<1x768xf32> to vector<16x768xf32>
    %5 = arith.addf %2, %4 : vector<16x768xf32>
    %cst_5 = arith.constant 0.000000e+00 : f32
    %6 = vector.broadcast %cst_5 : f32 to vector<16x768xf32>
    %7 = arith.maximumf %5, %6 : vector<16x768xf32>
    %8 = arith.truncf %7 : vector<16x768xf32> to vector<16x768xbf16>
    %c0_6 = arith.constant 0 : index
    %c0_7 = arith.constant 0 : index
    %9 = vector.load %arg4[%c0_6, %c0_7] : memref<768x512xbf16, #tpu.memory_space<vmem>>, vector<768x512xbf16>
    %cst_8 = arith.constant dense<0.000000e+00> : vector<16x512xf32>
    %10 = tpu.matmul %8, %9, %cst_8 {dimension_numbers = #tpu.dot_dimension_numbers<[1], [0], [0], [1], [0, 0, 1, 1], [], []>} : vector<16x768xbf16>, vector<768x512xbf16>, vector<16x512xf32> -> vector<16x512xf32>
    %c0_9 = arith.constant 0 : index
    %c0_10 = arith.constant 0 : index
    %11 = vector.load %arg5[%c0_9, %c0_10] : memref<1x512xf32, #tpu.memory_space<vmem>>, vector<1x512xf32>
    %12 = vector.broadcast %11 : vector<1x512xf32> to vector<16x512xf32>
    %13 = arith.addf %10, %12 : vector<16x512xf32>
    %cst_11 = arith.constant 0.000000e+00 : f32
    %14 = vector.broadcast %cst_11 : f32 to vector<16x512xf32>
    %15 = arith.maximumf %13, %14 : vector<16x512xf32>
    %16 = arith.truncf %15 : vector<16x512xf32> to vector<16x512xbf16>
    %c0_12 = arith.constant 0 : index
    %c0_13 = arith.constant 0 : index
    %17 = vector.load %arg6[%c0_12, %c0_13] : memref<512x128xbf16, #tpu.memory_space<vmem>>, vector<512x128xbf16>
    %cst_14 = arith.constant dense<0.000000e+00> : vector<16x128xf32>
    %18 = tpu.matmul %16, %17, %cst_14 {dimension_numbers = #tpu.dot_dimension_numbers<[1], [0], [0], [1], [0, 0, 1, 1], [], []>} : vector<16x512xbf16>, vector<512x128xbf16>, vector<16x128xf32> -> vector<16x128xf32>
    %c0_15 = arith.constant 0 : index
    %c0_16 = arith.constant 0 : index
    %19 = vector.load %arg7[%c0_15, %c0_16] : memref<1x128xf32, #tpu.memory_space<vmem>>, vector<1x128xf32>
    %20 = vector.broadcast %19 : vector<1x128xf32> to vector<16x128xf32>
    %21 = arith.addf %18, %20 : vector<16x128xf32>
    %cst_17 = arith.constant 0.000000e+00 : f32
    %22 = vector.broadcast %cst_17 : f32 to vector<16x128xf32>
    %23 = arith.maximumf %21, %22 : vector<16x128xf32>
    %24 = arith.truncf %23 : vector<16x128xf32> to vector<16x128xbf16>
    %c0_18 = arith.constant 0 : index
    %c0_19 = arith.constant 0 : index
    %25 = vector.load %arg8[%c0_18, %c0_19] : memref<128x128xbf16, #tpu.memory_space<vmem>>, vector<128x128xbf16>
    %cst_20 = arith.constant dense<0.000000e+00> : vector<16x128xf32>
    %26 = tpu.matmul %24, %25, %cst_20 {dimension_numbers = #tpu.dot_dimension_numbers<[1], [0], [0], [1], [0, 0, 1, 1], [], []>} : vector<16x128xbf16>, vector<128x128xbf16>, vector<16x128xf32> -> vector<16x128xf32>
    %c0_21 = arith.constant 0 : index
    %c0_22 = arith.constant 0 : index
    %27 = vector.load %arg9[%c0_21, %c0_22] : memref<1x128xf32, #tpu.memory_space<vmem>>, vector<1x128xf32>
    %28 = vector.broadcast %27 : vector<1x128xf32> to vector<16x128xf32>
    %29 = arith.addf %26, %28 : vector<16x128xf32>
    %c0_23 = arith.constant 0 : index
    %c0_24 = arith.constant 0 : index
    %30 = vector.load %arg10[%c0_23, %c0_24] : memref<16x128xf32, #tpu.memory_space<vmem>>, vector<16x128xf32>
    tpu.vector_store %arg10[%c0_23, %c0_24], %29 {strides = array<i32>} : memref<16x128xf32, #tpu.memory_space<vmem>>, vector<16x128xf32>,
    return
  }
  func.func @transform_0(%arg0: i32) -> (i32, i32) {
    %c0_i32 = arith.constant 0 : i32
    %c0_i32_0 = arith.constant 0 : i32
    return %arg0, %c0_i32 : i32, i32
  }
  func.func @transform_1(%arg0: i32) -> (i32, i32) {
    %c0_i32 = arith.constant 0 : i32
    %c0_i32_0 = arith.constant 0 : i32
    %c0_i32_1 = arith.constant 0 : i32
    return %c0_i32, %c0_i32_0 : i32, i32
  }
  func.func @transform_2(%arg0: i32) -> (i32, i32) {
    %c0_i32 = arith.constant 0 : i32
    %c0_i32_0 = arith.constant 0 : i32
    %c0_i32_1 = arith.constant 0 : i32
    return %c0_i32, %c0_i32_0 : i32, i32
  }
  func.func @transform_3(%arg0: i32) -> (i32, i32) {
    %c0_i32 = arith.constant 0 : i32
    %c0_i32_0 = arith.constant 0 : i32
    %c0_i32_1 = arith.constant 0 : i32
    return %c0_i32, %c0_i32_0 : i32, i32
  }
  func.func @transform_4(%arg0: i32) -> (i32, i32) {
    %c0_i32 = arith.constant 0 : i32
    %c0_i32_0 = arith.constant 0 : i32
    %c0_i32_1 = arith.constant 0 : i32
    return %c0_i32, %c0_i32_0 : i32, i32
  }
  func.func @transform_5(%arg0: i32) -> (i32, i32) {
    %c0_i32 = arith.constant 0 : i32
    %c0_i32_0 = arith.constant 0 : i32
    %c0_i32_1 = arith.constant 0 : i32
    return %c0_i32, %c0_i32_0 : i32, i32
  }
  func.func @transform_6(%arg0: i32) -> (i32, i32) {
    %c0_i32 = arith.constant 0 : i32
    %c0_i32_0 = arith.constant 0 : i32
    %c0_i32_1 = arith.constant 0 : i32
    return %c0_i32, %c0_i32_0 : i32, i32
  }
  func.func @transform_7(%arg0: i32) -> (i32, i32) {
    %c0_i32 = arith.constant 0 : i32
    %c0_i32_0 = arith.constant 0 : i32
    %c0_i32_1 = arith.constant 0 : i32
    return %c0_i32, %c0_i32_0 : i32, i32
  }
  func.func @transform_8(%arg0: i32) -> (i32, i32) {
    %c0_i32 = arith.constant 0 : i32
    %c0_i32_0 = arith.constant 0 : i32
    %c0_i32_1 = arith.constant 0 : i32
    return %c0_i32, %c0_i32_0 : i32, i32
  }
  func.func @transform_9(%arg0: i32) -> (i32, i32) {
    %c0_i32 = arith.constant 0 : i32
    %c0_i32_0 = arith.constant 0 : i32
    return %arg0, %c0_i32 : i32, i32
  }
}

</mosaic_0001>

<bundles_post_ra>
// kernel: tpu_custom_call.1
= control target key start
LH: loop header
LB: loop body
LE: loop exit
PB: predicated region body
PF: predicated region fallthrough
CT: control target
= control target key end

     0   :  { %14 = vsyncpa [#allocation3], 0  ;;  %s8166_s0 = inlined_call_operand.hbm [shape: bf16[16,1280], index: 0, kind: input, shape index: {}]   ;;  %s8167_s1 = inlined_call_operand.hbm [shape: bf16[1280,768], index: 1, kind: input, shape index: {}]   ;;  %s8168_s2 = inlined_call_operand.hbm [shape: f32[1,768], index: 2, kind: input, shape index: {}]   ;;  %s8169_s3 = inlined_call_operand.hbm [shape: bf16[768,512], index: 3, kind: input, shape index: {}]   ;;  %s8170_s4 = inlined_call_operand.hbm [shape: f32[1,512], index: 4, kind: input, shape index: {}]   ;;  %s8171_s5 = inlined_call_operand.hbm [shape: bf16[512,128], index: 5, kind: input, shape index: {}]   ;;  %s8172_s6 = inlined_call_operand.hbm [shape: f32[1,128], index: 6, kind: input, shape index: {}]   ;;  %s8173_s7 = inlined_call_operand.hbm [shape: bf16[128,128], index: 7, kind: input, shape index: {}]   ;;  %s8174_s8 = inlined_call_operand.hbm [shape: f32[1,128], index: 8, kind: input, shape index: {}]   ;;  %s8175_s9 = inlined_call_operand.hbm [shape: f32[16,128], index: 9, kind: output, shape index: {}]  }
   0x1   :  { %15 = vsyncpa [#allocation6], 0 }
   0x2   :  { %16 = vsyncpa [#allocation9], 0 }
   0x3   :  { %17 = vsyncpa [#allocation12], 0 }
   0x4   :  { %18 = vsyncpa [#allocation15], 0 }
   0x5   :  { %19 = vsyncpa [#allocation4], 0  ;;  %s7918_s30 = smov [#allocation5]   ;;  %s7686_s13 = scalar_lea.hbm %s8167_s1, 61440 }
   0x6   :  { %s37_s10 = sshll.u32 %s7918_s30, 4  ;;  %p7687_p0 = scmp.ne.s32.totalorder %s8167_s1, %s7686_s13  ;;  %s38_s10 = int_to_ptr.vmem [resolvable:$true] %s37_s10 }
   0x7   :  { %p7690_p1 = scmp.lt.u32.totalorder %s7686_s13, %s8167_s1 }
   0x9   :  { %p7692_p2 = pnand %p7690_p1, %p7687_p0 }
   0xb   :  { %7695 = shalt.err (!%p7692_p2)
}
   0xc   :  { %s7696_s18 = scalar_lea.vmem %s38_s10, 61440  ;;  %p7701_p4 = scmp.lt.s32.totalorder %s38_s10, %s38_s10 }
   0xd   :  { %p7697_p3 = scmp.ne.s32.totalorder %s38_s10, %s7696_s18  ;;  %p7702_p5 = scmp.lt.s32.totalorder %s7696_s18, %s7696_s18 }
   0xf   :  { %p7703_p6 = por %p7702_p5, %p7701_p4 }
  0x11   :  { %p7704_p7 = pnand %p7703_p6, %p7697_p3 }
  0x13   :  { %7707 = shalt.err (!%p7704_p7)
}
  0x14   :  { %s7919_s19 = smov 384   ;;  %s7920_s20 = smov 24  }
  0x15   :  { %43 = dma.hbm_to_vmem [thread:$0]  %s8167_s1, 61440, %s38_s10, [#allocation6], %s7919_s19, %s7919_s19, %s7920_s20  }
  0x16   :  { %s7921_s23 = smov [#allocation8]   ;;  %s7708_s27 = scalar_lea.hbm %s8169_s3, 24576 }
  0x17   :  { %s59_s24 = sshll.u32 %s7921_s23, 4  ;;  %p7709_p8 = scmp.ne.s32.totalorder %s8169_s3, %s7708_s27  ;;  %s60_s24 = int_to_ptr.vmem [resolvable:$true] %s59_s24 }
  0x18   :  { %p7712_p9 = scmp.lt.u32.totalorder %s7708_s27, %s8169_s3 }
  0x1a   :  { %p7714_p10 = pnand %p7712_p9, %p7709_p8 }
  0x1c   :  { %7717 = shalt.err (!%p7714_p10)
}
  0x1d   :  { %s7718_s12 = scalar_lea.vmem %s60_s24, 24576  ;;  %p7723_p12 = scmp.lt.s32.totalorder %s60_s24, %s60_s24 }
  0x1e   :  { %p7719_p11 = scmp.ne.s32.totalorder %s60_s24, %s7718_s12  ;;  %p7724_p13 = scmp.lt.s32.totalorder %s7718_s12, %s7718_s12 }
  0x20   :  { %p7725_p0 = por %p7724_p13, %p7723_p12 }
  0x22   :  { %p7726_p1 = pnand %p7725_p0, %p7719_p11 }
  0x24   :  { %7729 = shalt.err (!%p7726_p1)
}
  0x25   :  { %s7922_s1 = smov 256   ;;  %s7923_s10 = smov 16  }
  0x26   :  { %65 = dma.hbm_to_vmem [thread:$0]  %s8169_s3, 24576, %s60_s24, [#allocation9], %s7922_s1, %s7922_s1, %s7923_s10  }
  0x27   :  { %s7924_s15 = smov [#allocation11]   ;;  %s7730_s19 = scalar_lea.hbm %s8171_s5, 4096 }
  0x28   :  { %s81_s16 = sshll.u32 %s7924_s15, 4  ;;  %p7731_p2 = scmp.ne.s32.totalorder %s8171_s5, %s7730_s19  ;;  %s82_s16 = int_to_ptr.vmem [resolvable:$true] %s81_s16 }
  0x29   :  { %p7734_p3 = scmp.lt.u32.totalorder %s7730_s19, %s8171_s5 }
  0x2b   :  { %p7736_p4 = pnand %p7734_p3, %p7731_p2 }
  0x2d   :  { %7739 = shalt.err (!%p7736_p4)
}
  0x2e   :  { %s7740_s25 = scalar_lea.vmem %s82_s16, 4096  ;;  %p7745_p6 = scmp.lt.s32.totalorder %s82_s16, %s82_s16 }
  0x2f   :  { %p7741_p5 = scmp.ne.s32.totalorder %s82_s16, %s7740_s25  ;;  %p7746_p7 = scmp.lt.s32.totalorder %s7740_s25, %s7740_s25 }
  0x31   :  { %p7747_p8 = por %p7746_p7, %p7745_p6 }
  0x33   :  { %p7748_p9 = pnand %p7747_p8, %p7741_p5 }
  0x35   :  { %7751 = shalt.err (!%p7748_p9)
}
  0x36   :  { %s7925_s3 = smov 64   ;;  %s7926_s24 = smov 4  }
  0x37   :  { %87 = dma.hbm_to_vmem [thread:$0]  %s8171_s5, 4096, %s82_s16, [#allocation12], %s7925_s3, %s7925_s3, %s7926_s24  }
  0x38   :  { %s7927_s28 = smov [#allocation14]   ;;  %s7928_s30 = smov [#allocation2]  }
  0x39   :  { %s103_s29 = sshll.u32 %s7927_s28, 4  ;;  %s25_s11 = sshll.u32 %s7928_s30, 4  ;;  %s104_s29 = int_to_ptr.vmem [resolvable:$true] %s103_s29  ;;  %s26_s11 = int_to_ptr.vmem [resolvable:$true] %s25_s11 }
  0x3a   :  { %s7752_s10 = scalar_lea.hbm %s8173_s7, 1024 }
  0x3b   :  { %p7753_p10 = scmp.ne.s32.totalorder %s8173_s7, %s7752_s10  ;;  %p7756_p11 = scmp.lt.u32.totalorder %s7752_s10, %s8173_s7 }
  0x3d   :  { %p7758_p12 = pnand %p7756_p11, %p7753_p10 }
  0x3f   :  { %7761 = shalt.err (!%p7758_p12)
}
  0x40   :  { %s7762_s5 = scalar_lea.vmem %s104_s29, 1024  ;;  %p7767_p0 = scmp.lt.s32.totalorder %s104_s29, %s104_s29 }
  0x41   :  { %p7763_p13 = scmp.ne.s32.totalorder %s104_s29, %s7762_s5  ;;  %p7768_p1 = scmp.lt.s32.totalorder %s7762_s5, %s7762_s5 }
  0x43   :  { %p7769_p2 = por %p7768_p1, %p7767_p0 }
  0x45   :  { %p7770_p3 = pnand %p7769_p2, %p7763_p13 }
  0x47   :  { %7773 = shalt.err (!%p7770_p3)
}
  0x48   :  { %109 = dma.hbm_to_vmem [thread:$0]  %s8173_s7, 1024, %s104_s29, [#allocation15], %s7925_s3, %s7925_s3, %s7926_s24  }
  0x49   :  { %s7774_s21 = scalar_lea.hbm %s8166_s0, 1280 }
  0x4a   :  { %p7775_p4 = scmp.ne.s32.totalorder %s8166_s0, %s7774_s21  ;;  %p7778_p5 = scmp.lt.u32.totalorder %s7774_s21, %s8166_s0 }
  0x4c   :  { %p7780_p6 = pnand %p7778_p5, %p7775_p4 }
  0x4e   :  { %7783 = shalt.err (!%p7780_p6)
}
  0x4f   :  { %s7784_s27 = scalar_lea.vmem %s26_s11, 1280  ;;  %p7789_p8 = scmp.lt.s32.totalorder %s26_s11, %s26_s11 }
  0x50   :  { %p7785_p7 = scmp.ne.s32.totalorder %s26_s11, %s7784_s27  ;;  %p7790_p9 = scmp.lt.s32.totalorder %s7784_s27, %s7784_s27 }
  0x52   :  { %p7791_p10 = por %p7790_p9, %p7789_p8 }
  0x54   :  { %p7792_p11 = pnand %p7791_p10, %p7785_p7 }
  0x56   :  { %7795 = shalt.err (!%p7792_p11)
}
  0x57   :  { %s7929_s7 = smov 640   ;;  %s7930_s3 = smov 40  }
  0x58   :  { %31 = dma.hbm_to_vmem [thread:$0]  %s8166_s0, 1280, %s26_s11, [#allocation3], %s7929_s7, %s7929_s7, %s7930_s3  }
  0x59   :  { %s7931_s29 = smov [#allocation7]   ;;  %s7932_s12 = smov [#allocation10]  }
  0x5a   :  { %s50_s30 = sshll.u32 %s7931_s29, 4  ;;  %s72_s1 = sshll.u32 %s7932_s12, 4  ;;  %s51_s30 = int_to_ptr.vmem [resolvable:$true] %s50_s30  ;;  %s73_s1 = int_to_ptr.vmem [resolvable:$true] %s72_s1 }
  0x5b   :  { %s7796_s14 = scalar_lea.hbm %s8168_s2, 96 }
  0x5c   :  { %p7797_p12 = scmp.ne.s32.totalorder %s8168_s2, %s7796_s14  ;;  %p7800_p13 = scmp.lt.u32.totalorder %s7796_s14, %s8168_s2 }
  0x5e   :  { %p7802_p0 = pnand %p7800_p13, %p7797_p12 }
  0x60   :  { %7805 = shalt.err (!%p7802_p0)
}
  0x61   :  { %s7806_s0 = scalar_lea.vmem %s51_s30, 96  ;;  %p7811_p2 = scmp.lt.s32.totalorder %s51_s30, %s51_s30 }
  0x62   :  { %p7807_p1 = scmp.ne.s32.totalorder %s51_s30, %s7806_s0  ;;  %p7812_p3 = scmp.lt.s32.totalorder %s7806_s0, %s7806_s0 }
  0x64   :  { %p7813_p4 = por %p7812_p3, %p7811_p2 }
  0x66   :  { %p7814_p5 = pnand %p7813_p4, %p7807_p1 }
  0x68   :  { %7817 = shalt.err (!%p7814_p5)
}
  0x69   :  { %53 = dma.hbm_to_vmem [thread:$0]  %s8168_s2, 96, %s51_s30, [#allocation6]  }
  0x6a   :  { %s7818_s21 = scalar_lea.hbm %s8170_s4, 64 }
  0x6b   :  { %p7819_p6 = scmp.ne.s32.totalorder %s8170_s4, %s7818_s21  ;;  %p7822_p7 = scmp.lt.u32.totalorder %s7818_s21, %s8170_s4 }
  0x6d   :  { %p7824_p8 = pnand %p7822_p7, %p7819_p6 }
  0x6f   :  { %7827 = shalt.err (!%p7824_p8)
}
  0x70   :  { %s7828_s27 = scalar_lea.vmem %s73_s1, 64  ;;  %p7833_p10 = scmp.lt.s32.totalorder %s73_s1, %s73_s1 }
  0x71   :  { %p7829_p9 = scmp.ne.s32.totalorder %s73_s1, %s7828_s27  ;;  %p7834_p11 = scmp.lt.s32.totalorder %s7828_s27, %s7828_s27 }
  0x73   :  { %p7835_p12 = por %p7834_p11, %p7833_p10 }
  0x75   :  { %p7836_p13 = pnand %p7835_p12, %p7829_p9 }
  0x77   :  { %7839 = shalt.err (!%p7836_p13)
}
  0x78   :  { %75 = dma.hbm_to_vmem [thread:$0]  %s8170_s4, 64, %s73_s1, [#allocation9]  }
  0x79   :  { %s7933_s3 = smov [#allocation13]   ;;  %s7934_s28 = smov [#allocation16]  }
  0x7a   :  { %s94_s24 = sshll.u32 %s7933_s3, 4  ;;  %s116_s29 = sshll.u32 %s7934_s28, 4  ;;  %s95_s24 = int_to_ptr.vmem [resolvable:$true] %s94_s24  ;;  %s117_s29 = int_to_ptr.vmem [resolvable:$true] %s116_s29 }
  0x7b   :  { %s7840_s10 = scalar_lea.hbm %s8172_s6, 16 }
  0x7c   :  { %p7841_p0 = scmp.ne.s32.totalorder %s8172_s6, %s7840_s10  ;;  %p7844_p1 = scmp.lt.u32.totalorder %s7840_s10, %s8172_s6 }
  0x7e   :  { %p7846_p2 = pnand %p7844_p1, %p7841_p0 }
  0x80   :  { %7849 = shalt.err (!%p7846_p2)
}
  0x81   :  { %s7850_s4 = scalar_lea.vmem %s95_s24, 16  ;;  %s7854_s1 = scalar_lea.vmem %s95_s24, 32 }
  0x82   :  { %p7851_p3 = scmp.ne.s32.totalorder %s95_s24, %s7850_s4  ;;  %p7855_p4 = scmp.lt.s32.totalorder %s95_s24, %s95_s24 }
  0x83   :  { %p7856_p5 = scmp.lt.s32.totalorder %s7854_s1, %s7850_s4 }
  0x85   :  { %p7857_p6 = por %p7856_p5, %p7855_p4 }
  0x87   :  { %p7858_p7 = pnand %p7857_p6, %p7851_p3 }
  0x89   :  { %7861 = shalt.err (!%p7858_p7)
}
  0x8a   :  { %97 = dma.hbm_to_vmem [thread:$0]  %s8172_s6, 16, %s95_s24, [#allocation12]  }
  0x8b   :  { %s7862_s18 = scalar_lea.hbm %s8174_s8, 16 }
  0x8c   :  { %p7863_p8 = scmp.ne.s32.totalorder %s8174_s8, %s7862_s18  ;;  %p7866_p9 = scmp.lt.u32.totalorder %s7862_s18, %s8174_s8 }
  0x8e   :  { %p7868_p10 = pnand %p7866_p9, %p7863_p8 }
  0x90   :  { %7871 = shalt.err (!%p7868_p10)
}
  0x91   :  { %s7872_s23 = scalar_lea.vmem %s117_s29, 16  ;;  %s7876_s25 = scalar_lea.vmem %s117_s29, 32 }
  0x92   :  { %p7873_p11 = scmp.ne.s32.totalorder %s117_s29, %s7872_s23  ;;  %p7877_p12 = scmp.lt.s32.totalorder %s117_s29, %s117_s29 }
  0x93   :  { %p7878_p13 = scmp.lt.s32.totalorder %s7876_s25, %s7872_s23 }
  0x95   :  { %p7879_p0 = por %p7878_p13, %p7877_p12 }
  0x97   :  { %p7880_p1 = pnand %p7879_p0, %p7873_p11 }
  0x99   :  { %7883 = shalt.err (!%p7880_p1)
}
  0x9a   :  { %119 = dma.hbm_to_vmem [thread:$0]  %s8174_s8, 16, %s117_s29, [#allocation15]  }
  0x9b   :  { %7906 = dma.done.wait [#allocation3], 1280  }
  0x9c   :  { %7907 = vsyncadd [#allocation3], 4294966016 }
  0x9d   :  { %7908 = dma.done.wait [#allocation6], 61536  }
  0x9e   :  { %7909 = vsyncadd [#allocation6], 4294905760 }
  0x9f   :  { %7910 = dma.done.wait [#allocation9], 24640  }
  0xa0   :  { %7911 = vsyncadd [#allocation9], 4294942656 }
  0xa1   :  { %7912 = dma.done.wait [#allocation12], 4112  }
  0xa2   :  { %7913 = vsyncadd [#allocation12], 4294963184 }
  0xa3   :  { %7914 = dma.done.wait [#allocation15], 1040  }
  0xa4   :  { %7915 = vsyncadd [#allocation15], 4294966256  ;;  %v6613_v0 = vld [vmem:[#allocation5 + $0x4] ss:$24 sps:$4 sm:$0xff]   ;;  %v6617_v2 = vld [vmem:[#allocation5] ss:$24 sps:$4 sm:$0xff]  }
  0xa5   :  { %v6615_v1 = vld [vmem:[#allocation5 + $0xc] ss:$24 sps:$4 sm:$0xff]   ;;  %3120 = vmatprep.subr.bf16.mxu0 %v6613_v0  ;;  %v6618_v3 = vld [vmem:[#allocation5 + $0x8] ss:$24 sps:$4 sm:$0xff]   ;;  %v6621_v5 = vld [vmem:[#allocation5 + $0x3c] ss:$24 sps:$4 sm:$0xff]  }
  0xa6   :  { %3335 = vmatprep.subr.bf16.mxu1 %v6615_v1  ;;  %v6619_v4 = vld [vmem:[#allocation5 + $0x34] ss:$24 sps:$4 sm:$0xff]   ;;  %3121 = vmatpush1.bf16.msra.mxu0 %v6617_v2  ;;  %v6623_v6 = vld [vmem:[#allocation5 + $0x30] ss:$24 sps:$4 sm:$0xff]   ;;  %v6625_v8 = vld [vmem:[#allocation5 + $0x64] ss:$24 sps:$4 sm:$0xff]  }
  0xa7   :  { %3336 = vmatpush1.bf16.msra.mxu1 %v6618_v3  ;;  %3122 = vmatprep.subr.bf16.mxu0 %v6619_v4  ;;  %v6624_v7 = vld [vmem:[#allocation5 + $0x38] ss:$24 sps:$4 sm:$0xff]   ;;  %v6627_v9 = vld [vmem:[#allocation5 + $0x6c] ss:$24 sps:$4 sm:$0xff]   ;;  %v6630_v11 = vld [vmem:[#allocation5 + $0x68] ss:$24 sps:$4 sm:$0xff]  }
  0xa8   :  { %3337 = vmatprep.subr.bf16.mxu1 %v6621_v5  ;;  %v6629_v10 = vld [vmem:[#allocation5 + $0x60] ss:$24 sps:$4 sm:$0xff]   ;;  %v6631_v12 = vld [vmem:[#allocation5 + $0x94] ss:$24 sps:$4 sm:$0xff]   ;;  %v6635_v14 = vld [vmem:[#allocation5 + $0x90] ss:$24 sps:$4 sm:$0xff]  }
  0xa9   :  { %v6633_v13 = vld [vmem:[#allocation5 + $0x9c] ss:$24 sps:$4 sm:$0xff]   ;;  %v6636_v15 = vld [vmem:[#allocation5 + $0x98] ss:$24 sps:$4 sm:$0xff]   ;;  %v6639_v17 = vld [vmem:[#allocation5 + $0xcc] ss:$24 sps:$4 sm:$0xff]  }
  0xaa   :  { %3123 = vmatpush1.bf16.msra.mxu0 %v6623_v6  ;;  %v6637_v16 = vld [vmem:[#allocation5 + $0xc4] ss:$24 sps:$4 sm:$0xff]   ;;  %v6641_v18 = vld [vmem:[#allocation5 + $0xc0] ss:$24 sps:$4 sm:$0xff]   ;;  %v6643_v20 = vld [vmem:[#allocation5 + $0xf4] ss:$24 sps:$4 sm:$0xff]  }
  0xab   :  { %3338 = vmatpush1.bf16.msra.mxu1 %v6624_v7  ;;  %3124 = vmatprep.subr.bf16.mxu0 %v6625_v8  ;;  %v6642_v19 = vld [vmem:[#allocation5 + $0xc8] ss:$24 sps:$4 sm:$0xff]   ;;  %v6645_v21 = vld [vmem:[#allocation5 + $0xfc] ss:$24 sps:$4 sm:$0xff]   ;;  %v6648_v23 = vld [vmem:[#allocation5 + $0xf8] ss:$24 sps:$4 sm:$0xff]  }
  0xac   :  { %3339 = vmatprep.subr.bf16.mxu1 %v6627_v9  ;;  %v6647_v22 = vld [vmem:[#allocation5 + $0xf0] ss:$24 sps:$4 sm:$0xff]   ;;  %v6649_v24 = vld [vmem:[#allocation5 + $0x124] ss:$24 sps:$4 sm:$0xff]   ;;  %v6653_v26 = vld [vmem:[#allocation5 + $0x120] ss:$24 sps:$4 sm:$0xff]  }
  0xad   :  { %v6651_v25 = vld [vmem:[#allocation5 + $0x12c] ss:$24 sps:$4 sm:$0xff]   ;;  %v6654_v27 = vld [vmem:[#allocation5 + $0x128] ss:$24 sps:$4 sm:$0xff]   ;;  %v6657_v29 = vld [vmem:[#allocation5 + $0x15c] ss:$24 sps:$4 sm:$0xff]  }
  0xae   :  { %3125 = vmatpush1.bf16.msra.mxu0 %v6629_v10  ;;  %v6655_v28 = vld [vmem:[#allocation5 + $0x154] ss:$24 sps:$4 sm:$0xff]   ;;  %v6659_v30 = vld [vmem:[#allocation5 + $0x150] ss:$24 sps:$4 sm:$0xff]   ;;  %v6661_v32 = vld [vmem:[#allocation5 + $0x184] ss:$24 sps:$4 sm:$0xff]  }
  0xaf   :  { %3340 = vmatpush1.bf16.msra.mxu1 %v6630_v11  ;;  %3126 = vmatprep.subr.bf16.mxu0 %v6631_v12  ;;  %v6660_v31 = vld [vmem:[#allocation5 + $0x158] ss:$24 sps:$4 sm:$0xff]   ;;  %v6663_v33 = vld [vmem:[#allocation5 + $0x18c] ss:$24 sps:$4 sm:$0xff]   ;;  %v6666_v35 = vld [vmem:[#allocation5 + $0x188] ss:$24 sps:$4 sm:$0xff]  }
  0xb0   :  { %3341 = vmatprep.subr.bf16.mxu1 %v6633_v13  ;;  %v6665_v34 = vld [vmem:[#allocation5 + $0x180] ss:$24 sps:$4 sm:$0xff]   ;;  %v6667_v36 = vld [vmem:[#allocation5 + $0x1b4] ss:$24 sps:$4 sm:$0xff]   ;;  %v6671_v38 = vld [vmem:[#allocation5 + $0x1b0] ss:$24 sps:$4 sm:$0xff]  }
  0xb1   :  { %v6669_v37 = vld [vmem:[#allocation5 + $0x1bc] ss:$24 sps:$4 sm:$0xff]   ;;  %v6672_v39 = vld [vmem:[#allocation5 + $0x1b8] ss:$24 sps:$4 sm:$0xff]   ;;  %v6675_v41 = vld [vmem:[#allocation5 + $0x1ec] ss:$24 sps:$4 sm:$0xff]  }
  0xb2   :  { %3127 = vmatpush1.bf16.msra.mxu0 %v6635_v14  ;;  %v6673_v40 = vld [vmem:[#allocation5 + $0x1e4] ss:$24 sps:$4 sm:$0xff]   ;;  %v6677_v42 = vld [vmem:[#allocation5 + $0x1e0] ss:$24 sps:$4 sm:$0xff]   ;;  %v6679_v44 = vld [vmem:[#allocation5 + $0x214] ss:$24 sps:$4 sm:$0xff]  }
  0xb3   :  { %3342 = vmatpush1.bf16.msra.mxu1 %v6636_v15  ;;  %3128 = vmatprep.subr.bf16.mxu0 %v6637_v16  ;;  %v6678_v43 = vld [vmem:[#allocation5 + $0x1e8] ss:$24 sps:$4 sm:$0xff]   ;;  %v6681_v45 = vld [vmem:[#allocation5 + $0x21c] ss:$24 sps:$4 sm:$0xff]   ;;  %v6684_v48 = vld [vmem:[#allocation5 + $0x218] ss:$24 sps:$4 sm:$0xff]  }
  0xb4   :  { %3343 = vmatprep.subr.bf16.mxu1 %v6639_v17  ;;  %v6683_v46 = vld [vmem:[#allocation5 + $0x210] ss:$24 sps:$4 sm:$0xff]   ;;  %v6709_v47 = vld [vmem:[#allocation2 + $0x4] ss:$40 sps:$4 sm:$0xff]   ;;  %v6687_v50 = vld [vmem:[#allocation5 + $0x24c] ss:$24 sps:$4 sm:$0xff]  }
  0xb5   :  { %v6685_v49 = vld [vmem:[#allocation5 + $0x244] ss:$24 sps:$4 sm:$0xff]   ;;  %3152 = vmatprep.mubr.bf16.mxu0 %v6709_v47  ;;  %3367 = vmatprep.mubr.bf16.mxu1 %v6709_v47  ;;  %v6689_v51 = vld [vmem:[#allocation5 + $0x240] ss:$24 sps:$4 sm:$0xff]   ;;  %v6691_v53 = vld [vmem:[#allocation5 + $0x274] ss:$24 sps:$4 sm:$0xff]  }
  0xb6   :  { %3129 = vmatpush1.bf16.msra.mxu0 %v6641_v18  ;;  %v6690_v52 = vld [vmem:[#allocation5 + $0x248] ss:$24 sps:$4 sm:$0xff]   ;;  %v6693_v54 = vld [vmem:[#allocation5 + $0x27c] ss:$24 sps:$4 sm:$0xff]   ;;  %v6696_v56 = vld [vmem:[#allocation5 + $0x278] ss:$24 sps:$4 sm:$0xff]  }
  0xb7   :  { %3344 = vmatpush1.bf16.msra.mxu1 %v6642_v19  ;;  %3130 = vmatprep.subr.bf16.mxu0 %v6643_v20  ;;  %v6695_v55 = vld [vmem:[#allocation5 + $0x270] ss:$24 sps:$4 sm:$0xff]   ;;  %v6697_v57 = vld [vmem:[#allocation5 + $0x2a4] ss:$24 sps:$4 sm:$0xff]   ;;  %v6701_v59 = vld [vmem:[#allocation5 + $0x2a0] ss:$24 sps:$4 sm:$0xff]  }
  0xb8   :  { %3345 = vmatprep.subr.bf16.mxu1 %v6645_v21  ;;  %v6699_v58 = vld [vmem:[#allocation5 + $0x2ac] ss:$24 sps:$4 sm:$0xff]   ;;  %v6702_v60 = vld [vmem:[#allocation5 + $0x2a8] ss:$24 sps:$4 sm:$0xff]   ;;  %v6705_v62 = vld [vmem:[#allocation5 + $0x2dc] ss:$24 sps:$4 sm:$0xff]  }
  0xb9   :  { %v6703_v61 = vld [vmem:[#allocation5 + $0x2d4] ss:$24 sps:$4 sm:$0xff]   ;;  %v6707_v63 = vld [vmem:[#allocation5 + $0x2d0] ss:$24 sps:$4 sm:$0xff]   ;;  %v6713_v1 = vld [vmem:[#allocation5 + $0x304] ss:$24 sps:$4 sm:$0xff]  }
  0xba   :  { %3131 = vmatpush1.bf16.msra.mxu0 %v6647_v22  ;;  %v6708_v0 = vld [vmem:[#allocation5 + $0x2d8] ss:$24 sps:$4 sm:$0xff]   ;;  %v6716_v2 = vld [vmem:[#allocation5 + $0x30c] ss:$24 sps:$4 sm:$0xff]   ;;  %v6714_v4 = vld [vmem:[#allocation5 + $0x308] ss:$24 sps:$4 sm:$0xff]  }
  0xbb   :  { %3346 = vmatpush1.bf16.msra.mxu1 %v6648_v23  ;;  %3132 = vmatprep.subr.bf16.mxu0 %v6649_v24  ;;  %v6711_v3 = vld [vmem:[#allocation5 + $0x300] ss:$24 sps:$4 sm:$0xff]   ;;  %v6720_v6 = vld [vmem:[#allocation5 + $0x334] ss:$24 sps:$4 sm:$0xff]   ;;  %v6718_v8 = vld [vmem:[#allocation5 + $0x330] ss:$24 sps:$4 sm:$0xff]  }
  0xbc   :  { %3347 = vmatprep.subr.bf16.mxu1 %v6651_v25  ;;  %v6717_v5 = vld [vmem:[#allocation2] ss:$40 sps:$4 sm:$0xff]   ;;  %v6723_v7 = vld [vmem:[#allocation5 + $0x33c] ss:$24 sps:$4 sm:$0xff]   ;;  %v6729_v11 = vld [vmem:[#allocation5 + $0x36c] ss:$24 sps:$4 sm:$0xff]  }
  0xbd   :  { %v6721_v9 = vld [vmem:[#allocation5 + $0x338] ss:$24 sps:$4 sm:$0xff]   ;;  %v6726_v10 = vld [vmem:[#allocation5 + $0x364] ss:$24 sps:$4 sm:$0xff]   ;;  %v6727_v13 = vld [vmem:[#allocation5 + $0x368] ss:$24 sps:$4 sm:$0xff]  }
  0xbe   :  { %3133 = vmatpush1.bf16.msra.mxu0 %v6653_v26  ;;  %v6724_v12 = vld [vmem:[#allocation5 + $0x360] ss:$24 sps:$4 sm:$0xff]   ;;  %v6732_v14 = vld [vmem:[#allocation5 + $0x394] ss:$24 sps:$4 sm:$0xff]   ;;  %v6730_v16 = vld [vmem:[#allocation5 + $0x390] ss:$24 sps:$4 sm:$0xff]  }
  0xbf   :  { %3348 = vmatpush1.bf16.msra.mxu1 %v6654_v27  ;;  %3134 = vmatprep.subr.bf16.mxu0 %v6655_v28  ;;  %v6735_v15 = vld [vmem:[#allocation5 + $0x39c] ss:$24 sps:$4 sm:$0xff]   ;;  %v6733_v17 = vld [vmem:[#allocation5 + $0x398] ss:$24 sps:$4 sm:$0xff]   ;;  %v6741_v19 = vld [vmem:[#allocation5 + $0x3cc] ss:$24 sps:$4 sm:$0xff]  }
  0xc0   :  { %3349 = vmatprep.subr.bf16.mxu1 %v6657_v29  ;;  %v6738_v18 = vld [vmem:[#allocation5 + $0x3c4] ss:$24 sps:$4 sm:$0xff]   ;;  %v6736_v20 = vld [vmem:[#allocation5 + $0x3c0] ss:$24 sps:$4 sm:$0xff]   ;;  %v6744_v22 = vld [vmem:[#allocation5 + $0x3f4] ss:$24 sps:$4 sm:$0xff]  }
  0xc1   :  { %v6739_v21 = vld [vmem:[#allocation5 + $0x3c8] ss:$24 sps:$4 sm:$0xff]   ;;  %v6747_v23 = vld [vmem:[#allocation5 + $0x3fc] ss:$24 sps:$4 sm:$0xff]   ;;  %v6745_v25 = vld [vmem:[#allocation5 + $0x3f8] ss:$24 sps:$4 sm:$0xff]  }
  0xc2   :  { %3135 = vmatpush1.bf16.msra.mxu0 %v6659_v30  ;;  %v6742_v24 = vld [vmem:[#allocation5 + $0x3f0] ss:$24 sps:$4 sm:$0xff]   ;;  %v6750_v26 = vld [vmem:[#allocation5 + $0x424] ss:$24 sps:$4 sm:$0xff]   ;;  %v6748_v28 = vld [vmem:[#allocation5 + $0x420] ss:$24 sps:$4 sm:$0xff]  }
  0xc3   :  { %3350 = vmatpush1.bf16.msra.mxu1 %v6660_v31  ;;  %3136 = vmatprep.subr.bf16.mxu0 %v6661_v32  ;;  %v6753_v27 = vld [vmem:[#allocation5 + $0x42c] ss:$24 sps:$4 sm:$0xff]   ;;  %v6751_v29 = vld [vmem:[#allocation5 + $0x428] ss:$24 sps:$4 sm:$0xff]   ;;  %v6759_v32 = vld [vmem:[#allocation5 + $0x45c] ss:$24 sps:$4 sm:$0xff]  }
  0xc4   :  { %3351 = vmatprep.subr.bf16.mxu1 %v6663_v33  ;;  %v6810_v30 = vld [vmem:[#allocation2 + $0xc] ss:$40 sps:$4 sm:$0xff]   ;;  %v6756_v31 = vld [vmem:[#allocation5 + $0x454] ss:$24 sps:$4 sm:$0xff]   ;;  %v6754_v33 = vld [vmem:[#allocation5 + $0x450] ss:$24 sps:$4 sm:$0xff]  }
  0xc5   :  { %v6780_v47 = vld [vmem:[#allocation5 + $0x514] ss:$24 sps:$4 sm:$0xff]   ;;  %vm7936_vm0 = vmmov 0   ;;  %s7937_s8 = smov [#allocation17]  }
  0xc6   :  { %3137 = vmatpush1.bf16.msra.mxu0 %v6665_v34  ;;  %v6757_v34 = vld [vmem:[#allocation5 + $0x458] ss:$24 sps:$4 sm:$0xff]   ;;  %s5694_s27 = sshll.u32 %s7937_s8, 4  ;;  %s5695_s27 = int_to_ptr.vmem [resolvable:$true] %s5694_s27 }
  0xc7   :  { %3352 = vmatpush1.bf16.msra.mxu1 %v6666_v35  ;;  %3138 = vmatprep.subr.bf16.mxu0 %v6667_v36  ;;  %v6762_v35 = vld [vmem:[#allocation5 + $0x484] ss:$24 sps:$4 sm:$0xff]   ;;  %s7884_s2 = scalar_lea.vmem %s5695_s27, 256  ;;  %p7889_p3 = scmp.lt.s32.totalorder %s5695_s27, %s5695_s27 }
  0xc8   :  { %3353 = vmatprep.subr.bf16.mxu1 %v6669_v37  ;;  %v6765_v36 = vld [vmem:[#allocation5 + $0x48c] ss:$24 sps:$4 sm:$0xff]   ;;  %v6760_v37 = vld [vmem:[#allocation5 + $0x480] ss:$24 sps:$4 sm:$0xff]   ;;  %p7885_p2 = scmp.ne.s32.totalorder %s5695_s27, %s7884_s2  ;;  %p7890_p4 = scmp.lt.s32.totalorder %s7884_s2, %s7884_s2 }
  0xca   :  { %3139 = vmatpush1.bf16.msra.mxu0 %v6671_v38  ;;  %v6763_v38 = vld [vmem:[#allocation5 + $0x488] ss:$24 sps:$4 sm:$0xff]   ;;  %p7891_p5 = por %p7890_p4, %p7889_p3 }
  0xcb   :  { %3354 = vmatpush1.bf16.msra.mxu1 %v6672_v39  ;;  %3140 = vmatprep.subr.bf16.mxu0 %v6673_v40  ;;  %v6768_v39 = vld [vmem:[#allocation5 + $0x4b4] ss:$24 sps:$4 sm:$0xff]  }
  0xcc   :  { %3355 = vmatprep.subr.bf16.mxu1 %v6675_v41  ;;  %v6771_v40 = vld [vmem:[#allocation5 + $0x4bc] ss:$24 sps:$4 sm:$0xff]   ;;  %v6766_v41 = vld [vmem:[#allocation5 + $0x4b0] ss:$24 sps:$4 sm:$0xff]   ;;  %p7892_p6 = pnand %p7891_p5, %p7885_p2 }
  0xce   :  { %3141 = vmatpush1.bf16.msra.mxu0 %v6677_v42  ;;  %v6769_v42 = vld [vmem:[#allocation5 + $0x4b8] ss:$24 sps:$4 sm:$0xff]  }
  0xcf   :  { %3356 = vmatpush1.bf16.msra.mxu1 %v6678_v43  ;;  %3142 = vmatprep.subr.bf16.mxu0 %v6679_v44  ;;  %v6774_v43 = vld [vmem:[#allocation5 + $0x4e4] ss:$24 sps:$4 sm:$0xff]  }
  0xd0   :  { %3357 = vmatprep.subr.bf16.mxu1 %v6681_v45  ;;  %v6777_v44 = vld [vmem:[#allocation5 + $0x4ec] ss:$24 sps:$4 sm:$0xff]   ;;  %v6772_v45 = vld [vmem:[#allocation5 + $0x4e0] ss:$24 sps:$4 sm:$0xff]  }
  0xd2   :  { %3143 = vmatpush1.bf16.msra.mxu0 %v6683_v46  ;;  %v6775_v46 = vld [vmem:[#allocation5 + $0x4e8] ss:$24 sps:$4 sm:$0xff]  }
  0xd3   :  { %3358 = vmatpush1.bf16.msra.mxu1 %v6684_v48  ;;  %3144 = vmatprep.subr.bf16.mxu0 %v6685_v49  ;;  %v6783_v48 = vld [vmem:[#allocation5 + $0x51c] ss:$24 sps:$4 sm:$0xff]   ;;  %v6778_v49 = vld [vmem:[#allocation5 + $0x510] ss:$24 sps:$4 sm:$0xff]  }
  0xd4   :  { %3359 = vmatprep.subr.bf16.mxu1 %v6687_v50  ;;  %v6781_v50 = vld [vmem:[#allocation5 + $0x518] ss:$24 sps:$4 sm:$0xff]  }
  0xd6   :  { %3145 = vmatpush1.bf16.msra.mxu0 %v6689_v51  ;;  %v6786_v51 = vld [vmem:[#allocation5 + $0x544] ss:$24 sps:$4 sm:$0xff]  }
  0xd7   :  { %3360 = vmatpush1.bf16.msra.mxu1 %v6690_v52  ;;  %3146 = vmatprep.subr.bf16.mxu0 %v6691_v53  ;;  %v6789_v52 = vld [vmem:[#allocation5 + $0x54c] ss:$24 sps:$4 sm:$0xff]   ;;  %v6784_v53 = vld [vmem:[#allocation5 + $0x540] ss:$24 sps:$4 sm:$0xff]  }
  0xd8   :  { %3361 = vmatprep.subr.bf16.mxu1 %v6693_v54  ;;  %v6787_v54 = vld [vmem:[#allocation5 + $0x548] ss:$24 sps:$4 sm:$0xff]  }
  0xda   :  { %3147 = vmatpush1.bf16.msra.mxu0 %v6695_v55  ;;  %v6792_v55 = vld [vmem:[#allocation5 + $0x574] ss:$24 sps:$4 sm:$0xff]  }
  0xdb   :  { %3362 = vmatpush1.bf16.msra.mxu1 %v6696_v56  ;;  %3148 = vmatprep.subr.bf16.mxu0 %v6697_v57  ;;  %v6795_v56 = vld [vmem:[#allocation5 + $0x57c] ss:$24 sps:$4 sm:$0xff]   ;;  %v6790_v57 = vld [vmem:[#allocation5 + $0x570] ss:$24 sps:$4 sm:$0xff]  }
  0xdc   :  { %3363 = vmatprep.subr.bf16.mxu1 %v6699_v58  ;;  %v6793_v58 = vld [vmem:[#allocation5 + $0x578] ss:$24 sps:$4 sm:$0xff]  }
  0xde   :  { %3149 = vmatpush1.bf16.msra.mxu0 %v6701_v59  ;;  %v6798_v59 = vld [vmem:[#allocation5 + $0x5a4] ss:$24 sps:$4 sm:$0xff]  }
  0xdf   :  { %3364 = vmatpush1.bf16.msra.mxu1 %v6702_v60  ;;  %3150 = vmatprep.subr.bf16.mxu0 %v6703_v61  ;;  %v6801_v60 = vld [vmem:[#allocation5 + $0x5ac] ss:$24 sps:$4 sm:$0xff]   ;;  %v6796_v61 = vld [vmem:[#allocation5 + $0x5a0] ss:$24 sps:$4 sm:$0xff]  }
  0xe0   :  { %3365 = vmatprep.subr.bf16.mxu1 %v6705_v62  ;;  %v6799_v62 = vld [vmem:[#allocation5 + $0x5a8] ss:$24 sps:$4 sm:$0xff]  }
  0xe2   :  { %3151 = vmatpush1.bf16.msra.mxu0 %v6707_v63  ;;  %v6804_v63 = vld [vmem:[#allocation5 + $0x5d4] ss:$24 sps:$4 sm:$0xff]  }
  0xe3   :  { %3366 = vmatpush1.bf16.msra.mxu1 %v6708_v0  ;;  %3163 = vmatprep.subr.bf16.mxu0 %v6713_v1  ;;  %v6807_v0 = vld [vmem:[#allocation5 + $0x5dc] ss:$24 sps:$4 sm:$0xff]   ;;  %v6802_v1 = vld [vmem:[#allocation5 + $0x5d0] ss:$24 sps:$4 sm:$0xff]  }
  0xe4   :  { %3378 = vmatprep.subr.bf16.mxu1 %v6716_v2  ;;  %v6805_v2 = vld [vmem:[#allocation5 + $0x5d8] ss:$24 sps:$4 sm:$0xff]  }
  0xe5   :  { %3153 = vmatmul.mubr.bf16.vlgmr.msra.gmra.mrb[0].mxu0 %v6717_v5 }
  0xe6   :  { %3368 = vmatmul.mubr.bf16.vlgmr.msra.gmra.mrb[0].mxu1 %v6717_v5  ;;  %3164 = vmatpush1.bf16.msra.mxu0 %v6711_v3  ;;  %v6813_v3 = vld [vmem:[#allocation5 + $0x604] ss:$24 sps:$4 sm:$0xff]   ;;  %v6808_v5 = vld [vmem:[#allocation2 + $0x8] ss:$40 sps:$4 sm:$0xff]  }
  0xe7   :  { %3379 = vmatpush1.bf16.msra.mxu1 %v6714_v4  ;;  %3165 = vmatprep.subr.bf16.mxu0 %v6720_v6  ;;  %v6816_v4 = vld [vmem:[#allocation5 + $0x60c] ss:$24 sps:$4 sm:$0xff]   ;;  %v6811_v6 = vld [vmem:[#allocation5 + $0x600] ss:$24 sps:$4 sm:$0xff]  }
  0xe8   :  { %3380 = vmatprep.subr.bf16.mxu1 %v6723_v7  ;;  %3195 = vmatprep.mubr.bf16.mxu0 %v6810_v30  ;;  %v6814_v7 = vld [vmem:[#allocation5 + $0x608] ss:$24 sps:$4 sm:$0xff]  }
  0xe9   :  { %3410 = vmatprep.mubr.bf16.mxu1 %v6810_v30  ;;  %v6852_v30 = vld [vmem:[#allocation5 + $0x72c] ss:$24 sps:$4 sm:$0xff]  }
  0xea   :  { %3166 = vmatpush1.bf16.msra.mxu0 %v6718_v8  ;;  %v6819_v8 = vld [vmem:[#allocation5 + $0x634] ss:$24 sps:$4 sm:$0xff]  }
  0xeb   :  { %3381 = vmatpush1.bf16.msra.mxu1 %v6721_v9  ;;  %3167 = vmatprep.subr.bf16.mxu0 %v6726_v10  ;;  %v6822_v9 = vld [vmem:[#allocation5 + $0x63c] ss:$24 sps:$4 sm:$0xff]   ;;  %v6817_v10 = vld [vmem:[#allocation5 + $0x630] ss:$24 sps:$4 sm:$0xff]  }
  0xec   :  { %3382 = vmatprep.subr.bf16.mxu1 %v6729_v11  ;;  %v6820_v11 = vld [vmem:[#allocation5 + $0x638] ss:$24 sps:$4 sm:$0xff]  }
  0xee   :  { %3168 = vmatpush1.bf16.msra.mxu0 %v6724_v12  ;;  %v6909_v12 = vld [vmem:[#allocation2 + $0x14] ss:$40 sps:$4 sm:$0xff]  }
  0xef   :  { %3383 = vmatpush1.bf16.msra.mxu1 %v6727_v13  ;;  %3169 = vmatprep.subr.bf16.mxu0 %v6732_v14  ;;  %v6825_v13 = vld [vmem:[#allocation5 + $0x664] ss:$24 sps:$4 sm:$0xff]  }
  0xf0   :  { %3384 = vmatprep.subr.bf16.mxu1 %v6735_v15  ;;  %v6828_v14 = vld [vmem:[#allocation5 + $0x66c] ss:$24 sps:$4 sm:$0xff]   ;;  %v6823_v15 = vld [vmem:[#allocation5 + $0x660] ss:$24 sps:$4 sm:$0xff]  }
  0xf2   :  { %3170 = vmatpush1.bf16.msra.mxu0 %v6730_v16  ;;  %v6826_v16 = vld [vmem:[#allocation5 + $0x668] ss:$24 sps:$4 sm:$0xff]  }
  0xf3   :  { %3385 = vmatpush1.bf16.msra.mxu1 %v6733_v17  ;;  %3171 = vmatprep.subr.bf16.mxu0 %v6738_v18  ;;  %v6831_v17 = vld [vmem:[#allocation5 + $0x694] ss:$24 sps:$4 sm:$0xff]  }
  0xf4   :  { %3386 = vmatprep.subr.bf16.mxu1 %v6741_v19  ;;  %v6834_v18 = vld [vmem:[#allocation5 + $0x69c] ss:$24 sps:$4 sm:$0xff]   ;;  %v6829_v19 = vld [vmem:[#allocation5 + $0x690] ss:$24 sps:$4 sm:$0xff]  }
  0xf6   :  { %3172 = vmatpush1.bf16.msra.mxu0 %v6736_v20  ;;  %v6832_v20 = vld [vmem:[#allocation5 + $0x698] ss:$24 sps:$4 sm:$0xff]  }
  0xf7   :  { %3387 = vmatpush1.bf16.msra.mxu1 %v6739_v21  ;;  %3173 = vmatprep.subr.bf16.mxu0 %v6744_v22  ;;  %v6837_v21 = vld [vmem:[#allocation5 + $0x6c4] ss:$24 sps:$4 sm:$0xff]  }
  0xf8   :  { %3388 = vmatprep.subr.bf16.mxu1 %v6747_v23  ;;  %v6840_v22 = vld [vmem:[#allocation5 + $0x6cc] ss:$24 sps:$4 sm:$0xff]   ;;  %v6835_v23 = vld [vmem:[#allocation5 + $0x6c0] ss:$24 sps:$4 sm:$0xff]  }
  0xfa   :  { %3174 = vmatpush1.bf16.msra.mxu0 %v6742_v24  ;;  %v6838_v24 = vld [vmem:[#allocation5 + $0x6c8] ss:$24 sps:$4 sm:$0xff]  }
  0xfb   :  { %3389 = vmatpush1.bf16.msra.mxu1 %v6745_v25  ;;  %3175 = vmatprep.subr.bf16.mxu0 %v6750_v26  ;;  %v6843_v25 = vld [vmem:[#allocation5 + $0x6f4] ss:$24 sps:$4 sm:$0xff]  }
  0xfc   :  { %3390 = vmatprep.subr.bf16.mxu1 %v6753_v27  ;;  %v6846_v26 = vld [vmem:[#allocation5 + $0x6fc] ss:$24 sps:$4 sm:$0xff]   ;;  %v6841_v27 = vld [vmem:[#allocation5 + $0x6f0] ss:$24 sps:$4 sm:$0xff]  }
  0xfe   :  { %3176 = vmatpush1.bf16.msra.mxu0 %v6748_v28  ;;  %v6844_v28 = vld [vmem:[#allocation5 + $0x6f8] ss:$24 sps:$4 sm:$0xff]  }
  0xff   :  { %3391 = vmatpush1.bf16.msra.mxu1 %v6751_v29  ;;  %3177 = vmatprep.subr.bf16.mxu0 %v6756_v31  ;;  %v6849_v29 = vld [vmem:[#allocation5 + $0x724] ss:$24 sps:$4 sm:$0xff]   ;;  %v6847_v31 = vld [vmem:[#allocation5 + $0x720] ss:$24 sps:$4 sm:$0xff]  }
 0x100   :  { %3392 = vmatprep.subr.bf16.mxu1 %v6759_v32  ;;  %v6850_v32 = vld [vmem:[#allocation5 + $0x728] ss:$24 sps:$4 sm:$0xff]  }
 0x102   :  { %3178 = vmatpush1.bf16.msra.mxu0 %v6754_v33  ;;  %v6855_v33 = vld [vmem:[#allocation5 + $0x754] ss:$24 sps:$4 sm:$0xff]  }
 0x103   :  { %3393 = vmatpush1.bf16.msra.mxu1 %v6757_v34  ;;  %3179 = vmatprep.subr.bf16.mxu0 %v6762_v35  ;;  %v6858_v34 = vld [vmem:[#allocation5 + $0x75c] ss:$24 sps:$4 sm:$0xff]   ;;  %v6853_v35 = vld [vmem:[#allocation5 + $0x750] ss:$24 sps:$4 sm:$0xff]  }
 0x104   :  { %3394 = vmatprep.subr.bf16.mxu1 %v6765_v36  ;;  %v6856_v36 = vld [vmem:[#allocation5 + $0x758] ss:$24 sps:$4 sm:$0xff]  }
 0x106   :  { %3180 = vmatpush1.bf16.msra.mxu0 %v6760_v37  ;;  %v6861_v37 = vld [vmem:[#allocation5 + $0x784] ss:$24 sps:$4 sm:$0xff]  }
 0x107   :  { %3395 = vmatpush1.bf16.msra.mxu1 %v6763_v38  ;;  %3181 = vmatprep.subr.bf16.mxu0 %v6768_v39  ;;  %v6864_v38 = vld [vmem:[#allocation5 + $0x78c] ss:$24 sps:$4 sm:$0xff]   ;;  %v6859_v39 = vld [vmem:[#allocation5 + $0x780] ss:$24 sps:$4 sm:$0xff]  }
 0x108   :  { %3396 = vmatprep.subr.bf16.mxu1 %v6771_v40  ;;  %v6862_v40 = vld [vmem:[#allocation5 + $0x788] ss:$24 sps:$4 sm:$0xff]  }
 0x10a   :  { %3182 = vmatpush1.bf16.msra.mxu0 %v6766_v41  ;;  %v6867_v41 = vld [vmem:[#allocation5 + $0x7b4] ss:$24 sps:$4 sm:$0xff]  }
 0x10b   :  { %3397 = vmatpush1.bf16.msra.mxu1 %v6769_v42  ;;  %3183 = vmatprep.subr.bf16.mxu0 %v6774_v43  ;;  %v6870_v42 = vld [vmem:[#allocation5 + $0x7bc] ss:$24 sps:$4 sm:$0xff]   ;;  %v6865_v43 = vld [vmem:[#allocation5 + $0x7b0] ss:$24 sps:$4 sm:$0xff]  }
 0x10c   :  { %3398 = vmatprep.subr.bf16.mxu1 %v6777_v44  ;;  %v6868_v44 = vld [vmem:[#allocation5 + $0x7b8] ss:$24 sps:$4 sm:$0xff]  }
 0x10e   :  { %3184 = vmatpush1.bf16.msra.mxu0 %v6772_v45  ;;  %v6873_v45 = vld [vmem:[#allocation5 + $0x7e4] ss:$24 sps:$4 sm:$0xff]  }
 0x10f   :  { %3399 = vmatpush1.bf16.msra.mxu1 %v6775_v46  ;;  %3185 = vmatprep.subr.bf16.mxu0 %v6780_v47  ;;  %v6876_v46 = vld [vmem:[#allocation5 + $0x7ec] ss:$24 sps:$4 sm:$0xff]   ;;  %v6871_v47 = vld [vmem:[#allocation5 + $0x7e0] ss:$24 sps:$4 sm:$0xff]  }
 0x110   :  { %3400 = vmatprep.subr.bf16.mxu1 %v6783_v48  ;;  %v6874_v48 = vld [vmem:[#allocation5 + $0x7e8] ss:$24 sps:$4 sm:$0xff]  }
 0x112   :  { %3186 = vmatpush1.bf16.msra.mxu0 %v6778_v49  ;;  %v6879_v49 = vld [vmem:[#allocation5 + $0x814] ss:$24 sps:$4 sm:$0xff]  }
 0x113   :  { %3401 = vmatpush1.bf16.msra.mxu1 %v6781_v50  ;;  %3187 = vmatprep.subr.bf16.mxu0 %v6786_v51  ;;  %v6882_v50 = vld [vmem:[#allocation5 + $0x81c] ss:$24 sps:$4 sm:$0xff]   ;;  %v6877_v51 = vld [vmem:[#allocation5 + $0x810] ss:$24 sps:$4 sm:$0xff]  }
 0x114   :  { %3402 = vmatprep.subr.bf16.mxu1 %v6789_v52  ;;  %v6880_v52 = vld [vmem:[#allocation5 + $0x818] ss:$24 sps:$4 sm:$0xff]  }
 0x116   :  { %3188 = vmatpush1.bf16.msra.mxu0 %v6784_v53  ;;  %v6885_v53 = vld [vmem:[#allocation5 + $0x844] ss:$24 sps:$4 sm:$0xff]  }
 0x117   :  { %3403 = vmatpush1.bf16.msra.mxu1 %v6787_v54  ;;  %3189 = vmatprep.subr.bf16.mxu0 %v6792_v55  ;;  %v6888_v54 = vld [vmem:[#allocation5 + $0x84c] ss:$24 sps:$4 sm:$0xff]   ;;  %v6883_v55 = vld [vmem:[#allocation5 + $0x840] ss:$24 sps:$4 sm:$0xff]  }
 0x118   :  { %3404 = vmatprep.subr.bf16.mxu1 %v6795_v56  ;;  %v6886_v56 = vld [vmem:[#allocation5 + $0x848] ss:$24 sps:$4 sm:$0xff]  }
 0x11a   :  { %3190 = vmatpush1.bf16.msra.mxu0 %v6790_v57  ;;  %v6891_v57 = vld [vmem:[#allocation5 + $0x874] ss:$24 sps:$4 sm:$0xff]  }
 0x11b   :  { %3405 = vmatpush1.bf16.msra.mxu1 %v6793_v58  ;;  %3191 = vmatprep.subr.bf16.mxu0 %v6798_v59  ;;  %v6894_v58 = vld [vmem:[#allocation5 + $0x87c] ss:$24 sps:$4 sm:$0xff]   ;;  %v6889_v59 = vld [vmem:[#allocation5 + $0x870] ss:$24 sps:$4 sm:$0xff]  }
 0x11c   :  { %3406 = vmatprep.subr.bf16.mxu1 %v6801_v60  ;;  %v6892_v60 = vld [vmem:[#allocation5 + $0x878] ss:$24 sps:$4 sm:$0xff]  }
 0x11e   :  { %3192 = vmatpush1.bf16.msra.mxu0 %v6796_v61  ;;  %v6897_v61 = vld [vmem:[#allocation5 + $0x8a4] ss:$24 sps:$4 sm:$0xff]  }
 0x11f   :  { %3407 = vmatpush1.bf16.msra.mxu1 %v6799_v62  ;;  %3193 = vmatprep.subr.bf16.mxu0 %v6804_v63  ;;  %v6900_v62 = vld [vmem:[#allocation5 + $0x8ac] ss:$24 sps:$4 sm:$0xff]   ;;  %v6895_v63 = vld [vmem:[#allocation5 + $0x8a0] ss:$24 sps:$4 sm:$0xff]  }
 0x120   :  { %3408 = vmatprep.subr.bf16.mxu1 %v6807_v0  ;;  %v6898_v0 = vld [vmem:[#allocation5 + $0x8a8] ss:$24 sps:$4 sm:$0xff]  }
 0x122   :  { %3194 = vmatpush1.bf16.msra.mxu0 %v6802_v1  ;;  %v6903_v1 = vld [vmem:[#allocation5 + $0x8d4] ss:$24 sps:$4 sm:$0xff]  }
 0x123   :  { %3409 = vmatpush1.bf16.msra.mxu1 %v6805_v2  ;;  %3206 = vmatprep.subr.bf16.mxu0 %v6813_v3  ;;  %v6906_v2 = vld [vmem:[#allocation5 + $0x8dc] ss:$24 sps:$4 sm:$0xff]   ;;  %v6901_v3 = vld [vmem:[#allocation5 + $0x8d0] ss:$24 sps:$4 sm:$0xff]  }
 0x124   :  { %3421 = vmatprep.subr.bf16.mxu1 %v6816_v4  ;;  %v6904_v4 = vld [vmem:[#allocation5 + $0x8d8] ss:$24 sps:$4 sm:$0xff]  }
 0x125   :  { %3196 = vmatmul.mubr.bf16.vlgmr.msra.gmra.mrb[0].mxu0 %v6808_v5 }
 0x126   :  { %3411 = vmatmul.mubr.bf16.vlgmr.msra.gmra.mrb[0].mxu1 %v6808_v5  ;;  %3207 = vmatpush1.bf16.msra.mxu0 %v6811_v6  ;;  %v6912_v5 = vld [vmem:[#allocation5 + $0x904] ss:$24 sps:$4 sm:$0xff]  }
 0x127   :  { %3422 = vmatpush1.bf16.msra.mxu1 %v6814_v7  ;;  %3208 = vmatprep.subr.bf16.mxu0 %v6819_v8  ;;  %v6915_v6 = vld [vmem:[#allocation5 + $0x90c] ss:$24 sps:$4 sm:$0xff]   ;;  %v6907_v7 = vld [vmem:[#allocation2 + $0x10] ss:$40 sps:$4 sm:$0xff]  }
 0x128   :  { %3423 = vmatprep.subr.bf16.mxu1 %v6822_v9  ;;  %3238 = vmatprep.mubr.bf16.mxu0 %v6909_v12  ;;  %v6910_v8 = vld [vmem:[#allocation5 + $0x900] ss:$24 sps:$4 sm:$0xff]  }
 0x129   :  { %3453 = vmatprep.mubr.bf16.mxu1 %v6909_v12  ;;  %v6913_v9 = vld [vmem:[#allocation5 + $0x908] ss:$24 sps:$4 sm:$0xff]   ;;  %v7008_v12 = vld [vmem:[#allocation2 + $0x1c] ss:$40 sps:$4 sm:$0xff]  }
 0x12a   :  { %3209 = vmatpush1.bf16.msra.mxu0 %v6817_v10  ;;  %v6918_v10 = vld [vmem:[#allocation5 + $0x934] ss:$24 sps:$4 sm:$0xff]  }
 0x12b   :  { %3424 = vmatpush1.bf16.msra.mxu1 %v6820_v11  ;;  %3210 = vmatprep.subr.bf16.mxu0 %v6825_v13  ;;  %v6921_v11 = vld [vmem:[#allocation5 + $0x93c] ss:$24 sps:$4 sm:$0xff]   ;;  %v6916_v13 = vld [vmem:[#allocation5 + $0x930] ss:$24 sps:$4 sm:$0xff]  }
 0x12c   :  { %3425 = vmatprep.subr.bf16.mxu1 %v6828_v14  ;;  %v6919_v14 = vld [vmem:[#allocation5 + $0x938] ss:$24 sps:$4 sm:$0xff]  }
 0x12e   :  { %3211 = vmatpush1.bf16.msra.mxu0 %v6823_v15  ;;  %v6924_v15 = vld [vmem:[#allocation5 + $0x964] ss:$24 sps:$4 sm:$0xff]  }
 0x12f   :  { %3426 = vmatpush1.bf16.msra.mxu1 %v6826_v16  ;;  %3212 = vmatprep.subr.bf16.mxu0 %v6831_v17  ;;  %v6927_v16 = vld [vmem:[#allocation5 + $0x96c] ss:$24 sps:$4 sm:$0xff]   ;;  %v6922_v17 = vld [vmem:[#allocation5 + $0x960] ss:$24 sps:$4 sm:$0xff]  }
 0x130   :  { %3427 = vmatprep.subr.bf16.mxu1 %v6834_v18  ;;  %v6925_v18 = vld [vmem:[#allocation5 + $0x968] ss:$24 sps:$4 sm:$0xff]  }
 0x132   :  { %3213 = vmatpush1.bf16.msra.mxu0 %v6829_v19  ;;  %v6930_v19 = vld [vmem:[#allocation5 + $0x994] ss:$24 sps:$4 sm:$0xff]  }
 0x133   :  { %3428 = vmatpush1.bf16.msra.mxu1 %v6832_v20  ;;  %3214 = vmatprep.subr.bf16.mxu0 %v6837_v21  ;;  %v6933_v20 = vld [vmem:[#allocation5 + $0x99c] ss:$24 sps:$4 sm:$0xff]   ;;  %v6928_v21 = vld [vmem:[#allocation5 + $0x990] ss:$24 sps:$4 sm:$0xff]  }
 0x134   :  { %3429 = vmatprep.subr.bf16.mxu1 %v6840_v22  ;;  %v6931_v22 = vld [vmem:[#allocation5 + $0x998] ss:$24 sps:$4 sm:$0xff]  }
 0x136   :  { %3215 = vmatpush1.bf16.msra.mxu0 %v6835_v23  ;;  %v6936_v23 = vld [vmem:[#allocation5 + $0x9c4] ss:$24 sps:$4 sm:$0xff]  }
 0x137   :  { %3430 = vmatpush1.bf16.msra.mxu1 %v6838_v24  ;;  %3216 = vmatprep.subr.bf16.mxu0 %v6843_v25  ;;  %v6939_v24 = vld [vmem:[#allocation5 + $0x9cc] ss:$24 sps:$4 sm:$0xff]   ;;  %v6934_v25 = vld [vmem:[#allocation5 + $0x9c0] ss:$24 sps:$4 sm:$0xff]  }
 0x138   :  { %3431 = vmatprep.subr.bf16.mxu1 %v6846_v26  ;;  %v6937_v26 = vld [vmem:[#allocation5 + $0x9c8] ss:$24 sps:$4 sm:$0xff]  }
 0x13a   :  { %3217 = vmatpush1.bf16.msra.mxu0 %v6841_v27  ;;  %v6942_v27 = vld [vmem:[#allocation5 + $0x9f4] ss:$24 sps:$4 sm:$0xff]  }
 0x13b   :  { %3432 = vmatpush1.bf16.msra.mxu1 %v6844_v28  ;;  %3218 = vmatprep.subr.bf16.mxu0 %v6849_v29  ;;  %v6945_v28 = vld [vmem:[#allocation5 + $0x9fc] ss:$24 sps:$4 sm:$0xff]   ;;  %v6940_v29 = vld [vmem:[#allocation5 + $0x9f0] ss:$24 sps:$4 sm:$0xff]  }
 0x13c   :  { %3433 = vmatprep.subr.bf16.mxu1 %v6852_v30  ;;  %v6943_v30 = vld [vmem:[#allocation5 + $0x9f8] ss:$24 sps:$4 sm:$0xff]  }
 0x13e   :  { %3219 = vmatpush1.bf16.msra.mxu0 %v6847_v31  ;;  %v6948_v31 = vld [vmem:[#allocation5 + $0xa24] ss:$24 sps:$4 sm:$0xff]  }
 0x13f   :  { %3434 = vmatpush1.bf16.msra.mxu1 %v6850_v32  ;;  %3220 = vmatprep.subr.bf16.mxu0 %v6855_v33  ;;  %v6951_v32 = vld [vmem:[#allocation5 + $0xa2c] ss:$24 sps:$4 sm:$0xff]   ;;  %v6946_v33 = vld [vmem:[#allocation5 + $0xa20] ss:$24 sps:$4 sm:$0xff]  }
 0x140   :  { %3435 = vmatprep.subr.bf16.mxu1 %v6858_v34  ;;  %v6949_v34 = vld [vmem:[#allocation5 + $0xa28] ss:$24 sps:$4 sm:$0xff]  }
 0x142   :  { %3221 = vmatpush1.bf16.msra.mxu0 %v6853_v35  ;;  %v6954_v35 = vld [vmem:[#allocation5 + $0xa54] ss:$24 sps:$4 sm:$0xff]  }
 0x143   :  { %3436 = vmatpush1.bf16.msra.mxu1 %v6856_v36  ;;  %3222 = vmatprep.subr.bf16.mxu0 %v6861_v37  ;;  %v6957_v36 = vld [vmem:[#allocation5 + $0xa5c] ss:$24 sps:$4 sm:$0xff]   ;;  %v6952_v37 = vld [vmem:[#allocation5 + $0xa50] ss:$24 sps:$4 sm:$0xff]  }
 0x144   :  { %3437 = vmatprep.subr.bf16.mxu1 %v6864_v38  ;;  %v6955_v38 = vld [vmem:[#allocation5 + $0xa58] ss:$24 sps:$4 sm:$0xff]  }
 0x146   :  { %3223 = vmatpush1.bf16.msra.mxu0 %v6859_v39  ;;  %v6960_v39 = vld [vmem:[#allocation5 + $0xa84] ss:$24 sps:$4 sm:$0xff]  }
 0x147   :  { %3438 = vmatpush1.bf16.msra.mxu1 %v6862_v40  ;;  %3224 = vmatprep.subr.bf16.mxu0 %v6867_v41  ;;  %v6963_v40 = vld [vmem:[#allocation5 + $0xa8c] ss:$24 sps:$4 sm:$0xff]   ;;  %v6958_v41 = vld [vmem:[#allocation5 + $0xa80] ss:$24 sps:$4 sm:$0xff]  }
 0x148   :  { %3439 = vmatprep.subr.bf16.mxu1 %v6870_v42  ;;  %v6961_v42 = vld [vmem:[#allocation5 + $0xa88] ss:$24 sps:$4 sm:$0xff]  }
 0x14a   :  { %3225 = vmatpush1.bf16.msra.mxu0 %v6865_v43  ;;  %v6966_v43 = vld [vmem:[#allocation5 + $0xab4] ss:$24 sps:$4 sm:$0xff]  }
 0x14b   :  { %3440 = vmatpush1.bf16.msra.mxu1 %v6868_v44  ;;  %3226 = vmatprep.subr.bf16.mxu0 %v6873_v45  ;;  %v6969_v44 = vld [vmem:[#allocation5 + $0xabc] ss:$24 sps:$4 sm:$0xff]   ;;  %v6964_v45 = vld [vmem:[#allocation5 + $0xab0] ss:$24 sps:$4 sm:$0xff]  }
 0x14c   :  { %3441 = vmatprep.subr.bf16.mxu1 %v6876_v46  ;;  %v6967_v46 = vld [vmem:[#allocation5 + $0xab8] ss:$24 sps:$4 sm:$0xff]  }
 0x14e   :  { %3227 = vmatpush1.bf16.msra.mxu0 %v6871_v47  ;;  %v6972_v47 = vld [vmem:[#allocation5 + $0xae4] ss:$24 sps:$4 sm:$0xff]  }
 0x14f   :  { %3442 = vmatpush1.bf16.msra.mxu1 %v6874_v48  ;;  %3228 = vmatprep.subr.bf16.mxu0 %v6879_v49  ;;  %v6975_v48 = vld [vmem:[#allocation5 + $0xaec] ss:$24 sps:$4 sm:$0xff]   ;;  %v6970_v49 = vld [vmem:[#allocation5 + $0xae0] ss:$24 sps:$4 sm:$0xff]  }
 0x150   :  { %3443 = vmatprep.subr.bf16.mxu1 %v6882_v50  ;;  %v6973_v50 = vld [vmem:[#allocation5 + $0xae8] ss:$24 sps:$4 sm:$0xff]  }
 0x152   :  { %3229 = vmatpush1.bf16.msra.mxu0 %v6877_v51  ;;  %v6978_v51 = vld [vmem:[#allocation5 + $0xb14] ss:$24 sps:$4 sm:$0xff]  }
 0x153   :  { %3444 = vmatpush1.bf16.msra.mxu1 %v6880_v52  ;;  %3230 = vmatprep.subr.bf16.mxu0 %v6885_v53  ;;  %v6981_v52 = vld [vmem:[#allocation5 + $0xb1c] ss:$24 sps:$4 sm:$0xff]   ;;  %v6976_v53 = vld [vmem:[#allocation5 + $0xb10] ss:$24 sps:$4 sm:$0xff]  }
 0x154   :  { %3445 = vmatprep.subr.bf16.mxu1 %v6888_v54  ;;  %v6979_v54 = vld [vmem:[#allocation5 + $0xb18] ss:$24 sps:$4 sm:$0xff]  }
 0x156   :  { %3231 = vmatpush1.bf16.msra.mxu0 %v6883_v55  ;;  %v6984_v55 = vld [vmem:[#allocation5 + $0xb44] ss:$24 sps:$4 sm:$0xff]  }
 0x157   :  { %3446 = vmatpush1.bf16.msra.mxu1 %v6886_v56  ;;  %3232 = vmatprep.subr.bf16.mxu0 %v6891_v57  ;;  %v6987_v56 = vld [vmem:[#allocation5 + $0xb4c] ss:$24 sps:$4 sm:$0xff]   ;;  %v6982_v57 = vld [vmem:[#allocation5 + $0xb40] ss:$24 sps:$4 sm:$0xff]  }
 0x158   :  { %3447 = vmatprep.subr.bf16.mxu1 %v6894_v58  ;;  %v6985_v58 = vld [vmem:[#allocation5 + $0xb48] ss:$24 sps:$4 sm:$0xff]  }
 0x15a   :  { %3233 = vmatpush1.bf16.msra.mxu0 %v6889_v59  ;;  %v6990_v59 = vld [vmem:[#allocation5 + $0xb74] ss:$24 sps:$4 sm:$0xff]  }
 0x15b   :  { %3448 = vmatpush1.bf16.msra.mxu1 %v6892_v60  ;;  %3234 = vmatprep.subr.bf16.mxu0 %v6897_v61  ;;  %v6993_v60 = vld [vmem:[#allocation5 + $0xb7c] ss:$24 sps:$4 sm:$0xff]   ;;  %v6988_v61 = vld [vmem:[#allocation5 + $0xb70] ss:$24 sps:$4 sm:$0xff]  }
 0x15c   :  { %3449 = vmatprep.subr.bf16.mxu1 %v6900_v62  ;;  %v6991_v62 = vld [vmem:[#allocation5 + $0xb78] ss:$24 sps:$4 sm:$0xff]  }
 0x15e   :  { %3235 = vmatpush1.bf16.msra.mxu0 %v6895_v63  ;;  %v6996_v63 = vld [vmem:[#allocation5 + $0xba4] ss:$24 sps:$4 sm:$0xff]  }
 0x15f   :  { %3450 = vmatpush1.bf16.msra.mxu1 %v6898_v0  ;;  %3236 = vmatprep.subr.bf16.mxu0 %v6903_v1  ;;  %v6999_v0 = vld [vmem:[#allocation5 + $0xbac] ss:$24 sps:$4 sm:$0xff]   ;;  %v6994_v1 = vld [vmem:[#allocation5 + $0xba0] ss:$24 sps:$4 sm:$0xff]  }
 0x160   :  { %3451 = vmatprep.subr.bf16.mxu1 %v6906_v2  ;;  %v6997_v2 = vld [vmem:[#allocation5 + $0xba8] ss:$24 sps:$4 sm:$0xff]  }
 0x162   :  { %3237 = vmatpush1.bf16.msra.mxu0 %v6901_v3  ;;  %v7002_v3 = vld [vmem:[#allocation5 + $0xbd4] ss:$24 sps:$4 sm:$0xff]  }
 0x163   :  { %3452 = vmatpush1.bf16.msra.mxu1 %v6904_v4  ;;  %3249 = vmatprep.subr.bf16.mxu0 %v6912_v5  ;;  %v7005_v4 = vld [vmem:[#allocation5 + $0xbdc] ss:$24 sps:$4 sm:$0xff]   ;;  %v7000_v5 = vld [vmem:[#allocation5 + $0xbd0] ss:$24 sps:$4 sm:$0xff]  }
 0x164   :  { %3464 = vmatprep.subr.bf16.mxu1 %v6915_v6  ;;  %v7003_v6 = vld [vmem:[#allocation5 + $0xbd8] ss:$24 sps:$4 sm:$0xff]  }
 0x165   :  { %3239 = vmatmul.mubr.bf16.vlgmr.msra.gmra.mrb[0].mxu0 %v6907_v7 }
 0x166   :  { %3454 = vmatmul.mubr.bf16.vlgmr.msra.gmra.mrb[0].mxu1 %v6907_v7  ;;  %3250 = vmatpush1.bf16.msra.mxu0 %v6910_v8  ;;  %v7011_v7 = vld [vmem:[#allocation5 + $0xc04] ss:$24 sps:$4 sm:$0xff]  }
 0x167   :  { %3465 = vmatpush1.bf16.msra.mxu1 %v6913_v9  ;;  %3251 = vmatprep.subr.bf16.mxu0 %v6918_v10  ;;  %v7014_v8 = vld [vmem:[#allocation5 + $0xc0c] ss:$24 sps:$4 sm:$0xff]   ;;  %v7006_v9 = vld [vmem:[#allocation2 + $0x18] ss:$40 sps:$4 sm:$0xff]   ;;  %v7009_v10 = vld [vmem:[#allocation5 + $0xc00] ss:$24 sps:$4 sm:$0xff]  }
 0x168   :  { %3466 = vmatprep.subr.bf16.mxu1 %v6921_v11  ;;  %3281 = vmatprep.mubr.bf16.mxu0 %v7008_v12  ;;  %v7012_v11 = vld [vmem:[#allocation5 + $0xc08] ss:$24 sps:$4 sm:$0xff]  }
 0x169   :  { %3496 = vmatprep.mubr.bf16.mxu1 %v7008_v12  ;;  %v7017_v12 = vld [vmem:[#allocation5 + $0xc34] ss:$24 sps:$4 sm:$0xff]  }
 0x16a   :  { %3252 = vmatpush1.bf16.msra.mxu0 %v6916_v13  ;;  %v7020_v13 = vld [vmem:[#allocation5 + $0xc3c] ss:$24 sps:$4 sm:$0xff]  }
 0x16b   :  { %3467 = vmatpush1.bf16.msra.mxu1 %v6919_v14  ;;  %3253 = vmatprep.subr.bf16.mxu0 %v6924_v15  ;;  %v7107_v14 = vld [vmem:[#allocation2 + $0x24] ss:$40 sps:$4 sm:$0xff]   ;;  %v7015_v15 = vld [vmem:[#allocation5 + $0xc30] ss:$24 sps:$4 sm:$0xff]  }
 0x16c   :  { %3468 = vmatprep.subr.bf16.mxu1 %v6927_v16  ;;  %v7018_v16 = vld [vmem:[#allocation5 + $0xc38] ss:$24 sps:$4 sm:$0xff]  }
 0x16e   :  { %3254 = vmatpush1.bf16.msra.mxu0 %v6922_v17  ;;  %v7023_v17 = vld [vmem:[#allocation5 + $0xc64] ss:$24 sps:$4 sm:$0xff]  }
 0x16f   :  { %3469 = vmatpush1.bf16.msra.mxu1 %v6925_v18  ;;  %3255 = vmatprep.subr.bf16.mxu0 %v6930_v19  ;;  %v7026_v18 = vld [vmem:[#allocation5 + $0xc6c] ss:$24 sps:$4 sm:$0xff]   ;;  %v7021_v19 = vld [vmem:[#allocation5 + $0xc60] ss:$24 sps:$4 sm:$0xff]  }
 0x170   :  { %3470 = vmatprep.subr.bf16.mxu1 %v6933_v20  ;;  %v7024_v20 = vld [vmem:[#allocation5 + $0xc68] ss:$24 sps:$4 sm:$0xff]  }
 0x172   :  { %3256 = vmatpush1.bf16.msra.mxu0 %v6928_v21  ;;  %v7029_v21 = vld [vmem:[#allocation5 + $0xc94] ss:$24 sps:$4 sm:$0xff]  }
 0x173   :  { %3471 = vmatpush1.bf16.msra.mxu1 %v6931_v22  ;;  %3257 = vmatprep.subr.bf16.mxu0 %v6936_v23  ;;  %v7032_v22 = vld [vmem:[#allocation5 + $0xc9c] ss:$24 sps:$4 sm:$0xff]   ;;  %v7027_v23 = vld [vmem:[#allocation5 + $0xc90] ss:$24 sps:$4 sm:$0xff]  }
 0x174   :  { %3472 = vmatprep.subr.bf16.mxu1 %v6939_v24  ;;  %v7030_v24 = vld [vmem:[#allocation5 + $0xc98] ss:$24 sps:$4 sm:$0xff]  }
 0x176   :  { %3258 = vmatpush1.bf16.msra.mxu0 %v6934_v25  ;;  %v7035_v25 = vld [vmem:[#allocation5 + $0xcc4] ss:$24 sps:$4 sm:$0xff]  }
 0x177   :  { %3473 = vmatpush1.bf16.msra.mxu1 %v6937_v26  ;;  %3259 = vmatprep.subr.bf16.mxu0 %v6942_v27  ;;  %v7038_v26 = vld [vmem:[#allocation5 + $0xccc] ss:$24 sps:$4 sm:$0xff]   ;;  %v7033_v27 = vld [vmem:[#allocation5 + $0xcc0] ss:$24 sps:$4 sm:$0xff]  }
 0x178   :  { %3474 = vmatprep.subr.bf16.mxu1 %v6945_v28  ;;  %v7036_v28 = vld [vmem:[#allocation5 + $0xcc8] ss:$24 sps:$4 sm:$0xff]  }
 0x17a   :  { %3260 = vmatpush1.bf16.msra.mxu0 %v6940_v29  ;;  %v7041_v29 = vld [vmem:[#allocation5 + $0xcf4] ss:$24 sps:$4 sm:$0xff]  }
 0x17b   :  { %3475 = vmatpush1.bf16.msra.mxu1 %v6943_v30  ;;  %3261 = vmatprep.subr.bf16.mxu0 %v6948_v31  ;;  %v7044_v30 = vld [vmem:[#allocation5 + $0xcfc] ss:$24 sps:$4 sm:$0xff]   ;;  %v7039_v31 = vld [vmem:[#allocation5 + $0xcf0] ss:$24 sps:$4 sm:$0xff]  }
 0x17c   :  { %3476 = vmatprep.subr.bf16.mxu1 %v6951_v32  ;;  %v7042_v32 = vld [vmem:[#allocation5 + $0xcf8] ss:$24 sps:$4 sm:$0xff]  }
 0x17e   :  { %3262 = vmatpush1.bf16.msra.mxu0 %v6946_v33  ;;  %v7047_v33 = vld [vmem:[#allocation5 + $0xd24] ss:$24 sps:$4 sm:$0xff]  }
 0x17f   :  { %3477 = vmatpush1.bf16.msra.mxu1 %v6949_v34  ;;  %3263 = vmatprep.subr.bf16.mxu0 %v6954_v35  ;;  %v7050_v34 = vld [vmem:[#allocation5 + $0xd2c] ss:$24 sps:$4 sm:$0xff]   ;;  %v7045_v35 = vld [vmem:[#allocation5 + $0xd20] ss:$24 sps:$4 sm:$0xff]  }
 0x180   :  { %3478 = vmatprep.subr.bf16.mxu1 %v6957_v36  ;;  %v7048_v36 = vld [vmem:[#allocation5 + $0xd28] ss:$24 sps:$4 sm:$0xff]  }
 0x182   :  { %3264 = vmatpush1.bf16.msra.mxu0 %v6952_v37  ;;  %v7053_v37 = vld [vmem:[#allocation5 + $0xd54] ss:$24 sps:$4 sm:$0xff]  }
 0x183   :  { %3479 = vmatpush1.bf16.msra.mxu1 %v6955_v38  ;;  %3265 = vmatprep.subr.bf16.mxu0 %v6960_v39  ;;  %v7056_v38 = vld [vmem:[#allocation5 + $0xd5c] ss:$24 sps:$4 sm:$0xff]   ;;  %v7051_v39 = vld [vmem:[#allocation5 + $0xd50] ss:$24 sps:$4 sm:$0xff]  }
 0x184   :  { %3480 = vmatprep.subr.bf16.mxu1 %v6963_v40  ;;  %v7054_v40 = vld [vmem:[#allocation5 + $0xd58] ss:$24 sps:$4 sm:$0xff]  }
 0x186   :  { %3266 = vmatpush1.bf16.msra.mxu0 %v6958_v41  ;;  %v7059_v41 = vld [vmem:[#allocation5 + $0xd84] ss:$24 sps:$4 sm:$0xff]  }
 0x187   :  { %3481 = vmatpush1.bf16.msra.mxu1 %v6961_v42  ;;  %3267 = vmatprep.subr.bf16.mxu0 %v6966_v43  ;;  %v7062_v42 = vld [vmem:[#allocation5 + $0xd8c] ss:$24 sps:$4 sm:$0xff]   ;;  %v7057_v43 = vld [vmem:[#allocation5 + $0xd80] ss:$24 sps:$4 sm:$0xff]  }
 0x188   :  { %3482 = vmatprep.subr.bf16.mxu1 %v6969_v44  ;;  %v7060_v44 = vld [vmem:[#allocation5 + $0xd88] ss:$24 sps:$4 sm:$0xff]  }
 0x18a   :  { %3268 = vmatpush1.bf16.msra.mxu0 %v6964_v45  ;;  %v7065_v45 = vld [vmem:[#allocation5 + $0xdb4] ss:$24 sps:$4 sm:$0xff]  }
 0x18b   :  { %3483 = vmatpush1.bf16.msra.mxu1 %v6967_v46  ;;  %3269 = vmatprep.subr.bf16.mxu0 %v6972_v47  ;;  %v7068_v46 = vld [vmem:[#allocation5 + $0xdbc] ss:$24 sps:$4 sm:$0xff]   ;;  %v7063_v47 = vld [vmem:[#allocation5 + $0xdb0] ss:$24 sps:$4 sm:$0xff]  }
 0x18c   :  { %3484 = vmatprep.subr.bf16.mxu1 %v6975_v48  ;;  %v7066_v48 = vld [vmem:[#allocation5 + $0xdb8] ss:$24 sps:$4 sm:$0xff]  }
 0x18e   :  { %3270 = vmatpush1.bf16.msra.mxu0 %v6970_v49  ;;  %v7071_v49 = vld [vmem:[#allocation5 + $0xde4] ss:$24 sps:$4 sm:$0xff]  }
 0x18f   :  { %3485 = vmatpush1.bf16.msra.mxu1 %v6973_v50  ;;  %3271 = vmatprep.subr.bf16.mxu0 %v6978_v51  ;;  %v7074_v50 = vld [vmem:[#allocation5 + $0xdec] ss:$24 sps:$4 sm:$0xff]   ;;  %v7069_v51 = vld [vmem:[#allocation5 + $0xde0] ss:$24 sps:$4 sm:$0xff]  }
 0x190   :  { %3486 = vmatprep.subr.bf16.mxu1 %v6981_v52  ;;  %v7072_v52 = vld [vmem:[#allocation5 + $0xde8] ss:$24 sps:$4 sm:$0xff]  }
 0x192   :  { %3272 = vmatpush1.bf16.msra.mxu0 %v6976_v53  ;;  %v7077_v53 = vld [vmem:[#allocation5 + $0xe14] ss:$24 sps:$4 sm:$0xff]  }
 0x193   :  { %3487 = vmatpush1.bf16.msra.mxu1 %v6979_v54  ;;  %3273 = vmatprep.subr.bf16.mxu0 %v6984_v55  ;;  %v7080_v54 = vld [vmem:[#allocation5 + $0xe1c] ss:$24 sps:$4 sm:$0xff]   ;;  %v7075_v55 = vld [vmem:[#allocation5 + $0xe10] ss:$24 sps:$4 sm:$0xff]  }
 0x194   :  { %3488 = vmatprep.subr.bf16.mxu1 %v6987_v56  ;;  %v7078_v56 = vld [vmem:[#allocation5 + $0xe18] ss:$24 sps:$4 sm:$0xff]  }
 0x196   :  { %3274 = vmatpush1.bf16.msra.mxu0 %v6982_v57  ;;  %v7083_v57 = vld [vmem:[#allocation5 + $0xe44] ss:$24 sps:$4 sm:$0xff]  }
 0x197   :  { %3489 = vmatpush1.bf16.msra.mxu1 %v6985_v58  ;;  %3275 = vmatprep.subr.bf16.mxu0 %v6990_v59  ;;  %v7086_v58 = vld [vmem:[#allocation5 + $0xe4c] ss:$24 sps:$4 sm:$0xff]   ;;  %v7081_v59 = vld [vmem:[#allocation5 + $0xe40] ss:$24 sps:$4 sm:$0xff]  }
 0x198   :  { %3490 = vmatprep.subr.bf16.mxu1 %v6993_v60  ;;  %v7084_v60 = vld [vmem:[#allocation5 + $0xe48] ss:$24 sps:$4 sm:$0xff]  }
 0x19a   :  { %3276 = vmatpush1.bf16.msra.mxu0 %v6988_v61  ;;  %v7089_v61 = vld [vmem:[#allocation5 + $0xe74] ss:$24 sps:$4 sm:$0xff]  }
 0x19b   :  { %3491 = vmatpush1.bf16.msra.mxu1 %v6991_v62  ;;  %3277 = vmatprep.subr.bf16.mxu0 %v6996_v63  ;;  %v7092_v62 = vld [vmem:[#allocation5 + $0xe7c] ss:$24 sps:$4 sm:$0xff]   ;;  %v7087_v63 = vld [vmem:[#allocation5 + $0xe70] ss:$24 sps:$4 sm:$0xff]  }
 0x19c   :  { %3492 = vmatprep.subr.bf16.mxu1 %v6999_v0  ;;  %v7090_v0 = vld [vmem:[#allocation5 + $0xe78] ss:$24 sps:$4 sm:$0xff]  }
 0x19e   :  { %3278 = vmatpush1.bf16.msra.mxu0 %v6994_v1  ;;  %v7095_v1 = vld [vmem:[#allocation5 + $0xea4] ss:$24 sps:$4 sm:$0xff]  }
 0x19f   :  { %3493 = vmatpush1.bf16.msra.mxu1 %v6997_v2  ;;  %3279 = vmatprep.subr.bf16.mxu0 %v7002_v3  ;;  %v7098_v2 = vld [vmem:[#allocation5 + $0xeac] ss:$24 sps:$4 sm:$0xff]   ;;  %v7093_v3 = vld [vmem:[#allocation5 + $0xea0] ss:$24 sps:$4 sm:$0xff]  }
 0x1a0   :  { %3494 = vmatprep.subr.bf16.mxu1 %v7005_v4  ;;  %v7096_v4 = vld [vmem:[#allocation5 + $0xea8] ss:$24 sps:$4 sm:$0xff]  }
 0x1a2   :  { %3280 = vmatpush1.bf16.msra.mxu0 %v7000_v5  ;;  %v7101_v5 = vld [vmem:[#allocation5 + $0xed4] ss:$24 sps:$4 sm:$0xff]  }
 0x1a3   :  { %3495 = vmatpush1.bf16.msra.mxu1 %v7003_v6  ;;  %3292 = vmatprep.subr.bf16.mxu0 %v7011_v7  ;;  %v7104_v6 = vld [vmem:[#allocation5 + $0xedc] ss:$24 sps:$4 sm:$0xff]   ;;  %v7099_v7 = vld [vmem:[#allocation5 + $0xed0] ss:$24 sps:$4 sm:$0xff]  }
 0x1a4   :  { %3507 = vmatprep.subr.bf16.mxu1 %v7014_v8  ;;  %v7102_v8 = vld [vmem:[#allocation5 + $0xed8] ss:$24 sps:$4 sm:$0xff]  }
 0x1a5   :  { %3282 = vmatmul.mubr.bf16.vlgmr.msra.gmra.mrb[0].mxu0 %v7006_v9 }
 0x1a6   :  { %3497 = vmatmul.mubr.bf16.vlgmr.msra.gmra.mrb[0].mxu1 %v7006_v9  ;;  %3293 = vmatpush1.bf16.msra.mxu0 %v7009_v10  ;;  %v7110_v9 = vld [vmem:[#allocation5 + $0x14] ss:$24 sps:$4 sm:$0xff]   ;;  %v7105_v10 = vld [vmem:[#allocation2 + $0x20] ss:$40 sps:$4 sm:$0xff]  }
 0x1a7   :  { %3508 = vmatpush1.bf16.msra.mxu1 %v7012_v11  ;;  %3294 = vmatprep.subr.bf16.mxu0 %v7017_v12  ;;  %v7108_v11 = vld [vmem:[#allocation5 + $0x10] ss:$24 sps:$4 sm:$0xff]   ;;  %v7113_v12 = vld [vmem:[#allocation5 + $0x44] ss:$24 sps:$4 sm:$0xff]  }
 0x1a8   :  { %3509 = vmatprep.subr.bf16.mxu1 %v7020_v13  ;;  %3324 = vmatprep.mubr.bf16.mxu0 %v7107_v14  ;;  %v7111_v13 = vld [vmem:[#allocation5 + $0x40] ss:$24 sps:$4 sm:$0xff]  }
 0x1a9   :  { %3539 = vmatprep.mubr.bf16.mxu1 %v7107_v14  ;;  %v7116_v14 = vld [vmem:[#allocation5 + $0x74] ss:$24 sps:$4 sm:$0xff]  }
 0x1aa   :  { %3295 = vmatpush1.bf16.msra.mxu0 %v7015_v15  ;;  %v7676_v15 = vld [vmem:[#allocation2 + $0x4] ss:$40 sps:$4 sm:$0xff]  }
 0x1ab   :  { %3510 = vmatpush1.bf16.msra.mxu1 %v7018_v16  ;;  %3296 = vmatprep.subr.bf16.mxu0 %v7023_v17  ;;  %v7114_v16 = vld [vmem:[#allocation5 + $0x70] ss:$24 sps:$4 sm:$0xff]   ;;  %v7119_v17 = vld [vmem:[#allocation5 + $0xa4] ss:$24 sps:$4 sm:$0xff]  }
 0x1ac   :  { %3511 = vmatprep.subr.bf16.mxu1 %v7026_v18  ;;  %v7117_v18 = vld [vmem:[#allocation5 + $0xa0] ss:$24 sps:$4 sm:$0xff]  }
 0x1ae   :  { %3297 = vmatpush1.bf16.msra.mxu0 %v7021_v19  ;;  %v7122_v19 = vld [vmem:[#allocation5 + $0xd4] ss:$24 sps:$4 sm:$0xff]  }
 0x1af   :  { %3512 = vmatpush1.bf16.msra.mxu1 %v7024_v20  ;;  %3298 = vmatprep.subr.bf16.mxu0 %v7029_v21  ;;  %v7120_v20 = vld [vmem:[#allocation5 + $0xd0] ss:$24 sps:$4 sm:$0xff]   ;;  %v7125_v21 = vld [vmem:[#allocation5 + $0x104] ss:$24 sps:$4 sm:$0xff]  }
 0x1b0   :  { %3513 = vmatprep.subr.bf16.mxu1 %v7032_v22  ;;  %v7123_v22 = vld [vmem:[#allocation5 + $0x100] ss:$24 sps:$4 sm:$0xff]  }
 0x1b2   :  { %3299 = vmatpush1.bf16.msra.mxu0 %v7027_v23  ;;  %v7128_v23 = vld [vmem:[#allocation5 + $0x134] ss:$24 sps:$4 sm:$0xff]  }
 0x1b3   :  { %3514 = vmatpush1.bf16.msra.mxu1 %v7030_v24  ;;  %3300 = vmatprep.subr.bf16.mxu0 %v7035_v25  ;;  %v7126_v24 = vld [vmem:[#allocation5 + $0x130] ss:$24 sps:$4 sm:$0xff]   ;;  %v7131_v25 = vld [vmem:[#allocation5 + $0x164] ss:$24 sps:$4 sm:$0xff]  }
 0x1b4   :  { %3515 = vmatprep.subr.bf16.mxu1 %v7038_v26  ;;  %v7129_v26 = vld [vmem:[#allocation5 + $0x160] ss:$24 sps:$4 sm:$0xff]  }
 0x1b6   :  { %3301 = vmatpush1.bf16.msra.mxu0 %v7033_v27  ;;  %v7134_v27 = vld [vmem:[#allocation5 + $0x194] ss:$24 sps:$4 sm:$0xff]  }
 0x1b7   :  { %3516 = vmatpush1.bf16.msra.mxu1 %v7036_v28  ;;  %3302 = vmatprep.subr.bf16.mxu0 %v7041_v29  ;;  %v7230_v28 = vld [vmem:[#allocation8 + $0x4] ss:$16 sps:$4 sm:$0xff]   ;;  %v7228_v29 = vld [vmem:[#allocation8] ss:$16 sps:$4 sm:$0xff]  }
 0x1b8   :  { %3517 = vmatprep.subr.bf16.mxu1 %v7044_v30  ;;  %v7132_v30 = vld [vmem:[#allocation5 + $0x190] ss:$24 sps:$4 sm:$0xff]  }
 0x1ba   :  { %3303 = vmatpush1.bf16.msra.mxu0 %v7039_v31  ;;  %v7137_v31 = vld [vmem:[#allocation5 + $0x1c4] ss:$24 sps:$4 sm:$0xff]  }
 0x1bb   :  { %3518 = vmatpush1.bf16.msra.mxu1 %v7042_v32  ;;  %3304 = vmatprep.subr.bf16.mxu0 %v7047_v33  ;;  %v7236_v32 = vld [vmem:[#allocation8 + $0x24] ss:$16 sps:$4 sm:$0xff]   ;;  %v7234_v33 = vld [vmem:[#allocation8 + $0x20] ss:$16 sps:$4 sm:$0xff]  }
 0x1bc   :  { %3519 = vmatprep.subr.bf16.mxu1 %v7050_v34  ;;  %v7135_v34 = vld [vmem:[#allocation5 + $0x1c0] ss:$24 sps:$4 sm:$0xff]  }
 0x1be   :  { %3305 = vmatpush1.bf16.msra.mxu0 %v7045_v35  ;;  %v7140_v35 = vld [vmem:[#allocation5 + $0x1f4] ss:$24 sps:$4 sm:$0xff]  }
 0x1bf   :  { %3520 = vmatpush1.bf16.msra.mxu1 %v7048_v36  ;;  %3306 = vmatprep.subr.bf16.mxu0 %v7053_v37  ;;  %v7242_v36 = vld [vmem:[#allocation8 + $0x44] ss:$16 sps:$4 sm:$0xff]   ;;  %v7240_v37 = vld [vmem:[#allocation8 + $0x40] ss:$16 sps:$4 sm:$0xff]  }
 0x1c0   :  { %3521 = vmatprep.subr.bf16.mxu1 %v7056_v38  ;;  %v7138_v38 = vld [vmem:[#allocation5 + $0x1f0] ss:$24 sps:$4 sm:$0xff]  }
 0x1c2   :  { %3307 = vmatpush1.bf16.msra.mxu0 %v7051_v39  ;;  %v7143_v39 = vld [vmem:[#allocation5 + $0x224] ss:$24 sps:$4 sm:$0xff]  }
 0x1c3   :  { %3522 = vmatpush1.bf16.msra.mxu1 %v7054_v40  ;;  %3308 = vmatprep.subr.bf16.mxu0 %v7059_v41  ;;  %v7248_v40 = vld [vmem:[#allocation8 + $0x64] ss:$16 sps:$4 sm:$0xff]   ;;  %v7246_v41 = vld [vmem:[#allocation8 + $0x60] ss:$16 sps:$4 sm:$0xff]  }
 0x1c4   :  { %3523 = vmatprep.subr.bf16.mxu1 %v7062_v42  ;;  %v7141_v42 = vld [vmem:[#allocation5 + $0x220] ss:$24 sps:$4 sm:$0xff]  }
 0x1c6   :  { %3309 = vmatpush1.bf16.msra.mxu0 %v7057_v43  ;;  %v7146_v43 = vld [vmem:[#allocation5 + $0x254] ss:$24 sps:$4 sm:$0xff]  }
 0x1c7   :  { %3524 = vmatpush1.bf16.msra.mxu1 %v7060_v44  ;;  %3310 = vmatprep.subr.bf16.mxu0 %v7065_v45  ;;  %v7254_v44 = vld [vmem:[#allocation8 + $0x84] ss:$16 sps:$4 sm:$0xff]   ;;  %v7252_v45 = vld [vmem:[#allocation8 + $0x80] ss:$16 sps:$4 sm:$0xff]  }
 0x1c8   :  { %3525 = vmatprep.subr.bf16.mxu1 %v7068_v46  ;;  %v7144_v46 = vld [vmem:[#allocation5 + $0x250] ss:$24 sps:$4 sm:$0xff]  }
 0x1ca   :  { %3311 = vmatpush1.bf16.msra.mxu0 %v7063_v47  ;;  %v7149_v47 = vld [vmem:[#allocation5 + $0x284] ss:$24 sps:$4 sm:$0xff]  }
 0x1cb   :  { %3526 = vmatpush1.bf16.msra.mxu1 %v7066_v48  ;;  %3312 = vmatprep.subr.bf16.mxu0 %v7071_v49  ;;  %v7260_v48 = vld [vmem:[#allocation8 + $0xa4] ss:$16 sps:$4 sm:$0xff]   ;;  %v7258_v49 = vld [vmem:[#allocation8 + $0xa0] ss:$16 sps:$4 sm:$0xff]  }
 0x1cc   :  { %3527 = vmatprep.subr.bf16.mxu1 %v7074_v50  ;;  %v7147_v50 = vld [vmem:[#allocation5 + $0x280] ss:$24 sps:$4 sm:$0xff]  }
 0x1ce   :  { %3313 = vmatpush1.bf16.msra.mxu0 %v7069_v51  ;;  %v7152_v51 = vld [vmem:[#allocation5 + $0x2b4] ss:$24 sps:$4 sm:$0xff]  }
 0x1cf   :  { %3528 = vmatpush1.bf16.msra.mxu1 %v7072_v52  ;;  %3314 = vmatprep.subr.bf16.mxu0 %v7077_v53  ;;  %v7266_v52 = vld [vmem:[#allocation8 + $0xc4] ss:$16 sps:$4 sm:$0xff]   ;;  %v7264_v53 = vld [vmem:[#allocation8 + $0xc0] ss:$16 sps:$4 sm:$0xff]  }
 0x1d0   :  { %3529 = vmatprep.subr.bf16.mxu1 %v7080_v54  ;;  %v7150_v54 = vld [vmem:[#allocation5 + $0x2b0] ss:$24 sps:$4 sm:$0xff]  }
 0x1d2   :  { %3315 = vmatpush1.bf16.msra.mxu0 %v7075_v55  ;;  %v7155_v55 = vld [vmem:[#allocation5 + $0x2e4] ss:$24 sps:$4 sm:$0xff]  }
 0x1d3   :  { %3530 = vmatpush1.bf16.msra.mxu1 %v7078_v56  ;;  %3316 = vmatprep.subr.bf16.mxu0 %v7083_v57  ;;  %v7272_v56 = vld [vmem:[#allocation8 + $0xe4] ss:$16 sps:$4 sm:$0xff]   ;;  %v7270_v57 = vld [vmem:[#allocation8 + $0xe0] ss:$16 sps:$4 sm:$0xff]  }
 0x1d4   :  { %3531 = vmatprep.subr.bf16.mxu1 %v7086_v58  ;;  %v7153_v58 = vld [vmem:[#allocation5 + $0x2e0] ss:$24 sps:$4 sm:$0xff]  }
 0x1d6   :  { %3317 = vmatpush1.bf16.msra.mxu0 %v7081_v59  ;;  %v7158_v59 = vld [vmem:[#allocation5 + $0x314] ss:$24 sps:$4 sm:$0xff]  }
 0x1d7   :  { %3532 = vmatpush1.bf16.msra.mxu1 %v7084_v60  ;;  %3318 = vmatprep.subr.bf16.mxu0 %v7089_v61  ;;  %v7278_v60 = vld [vmem:[#allocation8 + $0x104] ss:$16 sps:$4 sm:$0xff]   ;;  %v7276_v61 = vld [vmem:[#allocation8 + $0x100] ss:$16 sps:$4 sm:$0xff]  }
 0x1d8   :  { %3533 = vmatprep.subr.bf16.mxu1 %v7092_v62  ;;  %v7156_v62 = vld [vmem:[#allocation5 + $0x310] ss:$24 sps:$4 sm:$0xff]  }
 0x1da   :  { %3319 = vmatpush1.bf16.msra.mxu0 %v7087_v63  ;;  %v7161_v63 = vld [vmem:[#allocation5 + $0x344] ss:$24 sps:$4 sm:$0xff]  }
 0x1db   :  { %3534 = vmatpush1.bf16.msra.mxu1 %v7090_v0  ;;  %3320 = vmatprep.subr.bf16.mxu0 %v7095_v1  ;;  %v7284_v0 = vld [vmem:[#allocation8 + $0x124] ss:$16 sps:$4 sm:$0xff]  }
 0x1dc   :  { %3535 = vmatprep.subr.bf16.mxu1 %v7098_v2  ;;  %v7677_v1 = vld [vmem:[#allocation2] ss:$40 sps:$4 sm:$0xff]  }
 0x1dd   :  { %v7282_v2 = vld [vmem:[#allocation8 + $0x120] ss:$16 sps:$4 sm:$0xff]  }
 0x1de   :  { %3321 = vmatpush1.bf16.msra.mxu0 %v7093_v3  ;;  %v7159_v3 = vld [vmem:[#allocation5 + $0x340] ss:$24 sps:$4 sm:$0xff]  }
 0x1df   :  { %3536 = vmatpush1.bf16.msra.mxu1 %v7096_v4  ;;  %3322 = vmatprep.subr.bf16.mxu0 %v7101_v5  ;;  %v7164_v4 = vld [vmem:[#allocation5 + $0x374] ss:$24 sps:$4 sm:$0xff]   ;;  %v7678_v5 = vld [vmem:[#allocation2 + $0xc] ss:$40 sps:$4 sm:$0xff]  }
 0x1e0   :  { %3537 = vmatprep.subr.bf16.mxu1 %v7104_v6  ;;  %v7290_v6 = vld [vmem:[#allocation8 + $0x144] ss:$16 sps:$4 sm:$0xff]  }
 0x1e2   :  { %3323 = vmatpush1.bf16.msra.mxu0 %v7099_v7  ;;  %v7288_v7 = vld [vmem:[#allocation8 + $0x140] ss:$16 sps:$4 sm:$0xff]  }
 0x1e3   :  { %3538 = vmatpush1.bf16.msra.mxu1 %v7102_v8  ;;  %3550 = vmatprep.subr.bf16.mxu0 %v7110_v9  ;;  %v7162_v8 = vld [vmem:[#allocation5 + $0x370] ss:$24 sps:$4 sm:$0xff]   ;;  %v7167_v9 = vld [vmem:[#allocation5 + $0x3a4] ss:$24 sps:$4 sm:$0xff]  }
 0x1e4   :  { %4957 = vmatprep.subr.bf16.mxu1 %v7230_v28  ;;  %v7318_v28 = vld [vmem:[#allocation8 + $0x1e0] ss:$16 sps:$4 sm:$0xff]  }
 0x1e5   :  { %3325 = vmatmul.mubr.bf16.vlgmr.msra.gmra.mrb[0].mxu0 %v7105_v10 }
 0x1e6   :  { %3540 = vmatmul.mubr.bf16.vlgmr.msra.gmra.mrb[0].mxu1 %v7105_v10  ;;  %3551 = vmatpush1.bf16.msra.mxu0 %v7108_v11  ;;  %v7296_v10 = vld [vmem:[#allocation8 + $0x164] ss:$16 sps:$4 sm:$0xff]   ;;  %v7294_v11 = vld [vmem:[#allocation8 + $0x160] ss:$16 sps:$4 sm:$0xff]  }
 0x1e7   :  { %3582 = vmatprep.mubr.bf16.mxu0 %v7676_v15  ;;  %3552 = vmatprep.subr.bf16.mxu0 %v7113_v12  ;;  %v7165_v12 = vld [vmem:[#allocation5 + $0x3a0] ss:$24 sps:$4 sm:$0xff]  }
 0x1e8   :  { %4958 = vmatpush1.bf16.msra.mxu1 %v7228_v29  ;;  %v7300_v15 = vld [vmem:[#allocation8 + $0x180] ss:$16 sps:$4 sm:$0xff]  }
 0x1e9   :  { %4959 = vmatprep.subr.bf16.mxu1 %v7236_v32  ;;  %v7182_v29 = vld [vmem:[#allocation5 + $0x494] ss:$24 sps:$4 sm:$0xff]   ;;  %v7185_v32 = vld [vmem:[#allocation5 + $0x4c4] ss:$24 sps:$4 sm:$0xff]  }
 0x1ea   :  { %3553 = vmatpush1.bf16.msra.mxu0 %v7111_v13  ;;  %v7170_v13 = vld [vmem:[#allocation5 + $0x3d4] ss:$24 sps:$4 sm:$0xff]  }
 0x1eb   :  { %3554 = vmatprep.subr.bf16.mxu0 %v7116_v14  ;;  %v7302_v14 = vld [vmem:[#allocation8 + $0x184] ss:$16 sps:$4 sm:$0xff]  }
 0x1ec   :  { %4960 = vmatpush1.bf16.msra.mxu1 %v7234_v33  ;;  %v7183_v33 = vld [vmem:[#allocation5 + $0x4c0] ss:$24 sps:$4 sm:$0xff]  }
 0x1ed   :  { %4961 = vmatprep.subr.bf16.mxu1 %v7242_v36  ;;  %v7191_v36 = vld [vmem:[#allocation5 + $0x524] ss:$24 sps:$4 sm:$0xff]  }
 0x1ee   :  { %3555 = vmatpush1.bf16.msra.mxu0 %v7114_v16  ;;  %v7168_v16 = vld [vmem:[#allocation5 + $0x3d0] ss:$24 sps:$4 sm:$0xff]  }
 0x1ef   :  { %3556 = vmatprep.subr.bf16.mxu0 %v7119_v17  ;;  %v7173_v17 = vld [vmem:[#allocation5 + $0x404] ss:$24 sps:$4 sm:$0xff]  }
 0x1f0   :  { %4962 = vmatpush1.bf16.msra.mxu1 %v7240_v37  ;;  %v7189_v37 = vld [vmem:[#allocation5 + $0x520] ss:$24 sps:$4 sm:$0xff]  }
 0x1f1   :  { %4963 = vmatprep.subr.bf16.mxu1 %v7248_v40  ;;  %v7197_v40 = vld [vmem:[#allocation5 + $0x584] ss:$24 sps:$4 sm:$0xff]  }
 0x1f2   :  { %3557 = vmatpush1.bf16.msra.mxu0 %v7117_v18  ;;  %v7308_v18 = vld [vmem:[#allocation8 + $0x1a4] ss:$16 sps:$4 sm:$0xff]  }
 0x1f3   :  { %3558 = vmatprep.subr.bf16.mxu0 %v7122_v19  ;;  %v7306_v19 = vld [vmem:[#allocation8 + $0x1a0] ss:$16 sps:$4 sm:$0xff]  }
 0x1f4   :  { %4964 = vmatpush1.bf16.msra.mxu1 %v7246_v41  ;;  %v7195_v41 = vld [vmem:[#allocation5 + $0x580] ss:$24 sps:$4 sm:$0xff]  }
 0x1f5   :  { %4965 = vmatprep.subr.bf16.mxu1 %v7254_v44  ;;  %v7203_v44 = vld [vmem:[#allocation5 + $0x5e4] ss:$24 sps:$4 sm:$0xff]  }
 0x1f6   :  { %3559 = vmatpush1.bf16.msra.mxu0 %v7120_v20  ;;  %v7171_v20 = vld [vmem:[#allocation5 + $0x400] ss:$24 sps:$4 sm:$0xff]  }
 0x1f7   :  { %3560 = vmatprep.subr.bf16.mxu0 %v7125_v21  ;;  %v7176_v21 = vld [vmem:[#allocation5 + $0x434] ss:$24 sps:$4 sm:$0xff]  }
 0x1f8   :  { %4966 = vmatpush1.bf16.msra.mxu1 %v7252_v45  ;;  %v7201_v45 = vld [vmem:[#allocation5 + $0x5e0] ss:$24 sps:$4 sm:$0xff]  }
 0x1f9   :  { %4967 = vmatprep.subr.bf16.mxu1 %v7260_v48  ;;  %v7209_v48 = vld [vmem:[#allocation5 + $0x644] ss:$24 sps:$4 sm:$0xff]  }
 0x1fa   :  { %3561 = vmatpush1.bf16.msra.mxu0 %v7123_v22  ;;  %v7174_v22 = vld [vmem:[#allocation5 + $0x430] ss:$24 sps:$4 sm:$0xff]  }
 0x1fb   :  { %3562 = vmatprep.subr.bf16.mxu0 %v7128_v23  ;;  %v7314_v23 = vld [vmem:[#allocation8 + $0x1c4] ss:$16 sps:$4 sm:$0xff]  }
 0x1fc   :  { %4968 = vmatpush1.bf16.msra.mxu1 %v7258_v49  ;;  %v7679_v49 = vld [vmem:[#allocation2 + $0x8] ss:$40 sps:$4 sm:$0xff]  }
 0x1fd   :  { %4969 = vmatprep.subr.bf16.mxu1 %v7266_v52  ;;  %v7212_v52 = vld [vmem:[#allocation5 + $0x674] ss:$24 sps:$4 sm:$0xff]  }
 0x1fe   :  { %3563 = vmatpush1.bf16.msra.mxu0 %v7126_v24  ;;  %v7312_v24 = vld [vmem:[#allocation8 + $0x1c0] ss:$16 sps:$4 sm:$0xff]  }
 0x1ff   :  { %3564 = vmatprep.subr.bf16.mxu0 %v7131_v25  ;;  %v7179_v25 = vld [vmem:[#allocation5 + $0x464] ss:$24 sps:$4 sm:$0xff]  }
 0x200   :  { %4970 = vmatpush1.bf16.msra.mxu1 %v7264_v53  ;;  %v7210_v53 = vld [vmem:[#allocation5 + $0x670] ss:$24 sps:$4 sm:$0xff]  }
 0x201   :  { %4971 = vmatprep.subr.bf16.mxu1 %v7272_v56  ;;  %v7218_v56 = vld [vmem:[#allocation5 + $0x6d4] ss:$24 sps:$4 sm:$0xff]  }
 0x202   :  { %3565 = vmatpush1.bf16.msra.mxu0 %v7129_v26  ;;  %v7177_v26 = vld [vmem:[#allocation5 + $0x460] ss:$24 sps:$4 sm:$0xff]  }
 0x203   :  { %3566 = vmatprep.subr.bf16.mxu0 %v7134_v27  ;;  %v7320_v27 = vld [vmem:[#allocation8 + $0x1e4] ss:$16 sps:$4 sm:$0xff]  }
 0x204   :  { %4972 = vmatpush1.bf16.msra.mxu1 %v7270_v57  ;;  %v7216_v57 = vld [vmem:[#allocation5 + $0x6d0] ss:$24 sps:$4 sm:$0xff]  }
 0x205   :  { %4973 = vmatprep.subr.bf16.mxu1 %v7278_v60  ;;  %v7224_v60 = vld [vmem:[#allocation5 + $0x734] ss:$24 sps:$4 sm:$0xff]  }
 0x206   :  { %3567 = vmatpush1.bf16.msra.mxu0 %v7132_v30  ;;  %v7326_v30 = vld [vmem:[#allocation8 + $0x204] ss:$16 sps:$4 sm:$0xff]  }
 0x207   :  { %3568 = vmatprep.subr.bf16.mxu0 %v7137_v31  ;;  %v7180_v31 = vld [vmem:[#allocation5 + $0x490] ss:$24 sps:$4 sm:$0xff]  }
 0x208   :  { %4974 = vmatpush1.bf16.msra.mxu1 %v7276_v61  ;;  %v7222_v61 = vld [vmem:[#allocation5 + $0x730] ss:$24 sps:$4 sm:$0xff]  }
 0x209   :  { %4975 = vmatprep.subr.bf16.mxu1 %v7284_v0  ;;  %v7233_v0 = vld [vmem:[#allocation5 + $0x794] ss:$24 sps:$4 sm:$0xff]  }
 0x20a   :  { %3569 = vmatpush1.bf16.msra.mxu0 %v7135_v34  ;;  %v7188_v34 = vld [vmem:[#allocation5 + $0x4f4] ss:$24 sps:$4 sm:$0xff]  }
 0x20b   :  { %3570 = vmatprep.subr.bf16.mxu0 %v7140_v35  ;;  %v7186_v35 = vld [vmem:[#allocation5 + $0x4f0] ss:$24 sps:$4 sm:$0xff]  }
 0x20c   :  { %4976 = vmatpush1.bf16.msra.mxu1 %v7282_v2  ;;  %v7239_v2 = vld [vmem:[#allocation5 + $0x7c4] ss:$24 sps:$4 sm:$0xff]  }
 0x20d   :  { %4977 = vmatprep.subr.bf16.mxu1 %v7290_v6  ;;  %v7251_v6 = vld [vmem:[#allocation5 + $0x824] ss:$24 sps:$4 sm:$0xff]  }
 0x20e   :  { %3571 = vmatpush1.bf16.msra.mxu0 %v7138_v38  ;;  %v7194_v38 = vld [vmem:[#allocation5 + $0x554] ss:$24 sps:$4 sm:$0xff]  }
 0x20f   :  { %3572 = vmatprep.subr.bf16.mxu0 %v7143_v39  ;;  %v7192_v39 = vld [vmem:[#allocation5 + $0x550] ss:$24 sps:$4 sm:$0xff]  }
 0x210   :  { %4978 = vmatpush1.bf16.msra.mxu1 %v7288_v7  ;;  %v7249_v7 = vld [vmem:[#allocation5 + $0x820] ss:$24 sps:$4 sm:$0xff]  }
 0x211   :  { %4979 = vmatprep.subr.bf16.mxu1 %v7296_v10  ;;  %v7263_v10 = vld [vmem:[#allocation5 + $0x884] ss:$24 sps:$4 sm:$0xff]  }
 0x212   :  { %3573 = vmatpush1.bf16.msra.mxu0 %v7141_v42  ;;  %v7200_v42 = vld [vmem:[#allocation5 + $0x5b4] ss:$24 sps:$4 sm:$0xff]  }
 0x213   :  { %3574 = vmatprep.subr.bf16.mxu0 %v7146_v43  ;;  %v7198_v43 = vld [vmem:[#allocation5 + $0x5b0] ss:$24 sps:$4 sm:$0xff]  }
 0x214   :  { %4980 = vmatpush1.bf16.msra.mxu1 %v7294_v11  ;;  %v7261_v11 = vld [vmem:[#allocation5 + $0x880] ss:$24 sps:$4 sm:$0xff]  }
 0x215   :  { %4981 = vmatprep.subr.bf16.mxu1 %v7302_v14  ;;  %v7275_v14 = vld [vmem:[#allocation5 + $0x8e4] ss:$24 sps:$4 sm:$0xff]  }
 0x216   :  { %3575 = vmatpush1.bf16.msra.mxu0 %v7144_v46  ;;  %v7206_v46 = vld [vmem:[#allocation5 + $0x614] ss:$24 sps:$4 sm:$0xff]  }
 0x217   :  { %3576 = vmatprep.subr.bf16.mxu0 %v7149_v47  ;;  %v7204_v47 = vld [vmem:[#allocation5 + $0x610] ss:$24 sps:$4 sm:$0xff]  }
 0x218   :  { %4982 = vmatpush1.bf16.msra.mxu1 %v7300_v15  ;;  %v7273_v15 = vld [vmem:[#allocation5 + $0x8e0] ss:$24 sps:$4 sm:$0xff]  }
 0x219   :  { %4983 = vmatprep.subr.bf16.mxu1 %v7308_v18  ;;  %v7287_v18 = vld [vmem:[#allocation5 + $0x944] ss:$24 sps:$4 sm:$0xff]  }
 0x21a   :  { %3577 = vmatpush1.bf16.msra.mxu0 %v7147_v50  ;;  %v7207_v50 = vld [vmem:[#allocation5 + $0x640] ss:$24 sps:$4 sm:$0xff]  }
 0x21b   :  { %3578 = vmatprep.subr.bf16.mxu0 %v7152_v51  ;;  %v7680_v51 = vld [vmem:[#allocation2 + $0x14] ss:$40 sps:$4 sm:$0xff]  }
 0x21c   :  { %4984 = vmatpush1.bf16.msra.mxu1 %v7306_v19  ;;  %v7681_v19 = vld [vmem:[#allocation2 + $0x10] ss:$40 sps:$4 sm:$0xff]  }
 0x21d   :  { %4985 = vmatprep.subr.bf16.mxu1 %v7314_v23  ;;  %v640_v23 = vlaneseq }
 0x21e   :  { %3579 = vmatpush1.bf16.msra.mxu0 %v7150_v54  ;;  %v7215_v54 = vld [vmem:[#allocation5 + $0x6a4] ss:$24 sps:$4 sm:$0xff]  }
 0x21f   :  { %3580 = vmatprep.subr.bf16.mxu0 %v7155_v55  ;;  %v7213_v55 = vld [vmem:[#allocation5 + $0x6a0] ss:$24 sps:$4 sm:$0xff]  }
 0x220   :  { %4986 = vmatpush1.bf16.msra.mxu1 %v7312_v24  ;;  %v7291_v24 = vld [vmem:[#allocation5 + $0x970] ss:$24 sps:$4 sm:$0xff]  }
 0x221   :  { %4987 = vmatprep.subr.bf16.mxu1 %v7320_v27  ;;  %v7297_v27 = vld [vmem:[#allocation5 + $0x9a0] ss:$24 sps:$4 sm:$0xff]  }
 0x222   :  { %3581 = vmatpush1.bf16.msra.mxu0 %v7153_v58  ;;  %v7221_v58 = vld [vmem:[#allocation5 + $0x704] ss:$24 sps:$4 sm:$0xff]  }
 0x223   :  { %3593 = vmatprep.subr.bf16.mxu0 %v7158_v59  ;;  %v7219_v59 = vld [vmem:[#allocation5 + $0x700] ss:$24 sps:$4 sm:$0xff]  }
 0x224   :  { %4988 = vmatpush1.bf16.msra.mxu1 %v7318_v28  ;;  %v7305_v28 = vld [vmem:[#allocation5 + $0x9d4] ss:$24 sps:$4 sm:$0xff]  }
 0x225   :  { %3583 = vmatmul.mubr.bf16.vlgmr.msra.gmra.mrb[4].mxu0 %v7677_v1  ;;  %5000 = vmatprep.subr.bf16.mxu1 %v7326_v30  ;;  %v7231_v1 = vld [vmem:[#allocation5 + $0x790] ss:$24 sps:$4 sm:$0xff]  }
 0x226   :  { %3594 = vmatpush1.bf16.msra.mxu0 %v7156_v62  ;;  %3625 = vmatprep.mubr.bf16.mxu0 %v7678_v5  ;;  %v7227_v62 = vld [vmem:[#allocation5 + $0x764] ss:$24 sps:$4 sm:$0xff]   ;;  %v7243_v5 = vld [vmem:[#allocation5 + $0x7f0] ss:$24 sps:$4 sm:$0xff]  }
 0x227   :  { %3595 = vmatprep.subr.bf16.mxu0 %v7161_v63  ;;  %v7225_v63 = vld [vmem:[#allocation5 + $0x760] ss:$24 sps:$4 sm:$0xff]  }
 0x22a   :  { %3596 = vmatpush1.bf16.msra.mxu0 %v7159_v3  ;;  %v7237_v3 = vld [vmem:[#allocation5 + $0x7c0] ss:$24 sps:$4 sm:$0xff]  }
 0x22b   :  { %3597 = vmatprep.subr.bf16.mxu0 %v7164_v4  ;;  %v7245_v4 = vld [vmem:[#allocation5 + $0x7f4] ss:$24 sps:$4 sm:$0xff]  }
 0x22e   :  { %3598 = vmatpush1.bf16.msra.mxu0 %v7162_v8  ;;  %v7257_v8 = vld [vmem:[#allocation5 + $0x854] ss:$24 sps:$4 sm:$0xff]  }
 0x22f   :  { %3599 = vmatprep.subr.bf16.mxu0 %v7167_v9  ;;  %v7255_v9 = vld [vmem:[#allocation5 + $0x850] ss:$24 sps:$4 sm:$0xff]  }
 0x232   :  { %3600 = vmatpush1.bf16.msra.mxu0 %v7165_v12  ;;  %v7269_v12 = vld [vmem:[#allocation5 + $0x8b4] ss:$24 sps:$4 sm:$0xff]  }
 0x233   :  { %3601 = vmatprep.subr.bf16.mxu0 %v7170_v13  ;;  %v7267_v13 = vld [vmem:[#allocation5 + $0x8b0] ss:$24 sps:$4 sm:$0xff]  }
 0x236   :  { %3602 = vmatpush1.bf16.msra.mxu0 %v7168_v16  ;;  %v7281_v16 = vld [vmem:[#allocation5 + $0x914] ss:$24 sps:$4 sm:$0xff]  }
 0x237   :  { %3603 = vmatprep.subr.bf16.mxu0 %v7173_v17  ;;  %v7279_v17 = vld [vmem:[#allocation5 + $0x910] ss:$24 sps:$4 sm:$0xff]  }
 0x23a   :  { %3604 = vmatpush1.bf16.msra.mxu0 %v7171_v20  ;;  %v7285_v20 = vld [vmem:[#allocation5 + $0x940] ss:$24 sps:$4 sm:$0xff]  }
 0x23b   :  { %3605 = vmatprep.subr.bf16.mxu0 %v7176_v21  ;;  %v7682_v21 = vld [vmem:[#allocation2 + $0x1c] ss:$40 sps:$4 sm:$0xff]  }
 0x23e   :  { %3606 = vmatpush1.bf16.msra.mxu0 %v7174_v22  ;;  %v7293_v22 = vld [vmem:[#allocation5 + $0x974] ss:$24 sps:$4 sm:$0xff]  }
 0x23f   :  { %3607 = vmatprep.subr.bf16.mxu0 %v7179_v25  ;;  %v7299_v25 = vld [vmem:[#allocation5 + $0x9a4] ss:$24 sps:$4 sm:$0xff]  }
 0x242   :  { %3608 = vmatpush1.bf16.msra.mxu0 %v7177_v26  ;;  %v8098_v26 = vshrl.u32 %v640_v23, 7  ;;  %v7350_v23 = vld [vmem:[#allocation8 + $0x284] ss:$16 sps:$4 sm:$0xff]  }
 0x243   :  { %3609 = vmatprep.subr.bf16.mxu0 %v7182_v29 }
 0x244   :  { %v642_v29 = vsub.s32 0, %v8098_v26  ;;  %v650_v30 = vsub.s32 2, %v8098_v26 }
 0x246   :  { %3610 = vmatpush1.bf16.msra.mxu0 %v7180_v31  ;;  %v7303_v31 = vld [vmem:[#allocation5 + $0x9d0] ss:$24 sps:$4 sm:$0xff]  }
 0x247   :  { %3611 = vmatprep.subr.bf16.mxu0 %v7185_v32  ;;  %v8102_v32 = vld [vmem:[#allocation7] sm:$0x3f] }
 0x24a   :  { %3612 = vmatpush1.bf16.msra.mxu0 %v7183_v33  ;;  %v646_v33 = vsub.s32 1, %v8098_v26 }
 0x24b   :  { %3613 = vmatprep.subr.bf16.mxu0 %v7188_v34  ;;  %v654_v34 = vsub.s32 3, %v8098_v26 }
 0x24e   :  { %3614 = vmatpush1.bf16.msra.mxu0 %v7186_v35  ;;  %v7311_v35 = vld [vmem:[#allocation5 + $0xa04] ss:$24 sps:$4 sm:$0xff]  }
 0x24f   :  { %3615 = vmatprep.subr.bf16.mxu0 %v7191_v36  ;;  %v643_v36 = vrot.slane %v8102_v32, %v642_v29 }
 0x252   :  { %3616 = vmatpush1.bf16.msra.mxu0 %v7189_v37  ;;  %v651_v37 = vrot.slane %v8102_v32, %v650_v30 }
 0x253   :  { %3617 = vmatprep.subr.bf16.mxu0 %v7194_v38  ;;  %v647_v38 = vrot.slane %v8102_v32, %v646_v33 }
 0x256   :  { %3618 = vmatpush1.bf16.msra.mxu0 %v7192_v39  ;;  %v655_v39 = vrot.slane %v8102_v32, %v654_v34 }
 0x257   :  { %3619 = vmatprep.subr.bf16.mxu0 %v7197_v40  ;;  %v7309_v40 = vld [vmem:[#allocation5 + $0xa00] ss:$24 sps:$4 sm:$0xff]  }
 0x25a   :  { %3620 = vmatpush1.bf16.msra.mxu0 %v7195_v41  ;;  %v7317_v41 = vld [vmem:[#allocation5 + $0xa34] ss:$24 sps:$4 sm:$0xff]  }
 0x25b   :  { %3621 = vmatprep.subr.bf16.mxu0 %v7200_v42 }
 0x25e   :  { %3622 = vmatpush1.bf16.msra.mxu0 %v7198_v43 }
 0x25f   :  { %3623 = vmatprep.subr.bf16.mxu0 %v7203_v44 }
 0x262   :  { %3624 = vmatpush1.bf16.msra.mxu0 %v7201_v45 }
 0x263   :  { %3636 = vmatprep.subr.bf16.mxu0 %v7206_v46 }
 0x265   :  { %3626 = vmatmul.mubr.bf16.vlgmr.msra.gmra.mrb[4].mxu0 %v7679_v49 }
 0x266   :  { %3637 = vmatpush1.bf16.msra.mxu0 %v7204_v47  ;;  %3668 = vmatprep.mubr.bf16.mxu0 %v7680_v51 }
 0x267   :  { %3638 = vmatprep.subr.bf16.mxu0 %v7209_v48 }
 0x26a   :  { %3639 = vmatpush1.bf16.msra.mxu0 %v7207_v50 }
 0x26b   :  { %3640 = vmatprep.subr.bf16.mxu0 %v7212_v52  ;;  %v7315_v52 = vld [vmem:[#allocation5 + $0xa30] ss:$24 sps:$4 sm:$0xff]  }
 0x26e   :  { %3641 = vmatpush1.bf16.msra.mxu0 %v7210_v53 }
 0x26f   :  { %3642 = vmatprep.subr.bf16.mxu0 %v7215_v54 }
 0x272   :  { %3643 = vmatpush1.bf16.msra.mxu0 %v7213_v55 }
 0x273   :  { %3644 = vmatprep.subr.bf16.mxu0 %v7218_v56 }
 0x276   :  { %3645 = vmatpush1.bf16.msra.mxu0 %v7216_v57 }
 0x277   :  { %3646 = vmatprep.subr.bf16.mxu0 %v7221_v58  ;;  %v7323_v58 = vld [vmem:[#allocation5 + $0xa64] ss:$24 sps:$4 sm:$0xff]  }
 0x27a   :  { %3647 = vmatpush1.bf16.msra.mxu0 %v7219_v59 }
 0x27b   :  { %3648 = vmatprep.subr.bf16.mxu0 %v7224_v60 }
 0x27e   :  { %3649 = vmatpush1.bf16.msra.mxu0 %v7222_v61 }
 0x27f   :  { %3650 = vmatprep.subr.bf16.mxu0 %v7227_v62 }
 0x282   :  { %3651 = vmatpush1.bf16.msra.mxu0 %v7225_v63 }
 0x283   :  { %3652 = vmatprep.subr.bf16.mxu0 %v7233_v0 }
 0x286   :  { %3653 = vmatpush1.bf16.msra.mxu0 %v7231_v1 }
 0x287   :  { %3654 = vmatprep.subr.bf16.mxu0 %v7239_v2 }
 0x28a   :  { %3655 = vmatpush1.bf16.msra.mxu0 %v7237_v3 }
 0x28b   :  { %3656 = vmatprep.subr.bf16.mxu0 %v7245_v4  ;;  %v7321_v4 = vld [vmem:[#allocation5 + $0xa60] ss:$24 sps:$4 sm:$0xff]  }
 0x28e   :  { %3657 = vmatpush1.bf16.msra.mxu0 %v7243_v5 }
 0x28f   :  { %3658 = vmatprep.subr.bf16.mxu0 %v7251_v6 }
 0x292   :  { %3659 = vmatpush1.bf16.msra.mxu0 %v7249_v7  ;;  %v7329_v7 = vld [vmem:[#allocation5 + $0xa94] ss:$24 sps:$4 sm:$0xff]  }
 0x293   :  { %3660 = vmatprep.subr.bf16.mxu0 %v7257_v8 }
 0x296   :  { %3661 = vmatpush1.bf16.msra.mxu0 %v7255_v9 }
 0x297   :  { %3662 = vmatprep.subr.bf16.mxu0 %v7263_v10  ;;  %v7324_v10 = vld [vmem:[#allocation8 + $0x200] ss:$16 sps:$4 sm:$0xff]  }
 0x29a   :  { %3663 = vmatpush1.bf16.msra.mxu0 %v7261_v11  ;;  %v7332_v11 = vld [vmem:[#allocation8 + $0x224] ss:$16 sps:$4 sm:$0xff]  }
 0x29b   :  { %3664 = vmatprep.subr.bf16.mxu0 %v7269_v12  ;;  %v7327_v12 = vld [vmem:[#allocation5 + $0xa90] ss:$24 sps:$4 sm:$0xff]  }
 0x29e   :  { %3665 = vmatpush1.bf16.msra.mxu0 %v7267_v13  ;;  %v7335_v13 = vld [vmem:[#allocation5 + $0xac4] ss:$24 sps:$4 sm:$0xff]  }
 0x29f   :  { %3666 = vmatprep.subr.bf16.mxu0 %v7275_v14  ;;  %v7330_v14 = vld [vmem:[#allocation8 + $0x220] ss:$16 sps:$4 sm:$0xff]  }
 0x2a2   :  { %3667 = vmatpush1.bf16.msra.mxu0 %v7273_v15  ;;  %v7338_v15 = vld [vmem:[#allocation8 + $0x244] ss:$16 sps:$4 sm:$0xff]  }
 0x2a3   :  { %3679 = vmatprep.subr.bf16.mxu0 %v7281_v16  ;;  %v7333_v16 = vld [vmem:[#allocation5 + $0xac0] ss:$24 sps:$4 sm:$0xff]  }
 0x2a5   :  { %3669 = vmatmul.mubr.bf16.vlgmr.msra.gmra.mrb[4].mxu0 %v7681_v19  ;;  %v7344_v19 = vld [vmem:[#allocation8 + $0x264] ss:$16 sps:$4 sm:$0xff]  }
 0x2a6   :  { %3680 = vmatpush1.bf16.msra.mxu0 %v7279_v17  ;;  %3711 = vmatprep.mubr.bf16.mxu0 %v7682_v21  ;;  %v7341_v17 = vld [vmem:[#allocation5 + $0xaf4] ss:$24 sps:$4 sm:$0xff]   ;;  %v7347_v21 = vld [vmem:[#allocation5 + $0xb24] ss:$24 sps:$4 sm:$0xff]  }
 0x2a7   :  { %3681 = vmatprep.subr.bf16.mxu0 %v7287_v18  ;;  %v7336_v18 = vld [vmem:[#allocation8 + $0x240] ss:$16 sps:$4 sm:$0xff]  }
 0x2aa   :  { %3682 = vmatpush1.bf16.msra.mxu0 %v7285_v20  ;;  %v7339_v20 = vld [vmem:[#allocation5 + $0xaf0] ss:$24 sps:$4 sm:$0xff]  }
 0x2ab   :  { %3683 = vmatprep.subr.bf16.mxu0 %v7293_v22  ;;  %v7342_v22 = vld [vmem:[#allocation8 + $0x260] ss:$16 sps:$4 sm:$0xff]  }
 0x2ae   :  { %3684 = vmatpush1.bf16.msra.mxu0 %v7291_v24  ;;  %v7345_v24 = vld [vmem:[#allocation5 + $0xb20] ss:$24 sps:$4 sm:$0xff]  }
 0x2af   :  { %3685 = vmatprep.subr.bf16.mxu0 %v7299_v25  ;;  %v7353_v25 = vld [vmem:[#allocation5 + $0xb54] ss:$24 sps:$4 sm:$0xff]  }
 0x2b2   :  { %3686 = vmatpush1.bf16.msra.mxu0 %v7297_v27  ;;  %v7348_v27 = vld [vmem:[#allocation8 + $0x280] ss:$16 sps:$4 sm:$0xff]  }
 0x2b3   :  { %3687 = vmatprep.subr.bf16.mxu0 %v7305_v28  ;;  %v7356_v28 = vld [vmem:[#allocation8 + $0x2a4] ss:$16 sps:$4 sm:$0xff]  }
 0x2b6   :  { %3688 = vmatpush1.bf16.msra.mxu0 %v7303_v31  ;;  %v7351_v31 = vld [vmem:[#allocation5 + $0xb50] ss:$24 sps:$4 sm:$0xff]  }
 0x2b7   :  { %3689 = vmatprep.subr.bf16.mxu0 %v7311_v35  ;;  %v7359_v35 = vld [vmem:[#allocation5 + $0xb84] ss:$24 sps:$4 sm:$0xff]  }
 0x2b8   :  { %v3326_v42 = vpop.f32.mrb[0].mxu0 }
 0x2b9   :  { %v3541_v43 = vpop.f32.mrb[0].mxu1  ;;  %v6507_v44 = vadd.f32 %v3326_v42, %v643_v36  ;;  %v3328_v46 = vpop.f32.mrb[1].mxu0  ;;  %v7363_v42 = vld [vmem:[#allocation5 + $0xbb0] ss:$24 sps:$4 sm:$0xff]  }
 0x2ba   :  { %v6511_v45 = vadd.f32 %v3541_v43, %v651_v37  ;;  %v3543_v47 = vpop.f32.mrb[1].mxu1  ;;  %v6508_v48 = vadd.f32 %v3328_v46, %v647_v38  ;;  %v3330_v50 = vpop.f32.mrb[2].mxu0  ;;  %3690 = vmatpush1.bf16.msra.mxu0 %v7309_v40  ;;  %v7360_v40 = vld [vmem:[#allocation8 + $0x2c0] ss:$16 sps:$4 sm:$0xff]  }
 0x2bb   :  { %v6512_v49 = vadd.f32 %v3543_v47, %v655_v39  ;;  %v3545_v51 = vpop.f32.mrb[2].mxu1  ;;  %v6509_v54 = vadd.f32 %v3330_v50, %v643_v36  ;;  %v3332_v56 = vpop.f32.mrb[3].mxu0  ;;  %3691 = vmatprep.subr.bf16.mxu0 %v7317_v41  ;;  %v3765_v61 = vmax.f32 %v6507_v44, 0.0  ;;  %v7354_v36 = vld [vmem:[#allocation8 + $0x2a0] ss:$16 sps:$4 sm:$0xff]  }
 0x2bc   :  { %v3767_v53 = vmax.f32 %v6511_v45, 0.0  ;;  %v6513_v55 = vadd.f32 %v3545_v51, %v651_v37  ;;  %v3547_v57 = vpop.f32.mrb[3].mxu1  ;;  %v6510_v59 = vadd.f32 %v3332_v56, %v647_v38  ;;  %v3766_v0 = vmax.f32 %v6508_v48, 0.0  ;;  %v7362_v37 = vld [vmem:[#allocation8 + $0x2c4] ss:$16 sps:$4 sm:$0xff]  }
 0x2bd   :  { %v6514_v60 = vadd.f32 %v3547_v57, %v655_v39  ;;  %v3771_v62 = vmax.f32 %v6509_v54, 0.0  ;;  %v3768_v1 = vmax.f32 %v6512_v49, 0.0  ;;  %v7357_v38 = vld [vmem:[#allocation5 + $0xb80] ss:$24 sps:$4 sm:$0xff]   ;;  %v7365_v39 = vld [vmem:[#allocation5 + $0xbb4] ss:$24 sps:$4 sm:$0xff]  }
 0x2be   :  { %v3773_v63 = vmax.f32 %v6513_v55, 0.0  ;;  %v3772_v2 = vmax.f32 %v6510_v59, 0.0  ;;  %3692 = vmatpush1.bf16.msra.mxu0 %v7315_v52  ;;  %v7368_v41 = vld [vmem:[#allocation8 + $0x2e4] ss:$16 sps:$4 sm:$0xff]   ;;  %v7366_v44 = vld [vmem:[#allocation8 + $0x2e0] ss:$16 sps:$4 sm:$0xff]  }
 0x2bf   :  { %v3774_v3 = vmax.f32 %v6514_v60, 0.0  ;;  %v8118_v5 = vpack.c.bf16 %v3771_v62, %v3765_v61  ;;  %3693 = vmatprep.subr.bf16.mxu0 %v7323_v58  ;;  %v7371_v43 = vld [vmem:[#allocation5 + $0xbe4] ss:$24 sps:$4 sm:$0xff]   ;;  %v7369_v46 = vld [vmem:[#allocation5 + $0xbe0] ss:$24 sps:$4 sm:$0xff]  }
 0x2c0   :  { %v8120_v6 = vpack.c.bf16 %v3773_v63, %v3767_v53  ;;  %v8122_v8 = vpack.c.bf16 %v3772_v2, %v3766_v0  ;;  %v7374_v45 = vld [vmem:[#allocation8 + $0x304] ss:$16 sps:$4 sm:$0xff]   ;;  %v7372_v48 = vld [vmem:[#allocation8 + $0x300] ss:$16 sps:$4 sm:$0xff]  }
 0x2c1   :  { %v8124_v9 = vpack.c.bf16 %v3774_v3, %v3768_v1  ;;  %v7377_v47 = vld [vmem:[#allocation5 + $0xc14] ss:$24 sps:$4 sm:$0xff]   ;;  %v7375_v50 = vld [vmem:[#allocation5 + $0xc10] ss:$24 sps:$4 sm:$0xff]   ;;  %v7383_v51 = vld [vmem:[#allocation5 + $0xc44] ss:$24 sps:$4 sm:$0xff]  }
 0x2c2   :  { %3694 = vmatpush1.bf16.msra.mxu0 %v7321_v4  ;;  %4989 = vmatprep.mubr.bf16.mxu1 %v8122_v8  ;;  %v7380_v49 = vld [vmem:[#allocation8 + $0x324] ss:$16 sps:$4 sm:$0xff]   ;;  %v7378_v52 = vld [vmem:[#allocation8 + $0x320] ss:$16 sps:$4 sm:$0xff]  }
 0x2c3   :  { %4990 = vmatmul.mubr.bf16.vlgmr.msra.gmra.mrb[4].mxu1 %v8118_v5  ;;  %3695 = vmatprep.subr.bf16.mxu0 %v7329_v7  ;;  %v7683_v53 = vld [vmem:[#allocation2 + $0x18] ss:$40 sps:$4 sm:$0xff]   ;;  %v7381_v55 = vld [vmem:[#allocation5 + $0xc40] ss:$24 sps:$4 sm:$0xff]   ;;  %v7684_v56 = vld [vmem:[#allocation2 + $0x24] ss:$40 sps:$4 sm:$0xff]  }
 0x2c4   :  { %5001 = vmatpush1.bf16.msra.mxu1 %v7324_v10  ;;  %5032 = vmatprep.mubr.bf16.mxu1 %v8124_v9  ;;  %v7386_v54 = vld [vmem:[#allocation8 + $0x344] ss:$16 sps:$4 sm:$0xff]   ;;  %v7384_v58 = vld [vmem:[#allocation8 + $0x340] ss:$16 sps:$4 sm:$0xff]  }
 0x2c5   :  { %5002 = vmatprep.subr.bf16.mxu1 %v7332_v11  ;;  %v7389_v57 = vld [vmem:[#allocation5 + $0xc74] ss:$24 sps:$4 sm:$0xff]   ;;  %v7387_v60 = vld [vmem:[#allocation5 + $0xc70] ss:$24 sps:$4 sm:$0xff]   ;;  %v7395_v61 = vld [vmem:[#allocation5 + $0xca4] ss:$24 sps:$4 sm:$0xff]  }
 0x2c6   :  { %3696 = vmatpush1.bf16.msra.mxu0 %v7327_v12  ;;  %v7392_v59 = vld [vmem:[#allocation8 + $0x364] ss:$16 sps:$4 sm:$0xff]   ;;  %v7390_v62 = vld [vmem:[#allocation8 + $0x360] ss:$16 sps:$4 sm:$0xff]  }
 0x2c7   :  { %3697 = vmatprep.subr.bf16.mxu0 %v7335_v13  ;;  %v7398_v63 = vld [vmem:[#allocation8 + $0x384] ss:$16 sps:$4 sm:$0xff]   ;;  %v7396_v2 = vld [vmem:[#allocation8 + $0x380] ss:$16 sps:$4 sm:$0xff]  }
 0x2c8   :  { %5003 = vmatpush1.bf16.msra.mxu1 %v7330_v14  ;;  %v7393_v0 = vld [vmem:[#allocation5 + $0xca0] ss:$24 sps:$4 sm:$0xff]   ;;  %v7401_v1 = vld [vmem:[#allocation5 + $0xcd4] ss:$24 sps:$4 sm:$0xff]   ;;  %v7399_v4 = vld [vmem:[#allocation5 + $0xcd0] ss:$24 sps:$4 sm:$0xff]  }
 0x2c9   :  { %5004 = vmatprep.subr.bf16.mxu1 %v7338_v15  ;;  %v7404_v3 = vld [vmem:[#allocation8 + $0x3a4] ss:$16 sps:$4 sm:$0xff]   ;;  %v7402_v10 = vld [vmem:[#allocation8 + $0x3a0] ss:$16 sps:$4 sm:$0xff]  }
 0x2ca   :  { %3698 = vmatpush1.bf16.msra.mxu0 %v7333_v16  ;;  %v7407_v7 = vld [vmem:[#allocation5 + $0xd04] ss:$24 sps:$4 sm:$0xff]   ;;  %v7405_v12 = vld [vmem:[#allocation5 + $0xd00] ss:$24 sps:$4 sm:$0xff]   ;;  %v7413_v13 = vld [vmem:[#allocation5 + $0xd34] ss:$24 sps:$4 sm:$0xff]  }
 0x2cb   :  { %3699 = vmatprep.subr.bf16.mxu0 %v7341_v17  ;;  %v7410_v11 = vld [vmem:[#allocation8 + $0x3c4] ss:$16 sps:$4 sm:$0xff]   ;;  %v7408_v14 = vld [vmem:[#allocation8 + $0x3c0] ss:$16 sps:$4 sm:$0xff]  }
 0x2cc   :  { %5005 = vmatpush1.bf16.msra.mxu1 %v7336_v18  ;;  %v7416_v15 = vld [vmem:[#allocation8 + $0x3e4] ss:$16 sps:$4 sm:$0xff]   ;;  %v7414_v18 = vld [vmem:[#allocation8 + $0x3e0] ss:$16 sps:$4 sm:$0xff]  }
 0x2cd   :  { %5006 = vmatprep.subr.bf16.mxu1 %v7344_v19  ;;  %v7411_v16 = vld [vmem:[#allocation5 + $0xd30] ss:$24 sps:$4 sm:$0xff]   ;;  %v7419_v17 = vld [vmem:[#allocation5 + $0xd64] ss:$24 sps:$4 sm:$0xff]  }
 0x2ce   :  { %3700 = vmatpush1.bf16.msra.mxu0 %v7339_v20  ;;  %v7446_v19 = vld [vmem:[#allocation8 + $0x404] ss:$16 sps:$4 sm:$0xff]  }
 0x2cf   :  { %3701 = vmatprep.subr.bf16.mxu0 %v7347_v21  ;;  %v7417_v20 = vld [vmem:[#allocation5 + $0xd60] ss:$24 sps:$4 sm:$0xff]   ;;  %v7422_v21 = vld [vmem:[#allocation5 + $0xd94] ss:$24 sps:$4 sm:$0xff]  }
 0x2d0   :  { %5007 = vmatpush1.bf16.msra.mxu1 %v7342_v22  ;;  %v7444_v22 = vld [vmem:[#allocation8 + $0x400] ss:$16 sps:$4 sm:$0xff]  }
 0x2d1   :  { %5008 = vmatprep.subr.bf16.mxu1 %v7350_v23  ;;  %v7449_v23 = vld [vmem:[#allocation8 + $0x424] ss:$16 sps:$4 sm:$0xff]  }
 0x2d2   :  { %3702 = vmatpush1.bf16.msra.mxu0 %v7345_v24  ;;  %v7420_v24 = vld [vmem:[#allocation5 + $0xd90] ss:$24 sps:$4 sm:$0xff]  }
 0x2d3   :  { %3703 = vmatprep.subr.bf16.mxu0 %v7353_v25  ;;  %v7425_v25 = vld [vmem:[#allocation5 + $0xdc4] ss:$24 sps:$4 sm:$0xff]  }
 0x2d4   :  { %5009 = vmatpush1.bf16.msra.mxu1 %v7348_v27  ;;  %v7447_v27 = vld [vmem:[#allocation8 + $0x420] ss:$16 sps:$4 sm:$0xff]  }
 0x2d5   :  { %5010 = vmatprep.subr.bf16.mxu1 %v7356_v28  ;;  %v7452_v28 = vld [vmem:[#allocation8 + $0x444] ss:$16 sps:$4 sm:$0xff]  }
 0x2d6   :  { %3704 = vmatpush1.bf16.msra.mxu0 %v7351_v31  ;;  %v7423_v31 = vld [vmem:[#allocation5 + $0xdc0] ss:$24 sps:$4 sm:$0xff]  }
 0x2d7   :  { %3705 = vmatprep.subr.bf16.mxu0 %v7359_v35  ;;  %v7428_v35 = vld [vmem:[#allocation5 + $0xdf4] ss:$24 sps:$4 sm:$0xff]  }
 0x2d8   :  { %5011 = vmatpush1.bf16.msra.mxu1 %v7354_v36  ;;  %v7450_v36 = vld [vmem:[#allocation8 + $0x440] ss:$16 sps:$4 sm:$0xff]  }
 0x2d9   :  { %5012 = vmatprep.subr.bf16.mxu1 %v7362_v37  ;;  %v7455_v37 = vld [vmem:[#allocation8 + $0x464] ss:$16 sps:$4 sm:$0xff]  }
 0x2da   :  { %3706 = vmatpush1.bf16.msra.mxu0 %v7357_v38  ;;  %v7426_v38 = vld [vmem:[#allocation5 + $0xdf0] ss:$24 sps:$4 sm:$0xff]  }
 0x2db   :  { %3707 = vmatprep.subr.bf16.mxu0 %v7365_v39  ;;  %v7431_v39 = vld [vmem:[#allocation5 + $0xe24] ss:$24 sps:$4 sm:$0xff]  }
 0x2dc   :  { %5013 = vmatpush1.bf16.msra.mxu1 %v7360_v40  ;;  %v7453_v40 = vld [vmem:[#allocation8 + $0x460] ss:$16 sps:$4 sm:$0xff]  }
 0x2dd   :  { %5014 = vmatprep.subr.bf16.mxu1 %v7368_v41  ;;  %v7458_v41 = vld [vmem:[#allocation8 + $0x484] ss:$16 sps:$4 sm:$0xff]  }
 0x2de   :  { %3708 = vmatpush1.bf16.msra.mxu0 %v7363_v42  ;;  %v7429_v42 = vld [vmem:[#allocation5 + $0xe20] ss:$24 sps:$4 sm:$0xff]  }
 0x2df   :  { %3709 = vmatprep.subr.bf16.mxu0 %v7371_v43  ;;  %v7434_v43 = vld [vmem:[#allocation5 + $0xe54] ss:$24 sps:$4 sm:$0xff]  }
 0x2e0   :  { %5015 = vmatpush1.bf16.msra.mxu1 %v7366_v44  ;;  %v7456_v44 = vld [vmem:[#allocation8 + $0x480] ss:$16 sps:$4 sm:$0xff]  }
 0x2e1   :  { %5016 = vmatprep.subr.bf16.mxu1 %v7374_v45  ;;  %v7461_v45 = vld [vmem:[#allocation8 + $0x4a4] ss:$16 sps:$4 sm:$0xff]  }
 0x2e2   :  { %3710 = vmatpush1.bf16.msra.mxu0 %v7369_v46  ;;  %v7432_v46 = vld [vmem:[#allocation5 + $0xe50] ss:$24 sps:$4 sm:$0xff]  }
 0x2e3   :  { %3722 = vmatprep.subr.bf16.mxu0 %v7377_v47  ;;  %v7437_v47 = vld [vmem:[#allocation5 + $0xe84] ss:$24 sps:$4 sm:$0xff]  }
 0x2e4   :  { %5017 = vmatpush1.bf16.msra.mxu1 %v7372_v48  ;;  %v7459_v48 = vld [vmem:[#allocation8 + $0x4a0] ss:$16 sps:$4 sm:$0xff]  }
 0x2e5   :  { %3712 = vmatmul.mubr.bf16.vlgmr.msra.gmra.mrb[4].mxu0 %v7683_v53  ;;  %5018 = vmatprep.subr.bf16.mxu1 %v7380_v49  ;;  %v7464_v49 = vld [vmem:[#allocation8 + $0x4c4] ss:$16 sps:$4 sm:$0xff]  }
 0x2e6   :  { %3723 = vmatpush1.bf16.msra.mxu0 %v7375_v50  ;;  %3754 = vmatprep.mubr.bf16.mxu0 %v7684_v56  ;;  %v7435_v50 = vld [vmem:[#allocation5 + $0xe80] ss:$24 sps:$4 sm:$0xff]  }
 0x2e7   :  { %3724 = vmatprep.subr.bf16.mxu0 %v7383_v51  ;;  %v7440_v51 = vld [vmem:[#allocation5 + $0xeb4] ss:$24 sps:$4 sm:$0xff]  }
 0x2e8   :  { %5019 = vmatpush1.bf16.msra.mxu1 %v7378_v52  ;;  %v7462_v52 = vld [vmem:[#allocation8 + $0x4c0] ss:$16 sps:$4 sm:$0xff]   ;;  %v7467_v53 = vld [vmem:[#allocation8 + $0x4e4] ss:$16 sps:$4 sm:$0xff]  }
 0x2e9   :  { %5020 = vmatprep.subr.bf16.mxu1 %v7386_v54  ;;  %v7438_v54 = vld [vmem:[#allocation5 + $0xeb0] ss:$24 sps:$4 sm:$0xff]  }
 0x2ea   :  { %3725 = vmatpush1.bf16.msra.mxu0 %v7381_v55  ;;  %v7443_v55 = vld [vmem:[#allocation5 + $0xee4] ss:$24 sps:$4 sm:$0xff]  }
 0x2eb   :  { %3726 = vmatprep.subr.bf16.mxu0 %v7389_v57  ;;  %v7465_v56 = vld [vmem:[#allocation8 + $0x4e0] ss:$16 sps:$4 sm:$0xff]   ;;  %v7470_v57 = vld [vmem:[#allocation8 + $0x504] ss:$16 sps:$4 sm:$0xff]  }
 0x2ec   :  { %5021 = vmatpush1.bf16.msra.mxu1 %v7384_v58  ;;  %v7441_v58 = vld [vmem:[#allocation5 + $0xee0] ss:$24 sps:$4 sm:$0xff]  }
 0x2ed   :  { %5022 = vmatprep.subr.bf16.mxu1 %v7392_v59  ;;  %v7468_v59 = vld [vmem:[#allocation8 + $0x500] ss:$16 sps:$4 sm:$0xff]  }
 0x2ee   :  { %3727 = vmatpush1.bf16.msra.mxu0 %v7387_v60  ;;  %v7473_v60 = vld [vmem:[#allocation8 + $0x524] ss:$16 sps:$4 sm:$0xff]  }
 0x2ef   :  { %3728 = vmatprep.subr.bf16.mxu0 %v7395_v61  ;;  %v7471_v61 = vld [vmem:[#allocation8 + $0x520] ss:$16 sps:$4 sm:$0xff]  }
 0x2f0   :  { %5023 = vmatpush1.bf16.msra.mxu1 %v7390_v62  ;;  %v7685_v62 = vld [vmem:[#allocation2 + $0x20] ss:$40 sps:$4 sm:$0xff]  }
 0x2f1   :  { %5024 = vmatprep.subr.bf16.mxu1 %v7398_v63  ;;  %v7476_v63 = vld [vmem:[#allocation8 + $0x544] ss:$16 sps:$4 sm:$0xff]  }
 0x2f2   :  { %3729 = vmatpush1.bf16.msra.mxu0 %v7393_v0  ;;  %v7474_v0 = vld [vmem:[#allocation8 + $0x540] ss:$16 sps:$4 sm:$0xff]  }
 0x2f3   :  { %3730 = vmatprep.subr.bf16.mxu0 %v7401_v1  ;;  %v7479_v1 = vld [vmem:[#allocation8 + $0x564] ss:$16 sps:$4 sm:$0xff]  }
 0x2f4   :  { %5025 = vmatpush1.bf16.msra.mxu1 %v7396_v2  ;;  %v7477_v2 = vld [vmem:[#allocation8 + $0x560] ss:$16 sps:$4 sm:$0xff]  }
 0x2f5   :  { %5026 = vmatprep.subr.bf16.mxu1 %v7404_v3  ;;  %v7482_v3 = vld [vmem:[#allocation8 + $0x584] ss:$16 sps:$4 sm:$0xff]  }
 0x2f6   :  { %3731 = vmatpush1.bf16.msra.mxu0 %v7399_v4  ;;  %v7480_v4 = vld [vmem:[#allocation8 + $0x580] ss:$16 sps:$4 sm:$0xff]  }
 0x2f7   :  { %3732 = vmatprep.subr.bf16.mxu0 %v7407_v7  ;;  %v7485_v7 = vld [vmem:[#allocation8 + $0x5a4] ss:$16 sps:$4 sm:$0xff]  }
 0x2f8   :  { %5027 = vmatpush1.bf16.msra.mxu1 %v7402_v10  ;;  %v7483_v10 = vld [vmem:[#allocation8 + $0x5a0] ss:$16 sps:$4 sm:$0xff]  }
 0x2f9   :  { %5028 = vmatprep.subr.bf16.mxu1 %v7410_v11  ;;  %v7488_v11 = vld [vmem:[#allocation8 + $0x5c4] ss:$16 sps:$4 sm:$0xff]  }
 0x2fa   :  { %3733 = vmatpush1.bf16.msra.mxu0 %v7405_v12  ;;  %v7486_v12 = vld [vmem:[#allocation8 + $0x5c0] ss:$16 sps:$4 sm:$0xff]  }
 0x2fb   :  { %3734 = vmatprep.subr.bf16.mxu0 %v7413_v13  ;;  %v7491_v13 = vld [vmem:[#allocation8 + $0x5e4] ss:$16 sps:$4 sm:$0xff]  }
 0x2fc   :  { %5029 = vmatpush1.bf16.msra.mxu1 %v7408_v14  ;;  %v7489_v14 = vld [vmem:[#allocation8 + $0x5e0] ss:$16 sps:$4 sm:$0xff]  }
 0x2fd   :  { %5030 = vmatprep.subr.bf16.mxu1 %v7416_v15  ;;  %v7494_v15 = vld [vmem:[#allocation8 + $0xc] ss:$16 sps:$4 sm:$0xff]  }
 0x2fe   :  { %3735 = vmatpush1.bf16.msra.mxu0 %v7411_v16  ;;  %v658_v16 = vsub.s32 4, %v8098_v26 }
 0x2ff   :  { %3736 = vmatprep.subr.bf16.mxu0 %v7419_v17  ;;  %v662_v17 = vsub.s32 5, %v8098_v26  ;;  %v7669_v26 = vld [vmem:[#allocation14 + $0x8] sm:$0xff]  }
 0x300   :  { %5031 = vmatpush1.bf16.msra.mxu1 %v7414_v18  ;;  %v659_v18 = vrot.slane %v8102_v32, %v658_v16  ;;  %v7543_v16 = vld [vmem:[#allocation8 + $0x228] ss:$16 sps:$4 sm:$0xff]  }
 0x301   :  { %5043 = vmatprep.subr.bf16.mxu1 %v7446_v19  ;;  %v663_v19 = vrot.slane %v8102_v32, %v662_v17  ;;  %v7495_v32 = vld [vmem:[#allocation8 + $0x28] ss:$16 sps:$4 sm:$0xff]  }
 0x302   :  { %3737 = vmatpush1.bf16.msra.mxu0 %v7417_v20  ;;  %v7640_v17 = vld [vmem:[#allocation11 + $0x50] sm:$0xff]  }
 0x303   :  { %5033 = vmatmul.mubr.bf16.vlgmr.msra.gmra.mrb[4].mxu1 %v8120_v6  ;;  %3738 = vmatprep.subr.bf16.mxu0 %v7422_v21 }
 0x304   :  { %5044 = vmatpush1.bf16.msra.mxu1 %v7444_v22 }
 0x305   :  { %5045 = vmatprep.subr.bf16.mxu1 %v7449_v23 }
 0x306   :  { %3739 = vmatpush1.bf16.msra.mxu0 %v7420_v24 }
 0x307   :  { %3740 = vmatprep.subr.bf16.mxu0 %v7425_v25 }
 0x308   :  { %5046 = vmatpush1.bf16.msra.mxu1 %v7447_v27 }
 0x309   :  { %5047 = vmatprep.subr.bf16.mxu1 %v7452_v28 }
 0x30a   :  { %3741 = vmatpush1.bf16.msra.mxu0 %v7423_v31 }
 0x30b   :  { %3742 = vmatprep.subr.bf16.mxu0 %v7428_v35 }
 0x30c   :  { %5048 = vmatpush1.bf16.msra.mxu1 %v7450_v36 }
 0x30d   :  { %5049 = vmatprep.subr.bf16.mxu1 %v7455_v37 }
 0x30e   :  { %3743 = vmatpush1.bf16.msra.mxu0 %v7426_v38 }
 0x30f   :  { %3744 = vmatprep.subr.bf16.mxu0 %v7431_v39 }
 0x310   :  { %5050 = vmatpush1.bf16.msra.mxu1 %v7453_v40  ;;  %v7492_v40 = vld [vmem:[#allocation8 + $0x8] ss:$16 sps:$4 sm:$0xff]  }
 0x311   :  { %5051 = vmatprep.subr.bf16.mxu1 %v7458_v41  ;;  %v7497_v41 = vld [vmem:[#allocation8 + $0x2c] ss:$16 sps:$4 sm:$0xff]  }
 0x312   :  { %3745 = vmatpush1.bf16.msra.mxu0 %v7429_v42  ;;  %v7500_v42 = vld [vmem:[#allocation8 + $0x4c] ss:$16 sps:$4 sm:$0xff]  }
 0x313   :  { %3746 = vmatprep.subr.bf16.mxu0 %v7434_v43  ;;  %v7498_v43 = vld [vmem:[#allocation8 + $0x48] ss:$16 sps:$4 sm:$0xff]  }
 0x314   :  { %5052 = vmatpush1.bf16.msra.mxu1 %v7456_v44  ;;  %v7503_v44 = vld [vmem:[#allocation8 + $0x6c] ss:$16 sps:$4 sm:$0xff]  }
 0x315   :  { %5053 = vmatprep.subr.bf16.mxu1 %v7461_v45  ;;  %v7501_v45 = vld [vmem:[#allocation8 + $0x68] ss:$16 sps:$4 sm:$0xff]  }
 0x316   :  { %3747 = vmatpush1.bf16.msra.mxu0 %v7432_v46  ;;  %v7506_v46 = vld [vmem:[#allocation8 + $0x8c] ss:$16 sps:$4 sm:$0xff]  }
 0x317   :  { %3748 = vmatprep.subr.bf16.mxu0 %v7437_v47  ;;  %v7504_v47 = vld [vmem:[#allocation8 + $0x88] ss:$16 sps:$4 sm:$0xff]  }
 0x318   :  { %5054 = vmatpush1.bf16.msra.mxu1 %v7459_v48  ;;  %v7509_v48 = vld [vmem:[#allocation8 + $0xac] ss:$16 sps:$4 sm:$0xff]  }
 0x319   :  { %5055 = vmatprep.subr.bf16.mxu1 %v7464_v49  ;;  %v7507_v49 = vld [vmem:[#allocation8 + $0xa8] ss:$16 sps:$4 sm:$0xff]  }
 0x31a   :  { %3749 = vmatpush1.bf16.msra.mxu0 %v7435_v50  ;;  %v7512_v50 = vld [vmem:[#allocation8 + $0xcc] ss:$16 sps:$4 sm:$0xff]  }
 0x31b   :  { %3750 = vmatprep.subr.bf16.mxu0 %v7440_v51  ;;  %v7515_v51 = vld [vmem:[#allocation8 + $0xec] ss:$16 sps:$4 sm:$0xff]  }
 0x31c   :  { %5056 = vmatpush1.bf16.msra.mxu1 %v7462_v52  ;;  %v7513_v52 = vld [vmem:[#allocation8 + $0xe8] ss:$16 sps:$4 sm:$0xff]  }
 0x31d   :  { %5057 = vmatprep.subr.bf16.mxu1 %v7467_v53  ;;  %v7518_v53 = vld [vmem:[#allocation8 + $0x10c] ss:$16 sps:$4 sm:$0xff]  }
 0x31e   :  { %3751 = vmatpush1.bf16.msra.mxu0 %v7438_v54  ;;  %v7516_v54 = vld [vmem:[#allocation8 + $0x108] ss:$16 sps:$4 sm:$0xff]  }
 0x31f   :  { %3752 = vmatprep.subr.bf16.mxu0 %v7443_v55  ;;  %v7521_v55 = vld [vmem:[#allocation8 + $0x12c] ss:$16 sps:$4 sm:$0xff]  }
 0x320   :  { %5058 = vmatpush1.bf16.msra.mxu1 %v7465_v56  ;;  %v7519_v56 = vld [vmem:[#allocation8 + $0x128] ss:$16 sps:$4 sm:$0xff]  }
 0x321   :  { %5059 = vmatprep.subr.bf16.mxu1 %v7470_v57  ;;  %v7524_v57 = vld [vmem:[#allocation8 + $0x14c] ss:$16 sps:$4 sm:$0xff]  }
 0x322   :  { %3753 = vmatpush1.bf16.msra.mxu0 %v7441_v58  ;;  %v7522_v58 = vld [vmem:[#allocation8 + $0x148] ss:$16 sps:$4 sm:$0xff]  }
 0x324   :  { %5060 = vmatpush1.bf16.msra.mxu1 %v7468_v59  ;;  %v7527_v59 = vld [vmem:[#allocation8 + $0x16c] ss:$16 sps:$4 sm:$0xff]  }
 0x325   :  { %3755 = vmatmul.mubr.bf16.vlgmr.msra.gmra.mrb[4].mxu0 %v7685_v62  ;;  %5061 = vmatprep.subr.bf16.mxu1 %v7473_v60  ;;  %v7525_v60 = vld [vmem:[#allocation8 + $0x168] ss:$16 sps:$4 sm:$0xff]  }
 0x326   :  { %v7528_v62 = vld [vmem:[#allocation8 + $0x188] ss:$16 sps:$4 sm:$0xff]  }
 0x328   :  { %5062 = vmatpush1.bf16.msra.mxu1 %v7471_v61  ;;  %v7530_v61 = vld [vmem:[#allocation8 + $0x18c] ss:$16 sps:$4 sm:$0xff]  }
 0x329   :  { %5063 = vmatprep.subr.bf16.mxu1 %v7476_v63  ;;  %v7533_v63 = vld [vmem:[#allocation8 + $0x1ac] ss:$16 sps:$4 sm:$0xff]  }
 0x32c   :  { %5064 = vmatpush1.bf16.msra.mxu1 %v7474_v0  ;;  %v7531_v0 = vld [vmem:[#allocation8 + $0x1a8] ss:$16 sps:$4 sm:$0xff]  }
 0x32d   :  { %5065 = vmatprep.subr.bf16.mxu1 %v7479_v1  ;;  %v7536_v1 = vld [vmem:[#allocation8 + $0x1cc] ss:$16 sps:$4 sm:$0xff]  }
 0x330   :  { %5066 = vmatpush1.bf16.msra.mxu1 %v7477_v2  ;;  %v7534_v2 = vld [vmem:[#allocation8 + $0x1c8] ss:$16 sps:$4 sm:$0xff]  }
 0x331   :  { %5067 = vmatprep.subr.bf16.mxu1 %v7482_v3  ;;  %v7539_v3 = vld [vmem:[#allocation8 + $0x1ec] ss:$16 sps:$4 sm:$0xff]  }
 0x334   :  { %5068 = vmatpush1.bf16.msra.mxu1 %v7480_v4  ;;  %v7537_v4 = vld [vmem:[#allocation8 + $0x1e8] ss:$16 sps:$4 sm:$0xff]  }
 0x335   :  { %5069 = vmatprep.subr.bf16.mxu1 %v7485_v7  ;;  %v7542_v7 = vld [vmem:[#allocation8 + $0x20c] ss:$16 sps:$4 sm:$0xff]  }
 0x338   :  { %5070 = vmatpush1.bf16.msra.mxu1 %v7483_v10  ;;  %v7540_v10 = vld [vmem:[#allocation8 + $0x208] ss:$16 sps:$4 sm:$0xff]  }
 0x339   :  { %5071 = vmatprep.subr.bf16.mxu1 %v7488_v11  ;;  %v7636_v11 = vld [vmem:[#allocation11 + $0x40] sm:$0xff]  }
 0x33a   :  { %6434 = vmatprep.subr.bf16.mxu0 %v7636_v11  ;;  %v7600_v11 = vld [vmem:[#allocation8 + $0x488] ss:$16 sps:$4 sm:$0xff]  }
 0x33c   :  { %5072 = vmatpush1.bf16.msra.mxu1 %v7486_v12  ;;  %v7545_v12 = vld [vmem:[#allocation8 + $0x22c] ss:$16 sps:$4 sm:$0xff]  }
 0x33d   :  { %5073 = vmatprep.subr.bf16.mxu1 %v7491_v13  ;;  %v7637_v13 = vld [vmem:[#allocation11] sm:$0xff]  }
 0x33e   :  { %6435 = vmatpush3.bf16.msra.mxu0 %v7637_v13  ;;  %v7608_v13 = vld [vmem:[#allocation8 + $0x4cc] ss:$16 sps:$4 sm:$0xff]  }
 0x340   :  { %5074 = vmatpush1.bf16.msra.mxu1 %v7489_v14  ;;  %v7638_v14 = vld [vmem:[#allocation11 + $0x48] sm:$0xff]  }
 0x341   :  { %5086 = vmatprep.subr.bf16.mxu1 %v7494_v15  ;;  %v7639_v15 = vld [vmem:[#allocation11 + $0x8] sm:$0xff]   ;;  %6436 = vmatprep.subr.bf16.mxu0 %v7638_v14 }
 0x342   :  { %6437 = vmatpush3.bf16.msra.mxu0 %v7639_v15  ;;  %v7611_v14 = vld [vmem:[#allocation8 + $0x4ec] ss:$16 sps:$4 sm:$0xff]   ;;  %v7609_v15 = vld [vmem:[#allocation8 + $0x4e8] ss:$16 sps:$4 sm:$0xff]  }
 0x343   :  { %6438 = vmatprep.subr.bf16.mxu0 %v7640_v17  ;;  %v7612_v17 = vld [vmem:[#allocation8 + $0x508] ss:$16 sps:$4 sm:$0xff]  }
 0x3f8   :  { %v3756_v20 = vpop.f32.mrb[4].mxu0 }
 0x3f9   :  { %v6515_v21 = vadd.f32 %v3756_v20, %v659_v18  ;;  %v3758_v22 = vpop.f32.mrb[5].mxu0  ;;  %v7546_v20 = vld [vmem:[#allocation8 + $0x248] ss:$16 sps:$4 sm:$0xff]  }
 0x3fa   :  { %v6516_v23 = vadd.f32 %v3758_v22, %v663_v19  ;;  %v3760_v24 = vpop.f32.mrb[6].mxu0  ;;  %v7551_v22 = vld [vmem:[#allocation8 + $0x26c] ss:$16 sps:$4 sm:$0xff]  }
 0x3fb   :  { %v6517_v25 = vadd.f32 %v3760_v24, %v659_v18  ;;  %v3762_v27 = vpop.f32.mrb[7].mxu0  ;;  %v3769_v31 = vmax.f32 %v6515_v21, 0.0  ;;  %v7548_v18 = vld [vmem:[#allocation8 + $0x24c] ss:$16 sps:$4 sm:$0xff]   ;;  %v7644_v24 = vld [vmem:[#allocation11 + $0x60] sm:$0xff]  }
 0x3fc   :  { %v6518_v28 = vadd.f32 %v3762_v27, %v663_v19  ;;  %v3770_v36 = vmax.f32 %v6516_v23, 0.0  ;;  %v7641_v19 = vld [vmem:[#allocation11 + $0x10] sm:$0xff]   ;;  %v7642_v21 = vld [vmem:[#allocation11 + $0x58] sm:$0xff]  }
 0x3fd   :  { %v3775_v35 = vmax.f32 %v6517_v25, 0.0  ;;  %6439 = vmatpush3.bf16.msra.mxu0 %v7641_v19  ;;  %v7549_v23 = vld [vmem:[#allocation8 + $0x268] ss:$16 sps:$4 sm:$0xff]  }
 0x3fe   :  { %v3776_v37 = vmax.f32 %v6518_v28, 0.0  ;;  %6440 = vmatprep.subr.bf16.mxu0 %v7642_v21  ;;  %v7645_v25 = vld [vmem:[#allocation11 + $0x20] sm:$0xff]   ;;  %v7646_v28 = vld [vmem:[#allocation11 + $0x68] sm:$0xff]  }
 0x3ff   :  { %v8134_v38 = vpack.c.bf16 %v3775_v35, %v3769_v31  ;;  %v7552_v27 = vld [vmem:[#allocation8 + $0x288] ss:$16 sps:$4 sm:$0xff]   ;;  %v7557_v31 = vld [vmem:[#allocation8 + $0x2ac] ss:$16 sps:$4 sm:$0xff]  }
 0x400   :  { %v8136_v39 = vpack.c.bf16 %v3776_v37, %v3770_v36  ;;  %v7555_v35 = vld [vmem:[#allocation8 + $0x2a8] ss:$16 sps:$4 sm:$0xff]   ;;  %v7560_v36 = vld [vmem:[#allocation8 + $0x2cc] ss:$16 sps:$4 sm:$0xff]  }
 0x401   :  { %v7647_v37 = vld [vmem:[#allocation11 + $0x28] sm:$0xff]   ;;  %v7615_v19 = vld [vmem:[#allocation8 + $0x528] ss:$16 sps:$4 sm:$0xff]  }
 0x402   :  { %5075 = vmatprep.mubr.bf16.mxu1 %v8136_v39  ;;  %v7618_v21 = vld [vmem:[#allocation8 + $0x548] ss:$16 sps:$4 sm:$0xff]  }
 0x403   :  { %5076 = vmatmul.mubr.bf16.vlgmr.msra.gmra.mrb[4].mxu1 %v8134_v38 }
 0x404   :  { %5087 = vmatpush1.bf16.msra.mxu1 %v7492_v40  ;;  %5118 = vmatprep.mubr.bf16.mxu1 %v8122_v8  ;;  %v7510_v8 = vld [vmem:[#allocation8 + $0xc8] ss:$16 sps:$4 sm:$0xff]  }
 0x405   :  { %5088 = vmatprep.subr.bf16.mxu1 %v7497_v41  ;;  %v7558_v40 = vld [vmem:[#allocation8 + $0x2c8] ss:$16 sps:$4 sm:$0xff]  }
 0x406   :  { %v7648_v41 = vld [vmem:[#allocation11 + $0x70] sm:$0xff]  }
 0x408   :  { %5089 = vmatpush1.bf16.msra.mxu1 %v7495_v32  ;;  %v7563_v32 = vld [vmem:[#allocation8 + $0x2ec] ss:$16 sps:$4 sm:$0xff]  }
 0x409   :  { %5090 = vmatprep.subr.bf16.mxu1 %v7500_v42  ;;  %v7649_v42 = vld [vmem:[#allocation11 + $0x30] sm:$0xff]  }
 0x40c   :  { %5091 = vmatpush1.bf16.msra.mxu1 %v7498_v43  ;;  %v7561_v43 = vld [vmem:[#allocation8 + $0x2e8] ss:$16 sps:$4 sm:$0xff]  }
 0x40d   :  { %5092 = vmatprep.subr.bf16.mxu1 %v7503_v44  ;;  %v7650_v44 = vld [vmem:[#allocation11 + $0x78] sm:$0xff]  }
 0x410   :  { %5093 = vmatpush1.bf16.msra.mxu1 %v7501_v45  ;;  %v7566_v45 = vld [vmem:[#allocation8 + $0x30c] ss:$16 sps:$4 sm:$0xff]  }
 0x411   :  { %5094 = vmatprep.subr.bf16.mxu1 %v7506_v46  ;;  %v7651_v46 = vld [vmem:[#allocation11 + $0x38] sm:$0xff]  }
 0x414   :  { %5095 = vmatpush1.bf16.msra.mxu1 %v7504_v47  ;;  %v7564_v47 = vld [vmem:[#allocation8 + $0x308] ss:$16 sps:$4 sm:$0xff]  }
 0x415   :  { %5096 = vmatprep.subr.bf16.mxu1 %v7509_v48  ;;  %v7569_v48 = vld [vmem:[#allocation8 + $0x32c] ss:$16 sps:$4 sm:$0xff]  }
 0x418   :  { %5097 = vmatpush1.bf16.msra.mxu1 %v7507_v49  ;;  %v7652_v49 = vld [vmem:[#allocation11 + $0xc0] sm:$0xff]  }
 0x419   :  { %5098 = vmatprep.subr.bf16.mxu1 %v7512_v50  ;;  %v7567_v50 = vld [vmem:[#allocation8 + $0x328] ss:$16 sps:$4 sm:$0xff]  }
 0x41c   :  { %5099 = vmatpush1.bf16.msra.mxu1 %v7510_v8  ;;  %v7572_v8 = vld [vmem:[#allocation8 + $0x34c] ss:$16 sps:$4 sm:$0xff]  }
 0x41d   :  { %5100 = vmatprep.subr.bf16.mxu1 %v7515_v51  ;;  %v7570_v51 = vld [vmem:[#allocation8 + $0x348] ss:$16 sps:$4 sm:$0xff]  }
 0x420   :  { %5101 = vmatpush1.bf16.msra.mxu1 %v7513_v52  ;;  %v7575_v52 = vld [vmem:[#allocation8 + $0x36c] ss:$16 sps:$4 sm:$0xff]  }
 0x421   :  { %5102 = vmatprep.subr.bf16.mxu1 %v7518_v53  ;;  %v7573_v53 = vld [vmem:[#allocation8 + $0x368] ss:$16 sps:$4 sm:$0xff]  }
 0x424   :  { %5103 = vmatpush1.bf16.msra.mxu1 %v7516_v54  ;;  %v7578_v54 = vld [vmem:[#allocation8 + $0x38c] ss:$16 sps:$4 sm:$0xff]  }
 0x425   :  { %5104 = vmatprep.subr.bf16.mxu1 %v7521_v55  ;;  %v7576_v55 = vld [vmem:[#allocation8 + $0x388] ss:$16 sps:$4 sm:$0xff]  }
 0x428   :  { %5105 = vmatpush1.bf16.msra.mxu1 %v7519_v56  ;;  %v7581_v56 = vld [vmem:[#allocation8 + $0x3ac] ss:$16 sps:$4 sm:$0xff]  }
 0x429   :  { %5106 = vmatprep.subr.bf16.mxu1 %v7524_v57  ;;  %v7579_v57 = vld [vmem:[#allocation8 + $0x3a8] ss:$16 sps:$4 sm:$0xff]  }
 0x42c   :  { %5107 = vmatpush1.bf16.msra.mxu1 %v7522_v58  ;;  %v7584_v58 = vld [vmem:[#allocation8 + $0x3cc] ss:$16 sps:$4 sm:$0xff]  }
 0x42d   :  { %5108 = vmatprep.subr.bf16.mxu1 %v7527_v59  ;;  %v7582_v59 = vld [vmem:[#allocation8 + $0x3c8] ss:$16 sps:$4 sm:$0xff]  }
 0x430   :  { %5109 = vmatpush1.bf16.msra.mxu1 %v7525_v60  ;;  %v7587_v60 = vld [vmem:[#allocation8 + $0x3ec] ss:$16 sps:$4 sm:$0xff]  }
 0x431   :  { %5110 = vmatprep.subr.bf16.mxu1 %v7530_v61  ;;  %v7585_v61 = vld [vmem:[#allocation8 + $0x3e8] ss:$16 sps:$4 sm:$0xff]  }
 0x434   :  { %5111 = vmatpush1.bf16.msra.mxu1 %v7528_v62  ;;  %v7590_v62 = vld [vmem:[#allocation8 + $0x40c] ss:$16 sps:$4 sm:$0xff]  }
 0x435   :  { %5112 = vmatprep.subr.bf16.mxu1 %v7533_v63  ;;  %v7588_v63 = vld [vmem:[#allocation8 + $0x408] ss:$16 sps:$4 sm:$0xff]  }
 0x438   :  { %5113 = vmatpush1.bf16.msra.mxu1 %v7531_v0  ;;  %v7593_v0 = vld [vmem:[#allocation8 + $0x42c] ss:$16 sps:$4 sm:$0xff]  }
 0x439   :  { %5114 = vmatprep.subr.bf16.mxu1 %v7536_v1  ;;  %v7591_v1 = vld [vmem:[#allocation8 + $0x428] ss:$16 sps:$4 sm:$0xff]  }
 0x43c   :  { %5115 = vmatpush1.bf16.msra.mxu1 %v7534_v2  ;;  %v7596_v2 = vld [vmem:[#allocation8 + $0x44c] ss:$16 sps:$4 sm:$0xff]  }
 0x43d   :  { %5116 = vmatprep.subr.bf16.mxu1 %v7539_v3  ;;  %v7594_v3 = vld [vmem:[#allocation8 + $0x448] ss:$16 sps:$4 sm:$0xff]  }
 0x440   :  { %5117 = vmatpush1.bf16.msra.mxu1 %v7537_v4  ;;  %v7599_v4 = vld [vmem:[#allocation8 + $0x46c] ss:$16 sps:$4 sm:$0xff]  }
 0x441   :  { %5129 = vmatprep.subr.bf16.mxu1 %v7542_v7  ;;  %v7597_v7 = vld [vmem:[#allocation8 + $0x468] ss:$16 sps:$4 sm:$0xff]  }
 0x443   :  { %5119 = vmatmul.mubr.bf16.vlgmr.msra.gmra.mrb[8].mxu1 %v8118_v5  ;;  %v7643_v5 = vld [vmem:[#allocation11 + $0x18] sm:$0xff]  }
 0x444   :  { %5130 = vmatpush1.bf16.msra.mxu1 %v7540_v10  ;;  %5161 = vmatprep.mubr.bf16.mxu1 %v8124_v9  ;;  %v7554_v9 = vld [vmem:[#allocation8 + $0x28c] ss:$16 sps:$4 sm:$0xff]  }
 0x445   :  { %5131 = vmatprep.subr.bf16.mxu1 %v7545_v12  ;;  %6441 = vmatpush3.bf16.msra.mxu0 %v7643_v5  ;;  %v7602_v10 = vld [vmem:[#allocation8 + $0x48c] ss:$16 sps:$4 sm:$0xff]   ;;  %v7621_v5 = vld [vmem:[#allocation8 + $0x568] ss:$16 sps:$4 sm:$0xff]  }
 0x446   :  { %6442 = vmatprep.subr.bf16.mxu0 %v7644_v24  ;;  %v7605_v12 = vld [vmem:[#allocation8 + $0x4ac] ss:$16 sps:$4 sm:$0xff]   ;;  %v7624_v24 = vld [vmem:[#allocation8 + $0x588] ss:$16 sps:$4 sm:$0xff]  }
 0x448   :  { %5132 = vmatpush1.bf16.msra.mxu1 %v7543_v16  ;;  %v7614_v16 = vld [vmem:[#allocation8 + $0x50c] ss:$16 sps:$4 sm:$0xff]  }
 0x449   :  { %5133 = vmatprep.subr.bf16.mxu1 %v7548_v18  ;;  %6443 = vmatpush3.bf16.msra.mxu0 %v7645_v25  ;;  %v7617_v18 = vld [vmem:[#allocation8 + $0x52c] ss:$16 sps:$4 sm:$0xff]   ;;  %v7627_v25 = vld [vmem:[#allocation8 + $0x5a8] ss:$16 sps:$4 sm:$0xff]  }
 0x44a   :  { %6444 = vmatprep.subr.bf16.mxu0 %v7646_v28  ;;  %v7630_v28 = vld [vmem:[#allocation8 + $0x5c8] ss:$16 sps:$4 sm:$0xff]  }
 0x44c   :  { %5134 = vmatpush1.bf16.msra.mxu1 %v7546_v20  ;;  %v7620_v20 = vld [vmem:[#allocation8 + $0x54c] ss:$16 sps:$4 sm:$0xff]  }
 0x44d   :  { %5135 = vmatprep.subr.bf16.mxu1 %v7551_v22  ;;  %6445 = vmatpush3.bf16.msra.mxu0 %v7647_v37  ;;  %v7623_v22 = vld [vmem:[#allocation8 + $0x56c] ss:$16 sps:$4 sm:$0xff]  }
 0x44e   :  { %6446 = vmatprep.subr.bf16.mxu0 %v7648_v41 }
 0x450   :  { %5136 = vmatpush1.bf16.msra.mxu1 %v7549_v23  ;;  %v7626_v23 = vld [vmem:[#allocation8 + $0x58c] ss:$16 sps:$4 sm:$0xff]  }
 0x451   :  { %5137 = vmatprep.subr.bf16.mxu1 %v7554_v9  ;;  %6447 = vmatpush3.bf16.msra.mxu0 %v7649_v42  ;;  %v7629_v9 = vld [vmem:[#allocation8 + $0x5ac] ss:$16 sps:$4 sm:$0xff]  }
 0x452   :  { %6448 = vmatprep.subr.bf16.mxu0 %v7650_v44 }
 0x454   :  { %5138 = vmatpush1.bf16.msra.mxu1 %v7552_v27  ;;  %v7632_v27 = vld [vmem:[#allocation8 + $0x5cc] ss:$16 sps:$4 sm:$0xff]  }
 0x455   :  { %5139 = vmatprep.subr.bf16.mxu1 %v7557_v31  ;;  %6449 = vmatpush3.bf16.msra.mxu0 %v7651_v46  ;;  %v7635_v31 = vld [vmem:[#allocation8 + $0x5ec] ss:$16 sps:$4 sm:$0xff]  }
 0x456   :  { %6456 = vmatprep.subr.bf16.mxu0 %v7652_v49 }
 0x458   :  { %5140 = vmatpush1.bf16.msra.mxu1 %v7555_v35  ;;  %v7633_v35 = vld [vmem:[#allocation8 + $0x5e8] ss:$16 sps:$4 sm:$0xff]  }
 0x459   :  { %5141 = vmatprep.subr.bf16.mxu1 %v7560_v36  ;;  %v3975_v36 = vld [vmem:[#allocation10] sm:$0xf] }
 0x45a   :  { %v3980_v37 = vrot.slane %v3975_v36, %v642_v29  ;;  %v7655_v29 = vld [vmem:[#allocation11 + $0x88] sm:$0xff]  }
 0x45c   :  { %5142 = vmatpush1.bf16.msra.mxu1 %v7558_v40  ;;  %v3984_v40 = vrot.slane %v3975_v36, %v646_v33  ;;  %v7656_v33 = vld [vmem:[#allocation11 + $0xd0] sm:$0xff]  }
 0x45d   :  { %5143 = vmatprep.subr.bf16.mxu1 %v7563_v32 }
 0x460   :  { %5144 = vmatpush1.bf16.msra.mxu1 %v7561_v43 }
 0x461   :  { %5145 = vmatprep.subr.bf16.mxu1 %v7566_v45 }
 0x464   :  { %5146 = vmatpush1.bf16.msra.mxu1 %v7564_v47 }
 0x465   :  { %5147 = vmatprep.subr.bf16.mxu1 %v7569_v48 }
 0x468   :  { %5148 = vmatpush1.bf16.msra.mxu1 %v7567_v50 }
 0x469   :  { %5149 = vmatprep.subr.bf16.mxu1 %v7572_v8 }
 0x46c   :  { %5150 = vmatpush1.bf16.msra.mxu1 %v7570_v51 }
 0x46d   :  { %5151 = vmatprep.subr.bf16.mxu1 %v7575_v52  ;;  %v7653_v52 = vld [vmem:[#allocation11 + $0x80] sm:$0xff]  }
 0x470   :  { %5152 = vmatpush1.bf16.msra.mxu1 %v7573_v53  ;;  %v7654_v53 = vld [vmem:[#allocation11 + $0xc8] sm:$0xff]  }
 0x471   :  { %5153 = vmatprep.subr.bf16.mxu1 %v7578_v54  ;;  %v7657_v54 = vld [vmem:[#allocation11 + $0x90] sm:$0xff]  }
 0x474   :  { %5154 = vmatpush1.bf16.msra.mxu1 %v7576_v55  ;;  %v7658_v55 = vld [vmem:[#allocation11 + $0xd8] sm:$0xff]  }
 0x475   :  { %5155 = vmatprep.subr.bf16.mxu1 %v7581_v56  ;;  %v7659_v56 = vld [vmem:[#allocation11 + $0x98] sm:$0xff]  }
 0x478   :  { %5156 = vmatpush1.bf16.msra.mxu1 %v7579_v57  ;;  %v7660_v57 = vld [vmem:[#allocation11 + $0xe0] sm:$0xff]  }
 0x479   :  { %5157 = vmatprep.subr.bf16.mxu1 %v7584_v58  ;;  %v7661_v58 = vld [vmem:[#allocation11 + $0xa0] sm:$0xff]  }
 0x47c   :  { %5158 = vmatpush1.bf16.msra.mxu1 %v7582_v59  ;;  %v7662_v59 = vld [vmem:[#allocation11 + $0xe8] sm:$0xff]  }
 0x47d   :  { %5159 = vmatprep.subr.bf16.mxu1 %v7587_v60  ;;  %v7663_v60 = vld [vmem:[#allocation11 + $0xa8] sm:$0xff]  }
 0x480   :  { %5160 = vmatpush1.bf16.msra.mxu1 %v7585_v61  ;;  %v7664_v61 = vld [vmem:[#allocation11 + $0xf0] sm:$0xff]  }
 0x481   :  { %5172 = vmatprep.subr.bf16.mxu1 %v7590_v62  ;;  %v7665_v62 = vld [vmem:[#allocation11 + $0xb0] sm:$0xff]  }
 0x483   :  { %5162 = vmatmul.mubr.bf16.vlgmr.msra.gmra.mrb[8].mxu1 %v8120_v6  ;;  %v7603_v6 = vld [vmem:[#allocation8 + $0x4a8] ss:$16 sps:$4 sm:$0xff]  }
 0x484   :  { %5173 = vmatpush1.bf16.msra.mxu1 %v7588_v63  ;;  %5204 = vmatprep.mubr.bf16.mxu1 %v8136_v39  ;;  %v7606_v39 = vld [vmem:[#allocation8 + $0x4c8] ss:$16 sps:$4 sm:$0xff]   ;;  %v7666_v63 = vld [vmem:[#allocation11 + $0xf8] sm:$0xff]  }
 0x485   :  { %5174 = vmatprep.subr.bf16.mxu1 %v7593_v0  ;;  %v7667_v0 = vld [vmem:[#allocation11 + $0xb8] sm:$0xff]  }
 0x488   :  { %5175 = vmatpush1.bf16.msra.mxu1 %v7591_v1  ;;  %v7935_v1 = vmov 0.0  }
 0x489   :  { %5176 = vmatprep.subr.bf16.mxu1 %v7596_v2  ;;  %v3988_v2 = vrot.slane %v3975_v36, %v650_v30  ;;  %v7670_v30 = vld [vmem:[#allocation14 + $0x10] sm:$0xff]  }
 0x48c   :  { %5177 = vmatpush1.bf16.msra.mxu1 %v7594_v3  ;;  %v3992_v3 = vrot.slane %v3975_v36, %v654_v34  ;;  %v7671_v34 = vld [vmem:[#allocation14 + $0x18] sm:$0xff]  }
 0x48d   :  { %5178 = vmatprep.subr.bf16.mxu1 %v7599_v4 }
 0x490   :  { %5179 = vmatpush1.bf16.msra.mxu1 %v7597_v7 }
 0x491   :  { %5180 = vmatprep.subr.bf16.mxu1 %v7602_v10 }
 0x494   :  { %5181 = vmatpush1.bf16.msra.mxu1 %v7600_v11 }
 0x495   :  { %5182 = vmatprep.subr.bf16.mxu1 %v7605_v12 }
 0x498   :  { %5183 = vmatpush1.bf16.msra.mxu1 %v7603_v6 }
 0x499   :  { %5184 = vmatprep.subr.bf16.mxu1 %v7608_v13 }
 0x49c   :  { %5185 = vmatpush1.bf16.msra.mxu1 %v7606_v39 }
 0x49d   :  { %5186 = vmatprep.subr.bf16.mxu1 %v7611_v14 }
 0x4a0   :  { %5187 = vmatpush1.bf16.msra.mxu1 %v7609_v15 }
 0x4a1   :  { %5188 = vmatprep.subr.bf16.mxu1 %v7614_v16 }
 0x4a4   :  { %5189 = vmatpush1.bf16.msra.mxu1 %v7612_v17 }
 0x4a5   :  { %5190 = vmatprep.subr.bf16.mxu1 %v7617_v18 }
 0x4a8   :  { %5191 = vmatpush1.bf16.msra.mxu1 %v7615_v19 }
 0x4a9   :  { %5192 = vmatprep.subr.bf16.mxu1 %v7620_v20  ;;  %v7668_v20 = vld [vmem:[#allocation14] sm:$0xff]  }
 0x4ac   :  { %5193 = vmatpush1.bf16.msra.mxu1 %v7618_v21  ;;  %v7672_v21 = vld [vmem:[#allocation14 + $0x20] sm:$0xff]  }
 0x4ad   :  { %5194 = vmatprep.subr.bf16.mxu1 %v7623_v22 }
 0x4b0   :  { %5195 = vmatpush1.bf16.msra.mxu1 %v7621_v5 }
 0x4b1   :  { %5196 = vmatprep.subr.bf16.mxu1 %v7626_v23 }
 0x4b4   :  { %5197 = vmatpush1.bf16.msra.mxu1 %v7624_v24 }
 0x4b5   :  { %5198 = vmatprep.subr.bf16.mxu1 %v7629_v9 }
 0x4b8   :  { %5199 = vmatpush1.bf16.msra.mxu1 %v7627_v25 }
 0x4b9   :  { %5200 = vmatprep.subr.bf16.mxu1 %v7632_v27  ;;  %v7673_v27 = vld [vmem:[#allocation14 + $0x28] sm:$0xff]  }
 0x4bc   :  { %5201 = vmatpush1.bf16.msra.mxu1 %v7630_v28  ;;  %v7674_v28 = vld [vmem:[#allocation14 + $0x30] sm:$0xff]  }
 0x4bd   :  { %5202 = vmatprep.subr.bf16.mxu1 %v7635_v31  ;;  %v7675_v31 = vld [vmem:[#allocation14 + $0x38] sm:$0xff]  }
 0x4c0   :  { %5203 = vmatpush1.bf16.msra.mxu1 %v7633_v35  ;;  %v6392_v35 = vld [vmem:[#allocation13] ss:$0 sm:$0xff] }
 0x4c3   :  { %5205 = vmatmul.mubr.bf16.vlgmr.msra.gmra.mrb[8].mxu1 %v8134_v38 }
 0x4d6   :  { %v5077_v41 = vpop.f32.mrb[4].mxu1 }
 0x4d7   :  { %v6519_v32 = vadd.f32 %v5077_v41, %v3980_v37  ;;  %v5079_v42 = vpop.f32.mrb[5].mxu1 }
 0x4d8   :  { %v6520_v43 = vadd.f32 %v5079_v42, %v3984_v40  ;;  %v5081_v44 = vpop.f32.mrb[6].mxu1 }
 0x4d9   :  { %v6521_v45 = vadd.f32 %v5081_v44, %v3980_v37  ;;  %v5083_v46 = vpop.f32.mrb[7].mxu1  ;;  %v5215_v48 = vmax.f32 %v6519_v32, 0.0 }
 0x4da   :  { %v6522_v47 = vadd.f32 %v5083_v46, %v3984_v40  ;;  %v5216_v50 = vmax.f32 %v6520_v43, 0.0 }
 0x4db   :  { %v5219_v49 = vmax.f32 %v6521_v45, 0.0 }
 0x4dc   :  { %v5220_v8 = vmax.f32 %v6522_v47, 0.0 }
 0x4dd   :  { %v5223_v38 = vpack.c.bf16 %v5219_v49, %v5215_v48 }
 0x4de   :  { %v5224_v51 = vpack.c.bf16 %v5220_v8, %v5216_v50  ;;  %v6425_v50 = vld [vmem:[#allocation16] ss:$0 sm:$0xff] }
 0x4e0   :  { %5522 = vmatprep.mubr.bf16.mxu0 %v5224_v51 }
 0x4e1   :  { %5523 = vmatmul.mubr.bf16.vlgmr.msra.gmra.mrb[8].mxu0 %v5223_v38 }
 0x4e2   :  { %6457 = vmatpush3.bf16.msra.mxu0 %v7653_v52 }
 0x4e3   :  { %6458 = vmatprep.subr.bf16.mxu0 %v7654_v53 }
 0x4e6   :  { %6459 = vmatpush3.bf16.msra.mxu0 %v7655_v29 }
 0x4e7   :  { %6460 = vmatprep.subr.bf16.mxu0 %v7656_v33 }
 0x4ea   :  { %6461 = vmatpush3.bf16.msra.mxu0 %v7657_v54 }
 0x4eb   :  { %6462 = vmatprep.subr.bf16.mxu0 %v7658_v55 }
 0x4ee   :  { %6463 = vmatpush3.bf16.msra.mxu0 %v7659_v56 }
 0x4ef   :  { %6464 = vmatprep.subr.bf16.mxu0 %v7660_v57 }
 0x4f2   :  { %6465 = vmatpush3.bf16.msra.mxu0 %v7661_v58 }
 0x4f3   :  { %6466 = vmatprep.subr.bf16.mxu0 %v7662_v59 }
 0x4f6   :  { %6467 = vmatpush3.bf16.msra.mxu0 %v7663_v60 }
 0x4f7   :  { %6468 = vmatprep.subr.bf16.mxu0 %v7664_v61 }
 0x4fa   :  { %6469 = vmatpush3.bf16.msra.mxu0 %v7665_v62 }
 0x4fb   :  { %6470 = vmatprep.subr.bf16.mxu0 %v7666_v63 }
 0x4fe   :  { %6471 = vmatpush3.bf16.msra.mxu0 %v7667_v0 }
 0x4ff   :  { %6487 = vmatprep.subr.bf16.mxu0 %v7935_v1 }
 0x596   :  { %v5206_v4 = vpop.f32.mrb[8].mxu1 }
 0x597   :  { %v6523_v7 = vadd.f32 %v5206_v4, %v3988_v2  ;;  %v5208_v10 = vpop.f32.mrb[9].mxu1 }
 0x598   :  { %v6524_v11 = vadd.f32 %v5208_v10, %v3992_v3  ;;  %v5210_v12 = vpop.f32.mrb[10].mxu1 }
 0x599   :  { %v6525_v6 = vadd.f32 %v5210_v12, %v3988_v2  ;;  %v5212_v13 = vpop.f32.mrb[11].mxu1  ;;  %v5217_v14 = vmax.f32 %v6523_v7, 0.0 }
 0x59a   :  { %v6526_v39 = vadd.f32 %v5212_v13, %v3992_v3  ;;  %v5218_v16 = vmax.f32 %v6524_v11, 0.0 }
 0x59b   :  { %v5221_v15 = vmax.f32 %v6525_v6, 0.0 }
 0x59c   :  { %v5222_v17 = vmax.f32 %v6526_v39, 0.0 }
 0x59d   :  { %v5225_v18 = vpack.c.bf16 %v5221_v15, %v5217_v14 }
 0x59e   :  { %v5226_v19 = vpack.c.bf16 %v5222_v17, %v5218_v16 }
 0x5a0   :  { %5563 = vmatprep.mubr.bf16.mxu0 %v5226_v19 }
 0x5a1   :  { %5564 = vmatmul.mubr.bf16.vlgmr.msra.gmra.mrb[12].mxu0 %v5225_v18 }
 0x5a2   :  { %6488 = vmatpush3.bf16.msra.mxu0 %v7668_v20  ;;  %6503 = vmatprep.mubr.msk.bf16.mxu0 %vm7936_vm0, %v7935_v1 }
 0x5a3   :  { %6489 = vmatprep.subr.bf16.mxu0 %v7935_v1 }
 0x5a6   :  { %6490 = vmatpush3.bf16.msra.mxu0 %v7669_v26 }
 0x5a7   :  { %6491 = vmatprep.subr.bf16.mxu0 %v7935_v1 }
 0x5aa   :  { %6492 = vmatpush3.bf16.msra.mxu0 %v7670_v30 }
 0x5ab   :  { %6493 = vmatprep.subr.bf16.mxu0 %v7935_v1 }
 0x5ae   :  { %6494 = vmatpush3.bf16.msra.mxu0 %v7671_v34 }
 0x5af   :  { %6495 = vmatprep.subr.bf16.mxu0 %v7935_v1 }
 0x5b2   :  { %6496 = vmatpush3.bf16.msra.mxu0 %v7672_v21 }
 0x5b3   :  { %6497 = vmatprep.subr.bf16.mxu0 %v7935_v1 }
 0x5b4   :  { %v6450_v22 = vpop.f32.mrb[8].mxu0 }
 0x5b5   :  { %v6451_v5 = vpop.f32.mrb[9].mxu0 }
 0x5b6   :  { %v6452_v23 = vadd.f32 %v6451_v5, %v6450_v22  ;;  %v6453_v24 = vpop.f32.mrb[10].mxu0  ;;  %6498 = vmatpush3.bf16.msra.mxu0 %v7673_v27 }
 0x5b7   :  { %v6454_v9 = vpop.f32.mrb[11].mxu0  ;;  %6499 = vmatprep.subr.bf16.mxu0 %v7935_v1 }
 0x5b8   :  { %v6455_v25 = vadd.f32 %v6454_v9, %v6453_v24  ;;  %v5525_v40 = vadd.f32 %v6452_v23, %v6392_v35 }
 0x5ba   :  { %6500 = vmatpush3.bf16.msra.mxu0 %v7674_v28  ;;  %v5528_v43 = vadd.f32 %v6455_v25, %v6392_v35 }
 0x5bb   :  { %6501 = vmatprep.subr.bf16.mxu0 %v7935_v1 }
 0x5be   :  { %6502 = vmatpush3.bf16.msra.mxu0 %v7675_v31 }
 0x674   :  { %v6472_v36 = vpop.f32.mrb[12].mxu0 }
 0x675   :  { %v6473_v37 = vpop.f32.mrb[13].mxu0 }
 0x676   :  { %v6474_v41 = vadd.f32 %v6473_v37, %v6472_v36  ;;  %v6475_v32 = vpop.f32.mrb[14].mxu0 }
 0x677   :  { %v6476_v42 = vpop.f32.mrb[15].mxu0 }
 0x678   :  { %v5566_v44 = vadd.f32 %v6474_v41, %v5525_v40  ;;  %v6477_v45 = vadd.f32 %v6476_v42, %v6475_v32 }
 0x67a   :  { %v5569_v46 = vadd.f32 %v6477_v45, %v5528_v43  ;;  %v5572_v47 = vmax.f32 %v5566_v44, 0.0 }
 0x67c   :  { %v5573_v48 = vmax.f32 %v5569_v46, 0.0 }
 0x67e   :  { %v5574_v49 = vpack.c.bf16 %v5573_v48, %v5572_v47 }
 0x680   :  { %6504 = vmatmul.mubr.bf16.vlgmr.msra.gmra.mrb[16].mxu0 %v5574_v49 }
 0x753   :  { %v5680_v8 = vpop.f32.mrb[16].mxu0 }
 0x754   :  { %v5681_v38 = vadd.f32 %v6425_v50, %v5680_v8  ;;  %v6505_v51 = vpop.f32.mrb[17].mxu0 }
 0x755   :  { %v5683_v52 = vpop.f32.mrb[18].mxu0 }
 0x756   :  { %5687 = vst [vmem:[#allocation17] sm:$0xff] %v5681_v38  ;;  %v5684_v53 = vadd.f32 %v6425_v50, %v5683_v52  ;;  %v6506_v29 = vpop.f32.mrb[19].mxu0 }
 0x758   :  { %5688 = vst [vmem:[#allocation17 + $0x8] sm:$0xff] %v5684_v53 }
 0x759   :  { %7895 = shalt.err (!%p7892_p6)
}
 0x75a   :  { %s7896_s24 = scalar_lea.hbm %s8175_s9, 256 }
 0x75b   :  { %p7897_p7 = scmp.ne.s32.totalorder %s8175_s9, %s7896_s24  ;;  %p7900_p8 = scmp.lt.u32.totalorder %s7896_s24, %s8175_s9 }
 0x75d   :  { %p7902_p9 = pnand %p7900_p8, %p7897_p7 }
 0x75f   :  { %7905 = shalt.err (!%p7902_p9)
}
 0x760   :  { %s7938_s10 = smov 128   ;;  %s7939_s13 = smov 8  }
 0x761   :  { %5700 = dma.vmem_to_hbm [thread:$0]  %s5695_s27, 256, %s8175_s9, [#allocation4], %s7938_s10, %s7938_s10, %s7939_s13  }
 0x762   :  { %7916 = dma.done.wait [#allocation4], 256  }
 0x763   :  { %7917 = vsyncadd [#allocation4], 4294967040 }
 0x764   :  { %5704 = vsyncpa [#allocation3], 1 }
 0x765   :  { %5705 = vsyncpa [#allocation6], 1 }
 0x766   :  { %5706 = vsyncpa [#allocation9], 1 }
 0x767   :  { %5707 = vsyncpa [#allocation12], 1 }
 0x768   :  { %5708 = vsyncpa [#allocation15], 1 }
 0x769   :  { %5709 = vsyncpa [#allocation4], 1 }

</bundles_post_ra>
